<compile_context>
chip_gen: v7x
topology: tpu7x:2x2x1
jax: 0.10.0
libtpu: 0.0.40
codegen_flags: <defaults>
</compile_context>

<pallas_src>
import functools

import jax
import jax.numpy as jnp
from jax.experimental import pallas as pl
from jax.experimental.pallas import tpu as pltpu

EPS = 1e-5


def _round_up(x, m):
    return ((x + m - 1) // m) * m


# --------------------------------------------------------------------------
# Pallas kernels
# --------------------------------------------------------------------------
def _matmul_bn_kernel(a_ref, w_ref, b_ref, *rest, relu, has_res):
    # a: (tm, tk) bf16   w: (tk, C) bf16 (BN scale folded in)
    # b: (1, C) f32      optional res: (tm, C) f32      o: (tm, C) f32
    if has_res:
        res_ref, o_ref, acc_ref = rest
    else:
        o_ref, acc_ref = rest
    k = pl.program_id(1)

    @pl.when(k == 0)
    def _():
        acc_ref[...] = jnp.zeros_like(acc_ref)

    acc_ref[...] += jnp.dot(
        a_ref[...], w_ref[...], preferred_element_type=jnp.float32
    )

    @pl.when(k == pl.num_programs(1) - 1)
    def _():
        y = acc_ref[...] + b_ref[...]
        if has_res:
            y = y + res_ref[...]
        if relu:
            y = jnp.maximum(y, 0.0)
        o_ref[...] = y


def matmul_bn(a, w, bias, relu, residual=None):
    """a:(M,K) f32, w:(K,C) f32 (scale pre-folded), bias:(C,) f32.
    Optional residual:(M,C) f32 fused into the epilogue. Returns (M,C) f32."""
    M, K = a.shape
    _, C = w.shape

    tm = 256 if M >= 256 else _round_up(max(M, 1), 8)
    Mp = _round_up(M, tm)
    Kp = _round_up(K, 128)
    tk = 512 if Kp % 512 == 0 else (256 if Kp % 256 == 0 else 128)

    a_p = jnp.pad(a, ((0, Mp - M), (0, Kp - K))).astype(jnp.bfloat16)
    w_p = jnp.pad(w, ((0, Kp - K), (0, 0))).astype(jnp.bfloat16)
    b2 = bias.reshape(1, C).astype(jnp.float32)

    has_res = residual is not None
    operands = [a_p, w_p, b2]
    in_specs = [
        pl.BlockSpec((tm, tk), lambda i, k: (i, k)),
        pl.BlockSpec((tk, C), lambda i, k: (k, 0)),
        pl.BlockSpec((1, C), lambda i, k: (0, 0)),
    ]
    if has_res:
        res_p = jnp.pad(residual, ((0, Mp - M), (0, 0))).astype(jnp.float32)
        operands.append(res_p)
        in_specs.append(pl.BlockSpec((tm, C), lambda i, k: (i, 0)))

    kern = functools.partial(_matmul_bn_kernel, relu=relu, has_res=has_res)
    out = pl.pallas_call(
        kern,
        out_shape=jax.ShapeDtypeStruct((Mp, C), jnp.float32),
        grid=(Mp // tm, Kp // tk),
        in_specs=in_specs,
        out_specs=pl.BlockSpec((tm, C), lambda i, k: (i, 0)),
        scratch_shapes=[pltpu.VMEM((tm, C), jnp.float32)],
        compiler_params=pltpu.CompilerParams(
            dimension_semantics=("parallel", "arbitrary")
        ),
    )(*operands)
    return out[:M]


def _max_reduce_kernel(p_ref, o_ref):
    # p: (1, tm, C) -- one 3x3 tap; running max kept resident in o: (tm, C)
    p = pl.program_id(1)

    @pl.when(p == 0)
    def _():
        o_ref[...] = p_ref[0]

    @pl.when(p > 0)
    def _():
        o_ref[...] = jnp.maximum(o_ref[...], p_ref[0])


def max_reduce(patches):
    """patches: (P, M, C) f32 -> (M, C) max over the patch axis (tiled grid)."""
    P, M, C = patches.shape
    tm = 256 if M >= 256 else _round_up(max(M, 1), 8)
    Mp = _round_up(M, tm)
    patches_p = jnp.pad(patches, ((0, 0), (0, Mp - M), (0, 0)))
    out = pl.pallas_call(
        _max_reduce_kernel,
        out_shape=jax.ShapeDtypeStruct((Mp, C), jnp.float32),
        grid=(Mp // tm, P),
        in_specs=[pl.BlockSpec((1, tm, C), lambda i, p: (p, i, 0))],
        out_specs=pl.BlockSpec((tm, C), lambda i, p: (i, 0)),
        compiler_params=pltpu.CompilerParams(
            dimension_semantics=("parallel", "arbitrary")
        ),
    )(patches_p)
    return out[:M]


def _avgpool_fc_kernel(x_ref, w_ref, b_ref, o_ref):
    # x: (N, HW, C)  w: (C, num_classes)  b: (1, num_classes)
    pooled = jnp.mean(x_ref[...], axis=1)  # (N, C)
    o_ref[...] = (
        jnp.dot(pooled, w_ref[...], preferred_element_type=jnp.float32) + b_ref[...]
    )


def avgpool_fc(x, w, b):
    # Tiny final op (N x 512 x num_classes); single block is fine.
    N, HW, C = x.shape
    _, NC = w.shape
    return pl.pallas_call(
        _avgpool_fc_kernel,
        out_shape=jax.ShapeDtypeStruct((N, NC), jnp.float32),
        grid=(1,),
        in_specs=[
            pl.BlockSpec((N, HW, C), lambda i: (0, 0, 0)),
            pl.BlockSpec((C, NC), lambda i: (0, 0)),
            pl.BlockSpec((1, NC), lambda i: (0, 0)),
        ],
        out_specs=pl.BlockSpec((N, NC), lambda i: (0, 0)),
    )(x, w, b.reshape(1, NC))


# --------------------------------------------------------------------------
# Plain-JAX glue (patch extraction / reshapes)
# --------------------------------------------------------------------------
def _patches(x, k, stride, pad, pad_value):
    """x: (N,H,W,C) -> list of k*k shifted strided views, each (N,Ho,Wo,C)."""
    N, H, W, C = x.shape
    Ho = (H + 2 * pad - k) // stride + 1
    Wo = (W + 2 * pad - k) // stride + 1
    xp = jnp.pad(
        x, ((0, 0), (pad, pad), (pad, pad), (0, 0)), constant_values=pad_value
    )
    views = []
    for dy in range(k):
        for dx in range(k):
            views.append(
                xp[
                    :,
                    dy : dy + stride * (Ho - 1) + 1 : stride,
                    dx : dx + stride * (Wo - 1) + 1 : stride,
                    :,
                ]
            )
    return views, (N, Ho, Wo)


def conv_bn(x, w_oihw, bn, stride, pad, relu, residual=None):
    """x NHWC, w_oihw (Cout, Cin, kh, kw). Returns NHWC.
    BN (eval mode) scale is folded into the weights; optional residual NHWC
    tensor is added (and ReLU'd) inside the matmul epilogue."""
    Cout, Cin, k, _ = w_oihw.shape
    views, (N, Ho, Wo) = _patches(x, k, stride, pad, 0.0)
    cols = jnp.concatenate(views, axis=-1).reshape(N * Ho * Wo, k * k * Cin)
    # patch feature order is (kh, kw, Cin) -> weight as (kh, kw, Cin, Cout)
    w2 = jnp.transpose(w_oihw, (2, 3, 1, 0)).reshape(k * k * Cin, Cout)
    gamma, beta, mean, var = bn
    inv = gamma / jnp.sqrt(var + EPS)
    w2 = w2 * inv[None, :]            # fold BN scale into the weight matrix
    bias = beta - mean * inv
    res2d = None
    if residual is not None:
        res2d = residual.reshape(N * Ho * Wo, Cout)
    y = matmul_bn(cols, w2, bias, relu, residual=res2d)
    return y.reshape(N, Ho, Wo, Cout)


def maxpool_3x3_s2_p1(x):
    views, (N, Ho, Wo) = _patches(x, 3, 2, 1, -jnp.inf)
    C = x.shape[-1]
    stacked = jnp.stack(views, axis=0).reshape(9, N * Ho * Wo, C)
    out = max_reduce(stacked)
    return out.reshape(N, Ho, Wo, C)


def basic_block(x, p):
    if "ds_w" in p:
        identity = conv_bn(
            x, p["ds_w"], p["ds_bn"], stride=p["stride"], pad=0, relu=False
        )
    else:
        identity = x
    out = conv_bn(x, p["conv1_w"], p["bn1"], stride=p["stride"], pad=1, relu=True)
    # conv2: BN + residual add + ReLU all fused in the matmul epilogue.
    out = conv_bn(
        out, p["conv2_w"], p["bn2"], stride=1, pad=1, relu=True, residual=identity
    )
    return out


def resnet_forward(x_nchw, params, include_top=True):
    x = jnp.transpose(x_nchw, (0, 2, 3, 1)).astype(jnp.float32)  # NCHW -> NHWC
    x = conv_bn(x, params["conv1_w"], params["bn1"], stride=2, pad=3, relu=True)
    x = maxpool_3x3_s2_p1(x)
    for layer in ("layer1", "layer2", "layer3", "layer4"):
        for blk in params[layer]:
            x = basic_block(x, blk)
    if include_top:
        N, H, W, C = x.shape
        return avgpool_fc(x.reshape(N, H * W, C), params["fc_w"], params["fc_b"])
    return jnp.transpose(x, (0, 3, 1, 2))  # back to NCHW


# --------------------------------------------------------------------------
# Deterministic parameter construction (BasicBlock, expansion = 1)
# --------------------------------------------------------------------------
def _kaiming_conv(key, cout, cin, k):
    # kaiming_normal_ with mode='fan_out', nonlinearity='relu'
    fan_out = cout * k * k
    std = (2.0 / fan_out) ** 0.5
    return jax.random.normal(key, (cout, cin, k, k), jnp.float32) * std


def _bn(c):
    # PyTorch BatchNorm2d defaults: weight=1, bias=0, running_mean=0, running_var=1
    return (
        jnp.ones((c,), jnp.float32),
        jnp.zeros((c,), jnp.float32),
        jnp.zeros((c,), jnp.float32),
        jnp.ones((c,), jnp.float32),
    )


def make_resnet_params(key, blocks_num=(1, 1, 1, 1), num_classes=10):
    expansion = 1  # BasicBlock
    keys = iter(jax.random.split(key, 256))
    params = {
        "conv1_w": _kaiming_conv(next(keys), 64, 3, 7),
        "bn1": _bn(64),
    }
    in_ch = 64
    for li, (channel, nblocks) in enumerate(zip((64, 128, 256, 512), blocks_num)):
        stride = 1 if li == 0 else 2
        blocks = []
        for bi in range(nblocks):
            s = stride if bi == 0 else 1
            blk = {
                "stride": s,
                "conv1_w": _kaiming_conv(next(keys), channel, in_ch, 3),
                "bn1": _bn(channel),
                "conv2_w": _kaiming_conv(next(keys), channel, channel, 3),
                "bn2": _bn(channel),
            }
            if s != 1 or in_ch != channel * expansion:
                blk["ds_w"] = _kaiming_conv(next(keys), channel * expansion, in_ch, 1)
                blk["ds_bn"] = _bn(channel * expansion)
            blocks.append(blk)
            in_ch = channel * expansion
        params[f"layer{li + 1}"] = blocks
    # fc: PyTorch Linear(512*expansion, num_classes): weight (nc, in), bias (nc,)
    fin = 512 * expansion
    bound = 1.0 / (fin ** 0.5)
    fc_w = jax.random.uniform(
        next(keys), (num_classes, fin), jnp.float32, -bound, bound
    )
    fc_b = jax.random.uniform(next(keys), (num_classes,), jnp.float32, -bound, bound)
    params["fc_w"] = fc_w.T  # stored as (in, num_classes) for the kernel matmul
    params["fc_b"] = fc_b
    return params


# --------------------------------------------------------------------------
if __name__ == "__main__":
    key = jax.random.PRNGKey(0)
    k_param, k_input = jax.random.split(key)

    params = make_resnet_params(k_param, blocks_num=(1, 1, 1, 1), num_classes=10)
    x = jax.random.normal(k_input, (2, 3, 32, 32), jnp.float32)  # NCHW, like PyTorch

    fwd = jax.jit(lambda inp: resnet_forward(inp, params, include_top=True))
    logits = fwd(x)
    jax.block_until_ready(logits)

    assert logits.shape == (2, 10), logits.shape
    assert bool(jnp.all(jnp.isfinite(logits)))
    print("KERNEL_OK")
</pallas_src>

<mosaic_0001>
module attributes {stable_mosaic.version = 11 : i64} {
  func.func @_matmul_bn_kernel(%arg0: i32, %arg1: i32, %arg2: memref<256x256xbf16, #tpu.memory_space<vmem>>, %arg3: memref<256x64xbf16, #tpu.memory_space<vmem>>, %arg4: memref<1x64xf32, #tpu.memory_space<vmem>>, %arg5: memref<256x64xf32, #tpu.memory_space<vmem>>, %arg6: memref<256x64xf32, #tpu.memory_space<vmem>>) attributes {dimension_semantics = [#tpu.dimension_semantics<parallel>, #tpu.dimension_semantics<arbitrary>], iteration_bounds = array<i64: 2, 1>, scalar_prefetch = 0 : i64, scratch_operands = 1 : i64, tpu.core_type = #tpu.core_type<tc>, window_params = [{transform_indices = @transform_0, window_bounds = array<i64: 256, 256>}, {transform_indices = @transform_1, window_bounds = array<i64: 256, 64>}, {pipeline_mode = #tpu.pipeline_mode<synchronous>, transform_indices = @transform_2, window_bounds = array<i64: 1, 64>}, {transform_indices = @transform_3, window_bounds = array<i64: 256, 64>}]} {
    %c0_i32 = arith.constant 0 : i32
    %0 = arith.cmpi eq, %arg1, %c0_i32 : i32
    %1 = arith.extui %0 : i1 to i32
    %c0_i32_0 = arith.constant 0 : i32
    %2 = arith.cmpi ne, %1, %c0_i32_0 : i32
    scf.if %2 {
      %cst_10 = arith.constant 0.000000e+00 : f32
      %12 = vector.broadcast %cst_10 : f32 to vector<256x64xf32>
      %c0_11 = arith.constant 0 : index
      %c0_12 = arith.constant 0 : index
      %13 = vector.load %arg6[%c0_11, %c0_12] : memref<256x64xf32, #tpu.memory_space<vmem>>, vector<256x64xf32>
      tpu.vector_store %arg6[%c0_11, %c0_12], %12 {strides = array<i32>} : memref<256x64xf32, #tpu.memory_space<vmem>>, vector<256x64xf32>,
    } else {
    }
    %c0 = arith.constant 0 : index
    %c0_1 = arith.constant 0 : index
    %3 = vector.load %arg6[%c0, %c0_1] : memref<256x64xf32, #tpu.memory_space<vmem>>, vector<256x64xf32>
    %c0_2 = arith.constant 0 : index
    %c0_3 = arith.constant 0 : index
    %4 = vector.load %arg2[%c0_2, %c0_3] : memref<256x256xbf16, #tpu.memory_space<vmem>>, vector<256x256xbf16>
    %c0_4 = arith.constant 0 : index
    %c0_5 = arith.constant 0 : index
    %5 = vector.load %arg3[%c0_4, %c0_5] : memref<256x64xbf16, #tpu.memory_space<vmem>>, vector<256x64xbf16>
    %cst = arith.constant dense<0.000000e+00> : vector<256x64xf32>
    %6 = tpu.matmul %4, %5, %cst {dimension_numbers = #tpu.dot_dimension_numbers<[1], [0], [0], [1], [0, 0, 1, 1], [], []>} : vector<256x256xbf16>, vector<256x64xbf16>, vector<256x64xf32> -> vector<256x64xf32>
    %7 = arith.addf %3, %6 : vector<256x64xf32>
    %c0_6 = arith.constant 0 : index
    %c0_7 = arith.constant 0 : index
    %8 = vector.load %arg6[%c0_6, %c0_7] : memref<256x64xf32, #tpu.memory_space<vmem>>, vector<256x64xf32>
    tpu.vector_store %arg6[%c0_6, %c0_7], %7 {strides = array<i32>} : memref<256x64xf32, #tpu.memory_space<vmem>>, vector<256x64xf32>,
    %c0_i32_8 = arith.constant 0 : i32
    %9 = arith.cmpi eq, %arg1, %c0_i32_8 : i32
    %10 = arith.extui %9 : i1 to i32
    %c0_i32_9 = arith.constant 0 : i32
    %11 = arith.cmpi ne, %10, %c0_i32_9 : i32
    scf.if %11 {
      %c0_10 = arith.constant 0 : index
      %c0_11 = arith.constant 0 : index
      %12 = vector.load %arg6[%c0_10, %c0_11] : memref<256x64xf32, #tpu.memory_space<vmem>>, vector<256x64xf32>
      %c0_12 = arith.constant 0 : index
      %c0_13 = arith.constant 0 : index
      %13 = vector.load %arg4[%c0_12, %c0_13] : memref<1x64xf32, #tpu.memory_space<vmem>>, vector<1x64xf32>
      %14 = vector.broadcast %13 : vector<1x64xf32> to vector<256x64xf32>
      %15 = arith.addf %12, %14 : vector<256x64xf32>
      %cst_14 = arith.constant 0.000000e+00 : f32
      %16 = vector.broadcast %cst_14 : f32 to vector<256x64xf32>
      %17 = arith.maximumf %15, %16 : vector<256x64xf32>
      %c0_15 = arith.constant 0 : index
      %c0_16 = arith.constant 0 : index
      %18 = vector.load %arg5[%c0_15, %c0_16] : memref<256x64xf32, #tpu.memory_space<vmem>>, vector<256x64xf32>
      tpu.vector_store %arg5[%c0_15, %c0_16], %17 {strides = array<i32>} : memref<256x64xf32, #tpu.memory_space<vmem>>, vector<256x64xf32>,
    } else {
    }
    return
  }
  func.func @transform_0(%arg0: i32, %arg1: i32) -> (i32, i32) {
    %c0_i32 = arith.constant 0 : i32
    return %arg0, %arg1 : i32, i32
  }
  func.func @transform_1(%arg0: i32, %arg1: i32) -> (i32, i32) {
    %c0_i32 = arith.constant 0 : i32
    %c0_i32_0 = arith.constant 0 : i32
    return %arg1, %c0_i32 : i32, i32
  }
  func.func @transform_2(%arg0: i32, %arg1: i32) -> (i32, i32) {
    %c0_i32 = arith.constant 0 : i32
    %c0_i32_0 = arith.constant 0 : i32
    %c0_i32_1 = arith.constant 0 : i32
    return %c0_i32, %c0_i32_0 : i32, i32
  }
  func.func @transform_3(%arg0: i32, %arg1: i32) -> (i32, i32) {
    %c0_i32 = arith.constant 0 : i32
    %c0_i32_0 = arith.constant 0 : i32
    return %arg0, %c0_i32 : i32, i32
  }
}

module attributes {stable_mosaic.version = 11 : i64} {
  func.func @_max_reduce_kernel(%arg0: i32, %arg1: i32, %arg2: memref<1x128x64xf32, #tpu.memory_space<vmem>>, %arg3: memref<128x64xf32, #tpu.memory_space<vmem>>) attributes {dimension_semantics = [#tpu.dimension_semantics<parallel>, #tpu.dimension_semantics<arbitrary>], iteration_bounds = array<i64: 1, 9>, scalar_prefetch = 0 : i64, scratch_operands = 0 : i64, tpu.core_type = #tpu.core_type<tc>, window_params = [{transform_indices = @transform_0, window_bounds = array<i64: 1, 128, 64>}, {transform_indices = @transform_1, window_bounds = array<i64: 128, 64>}]} {
    %c0_i32 = arith.constant 0 : i32
    %0 = arith.cmpi eq, %arg1, %c0_i32 : i32
    %1 = arith.extui %0 : i1 to i32
    %c0_i32_0 = arith.constant 0 : i32
    %2 = arith.cmpi ne, %1, %c0_i32_0 : i32
    scf.if %2 {
      %c0 = arith.constant 0 : index
      %c0_3 = arith.constant 0 : index
      %c0_4 = arith.constant 0 : index
      %6 = vector.load %arg2[%c0, %c0_3, %c0_4] : memref<1x128x64xf32, #tpu.memory_space<vmem>>, vector<1x128x64xf32>
      %7 = vector.shape_cast %6 : vector<1x128x64xf32> to vector<128x64xf32>
      %c0_5 = arith.constant 0 : index
      %c0_6 = arith.constant 0 : index
      %8 = vector.load %arg3[%c0_5, %c0_6] : memref<128x64xf32, #tpu.memory_space<vmem>>, vector<128x64xf32>
      tpu.vector_store %arg3[%c0_5, %c0_6], %7 {strides = array<i32>} : memref<128x64xf32, #tpu.memory_space<vmem>>, vector<128x64xf32>,
    } else {
    }
    %c0_i32_1 = arith.constant 0 : i32
    %3 = arith.cmpi sgt, %arg1, %c0_i32_1 : i32
    %4 = arith.extui %3 : i1 to i32
    %c0_i32_2 = arith.constant 0 : i32
    %5 = arith.cmpi ne, %4, %c0_i32_2 : i32
    scf.if %5 {
      %c0 = arith.constant 0 : index
      %c0_3 = arith.constant 0 : index
      %6 = vector.load %arg3[%c0, %c0_3] : memref<128x64xf32, #tpu.memory_space<vmem>>, vector<128x64xf32>
      %c0_4 = arith.constant 0 : index
      %c0_5 = arith.constant 0 : index
      %c0_6 = arith.constant 0 : index
      %7 = vector.load %arg2[%c0_4, %c0_5, %c0_6] : memref<1x128x64xf32, #tpu.memory_space<vmem>>, vector<1x128x64xf32>
      %8 = vector.shape_cast %7 : vector<1x128x64xf32> to vector<128x64xf32>
      %9 = arith.maximumf %6, %8 : vector<128x64xf32>
      %c0_7 = arith.constant 0 : index
      %c0_8 = arith.constant 0 : index
      %10 = vector.load %arg3[%c0_7, %c0_8] : memref<128x64xf32, #tpu.memory_space<vmem>>, vector<128x64xf32>
      tpu.vector_store %arg3[%c0_7, %c0_8], %9 {strides = array<i32>} : memref<128x64xf32, #tpu.memory_space<vmem>>, vector<128x64xf32>,
    } else {
    }
    return
  }
  func.func @transform_0(%arg0: i32, %arg1: i32) -> (i32, i32, i32) {
    %c0_i32 = arith.constant 0 : i32
    %c0_i32_0 = arith.constant 0 : i32
    return %arg1, %arg0, %c0_i32 : i32, i32, i32
  }
  func.func @transform_1(%arg0: i32, %arg1: i32) -> (i32, i32) {
    %c0_i32 = arith.constant 0 : i32
    %c0_i32_0 = arith.constant 0 : i32
    return %arg0, %c0_i32 : i32, i32
  }
}

module attributes {stable_mosaic.version = 11 : i64} {
  func.func @_matmul_bn_kernel(%arg0: i32, %arg1: i32, %arg2: memref<128x128xbf16, #tpu.memory_space<vmem>>, %arg3: memref<128x64xbf16, #tpu.memory_space<vmem>>, %arg4: memref<1x64xf32, #tpu.memory_space<vmem>>, %arg5: memref<128x64xf32, #tpu.memory_space<vmem>>, %arg6: memref<128x64xf32, #tpu.memory_space<vmem>>) attributes {dimension_semantics = [#tpu.dimension_semantics<parallel>, #tpu.dimension_semantics<arbitrary>], iteration_bounds = array<i64: 1, 5>, scalar_prefetch = 0 : i64, scratch_operands = 1 : i64, tpu.core_type = #tpu.core_type<tc>, window_params = [{transform_indices = @transform_0, window_bounds = array<i64: 128, 128>}, {transform_indices = @transform_1, window_bounds = array<i64: 128, 64>}, {pipeline_mode = #tpu.pipeline_mode<synchronous>, transform_indices = @transform_2, window_bounds = array<i64: 1, 64>}, {transform_indices = @transform_3, window_bounds = array<i64: 128, 64>}]} {
    %c0_i32 = arith.constant 0 : i32
    %0 = arith.cmpi eq, %arg1, %c0_i32 : i32
    %1 = arith.extui %0 : i1 to i32
    %c0_i32_0 = arith.constant 0 : i32
    %2 = arith.cmpi ne, %1, %c0_i32_0 : i32
    scf.if %2 {
      %cst_9 = arith.constant 0.000000e+00 : f32
      %12 = vector.broadcast %cst_9 : f32 to vector<128x64xf32>
      %c0_10 = arith.constant 0 : index
      %c0_11 = arith.constant 0 : index
      %13 = vector.load %arg6[%c0_10, %c0_11] : memref<128x64xf32, #tpu.memory_space<vmem>>, vector<128x64xf32>
      tpu.vector_store %arg6[%c0_10, %c0_11], %12 {strides = array<i32>} : memref<128x64xf32, #tpu.memory_space<vmem>>, vector<128x64xf32>,
    } else {
    }
    %c0 = arith.constant 0 : index
    %c0_1 = arith.constant 0 : index
    %3 = vector.load %arg6[%c0, %c0_1] : memref<128x64xf32, #tpu.memory_space<vmem>>, vector<128x64xf32>
    %c0_2 = arith.constant 0 : index
    %c0_3 = arith.constant 0 : index
    %4 = vector.load %arg2[%c0_2, %c0_3] : memref<128x128xbf16, #tpu.memory_space<vmem>>, vector<128x128xbf16>
    %c0_4 = arith.constant 0 : index
    %c0_5 = arith.constant 0 : index
    %5 = vector.load %arg3[%c0_4, %c0_5] : memref<128x64xbf16, #tpu.memory_space<vmem>>, vector<128x64xbf16>
    %cst = arith.constant dense<0.000000e+00> : vector<128x64xf32>
    %6 = tpu.matmul %4, %5, %cst {dimension_numbers = #tpu.dot_dimension_numbers<[1], [0], [0], [1], [0, 0, 1, 1], [], []>} : vector<128x128xbf16>, vector<128x64xbf16>, vector<128x64xf32> -> vector<128x64xf32>
    %7 = arith.addf %3, %6 : vector<128x64xf32>
    %c0_6 = arith.constant 0 : index
    %c0_7 = arith.constant 0 : index
    %8 = vector.load %arg6[%c0_6, %c0_7] : memref<128x64xf32, #tpu.memory_space<vmem>>, vector<128x64xf32>
    tpu.vector_store %arg6[%c0_6, %c0_7], %7 {strides = array<i32>} : memref<128x64xf32, #tpu.memory_space<vmem>>, vector<128x64xf32>,
    %c4_i32 = arith.constant 4 : i32
    %9 = arith.cmpi eq, %arg1, %c4_i32 : i32
    %10 = arith.extui %9 : i1 to i32
    %c0_i32_8 = arith.constant 0 : i32
    %11 = arith.cmpi ne, %10, %c0_i32_8 : i32
    scf.if %11 {
      %c0_9 = arith.constant 0 : index
      %c0_10 = arith.constant 0 : index
      %12 = vector.load %arg6[%c0_9, %c0_10] : memref<128x64xf32, #tpu.memory_space<vmem>>, vector<128x64xf32>
      %c0_11 = arith.constant 0 : index
      %c0_12 = arith.constant 0 : index
      %13 = vector.load %arg4[%c0_11, %c0_12] : memref<1x64xf32, #tpu.memory_space<vmem>>, vector<1x64xf32>
      %14 = vector.broadcast %13 : vector<1x64xf32> to vector<128x64xf32>
      %15 = arith.addf %12, %14 : vector<128x64xf32>
      %cst_13 = arith.constant 0.000000e+00 : f32
      %16 = vector.broadcast %cst_13 : f32 to vector<128x64xf32>
      %17 = arith.maximumf %15, %16 : vector<128x64xf32>
      %c0_14 = arith.constant 0 : index
      %c0_15 = arith.constant 0 : index
      %18 = vector.load %arg5[%c0_14, %c0_15] : memref<128x64xf32, #tpu.memory_space<vmem>>, vector<128x64xf32>
      tpu.vector_store %arg5[%c0_14, %c0_15], %17 {strides = array<i32>} : memref<128x64xf32, #tpu.memory_space<vmem>>, vector<128x64xf32>,
    } else {
    }
    return
  }
  func.func @transform_0(%arg0: i32, %arg1: i32) -> (i32, i32) {
    %c0_i32 = arith.constant 0 : i32
    return %arg0, %arg1 : i32, i32
  }
  func.func @transform_1(%arg0: i32, %arg1: i32) -> (i32, i32) {
    %c0_i32 = arith.constant 0 : i32
    %c0_i32_0 = arith.constant 0 : i32
    return %arg1, %c0_i32 : i32, i32
  }
  func.func @transform_2(%arg0: i32, %arg1: i32) -> (i32, i32) {
    %c0_i32 = arith.constant 0 : i32
    %c0_i32_0 = arith.constant 0 : i32
    %c0_i32_1 = arith.constant 0 : i32
    return %c0_i32, %c0_i32_0 : i32, i32
  }
  func.func @transform_3(%arg0: i32, %arg1: i32) -> (i32, i32) {
    %c0_i32 = arith.constant 0 : i32
    %c0_i32_0 = arith.constant 0 : i32
    return %arg0, %c0_i32 : i32, i32
  }
}

module attributes {stable_mosaic.version = 11 : i64} {
  func.func @_matmul_bn_kernel(%arg0: i32, %arg1: i32, %arg2: memref<128x128xbf16, #tpu.memory_space<vmem>>, %arg3: memref<128x64xbf16, #tpu.memory_space<vmem>>, %arg4: memref<1x64xf32, #tpu.memory_space<vmem>>, %arg5: memref<128x64xf32, #tpu.memory_space<vmem>>, %arg6: memref<128x64xf32, #tpu.memory_space<vmem>>, %arg7: memref<128x64xf32, #tpu.memory_space<vmem>>) attributes {dimension_semantics = [#tpu.dimension_semantics<parallel>, #tpu.dimension_semantics<arbitrary>], iteration_bounds = array<i64: 1, 5>, scalar_prefetch = 0 : i64, scratch_operands = 1 : i64, tpu.core_type = #tpu.core_type<tc>, window_params = [{transform_indices = @transform_0, window_bounds = array<i64: 128, 128>}, {transform_indices = @transform_1, window_bounds = array<i64: 128, 64>}, {pipeline_mode = #tpu.pipeline_mode<synchronous>, transform_indices = @transform_2, window_bounds = array<i64: 1, 64>}, {transform_indices = @transform_3, window_bounds = array<i64: 128, 64>}, {transform_indices = @transform_4, window_bounds = array<i64: 128, 64>}]} {
    %c0_i32 = arith.constant 0 : i32
    %0 = arith.cmpi eq, %arg1, %c0_i32 : i32
    %1 = arith.extui %0 : i1 to i32
    %c0_i32_0 = arith.constant 0 : i32
    %2 = arith.cmpi ne, %1, %c0_i32_0 : i32
    scf.if %2 {
      %cst_9 = arith.constant 0.000000e+00 : f32
      %12 = vector.broadcast %cst_9 : f32 to vector<128x64xf32>
      %c0_10 = arith.constant 0 : index
      %c0_11 = arith.constant 0 : index
      %13 = vector.load %arg7[%c0_10, %c0_11] : memref<128x64xf32, #tpu.memory_space<vmem>>, vector<128x64xf32>
      tpu.vector_store %arg7[%c0_10, %c0_11], %12 {strides = array<i32>} : memref<128x64xf32, #tpu.memory_space<vmem>>, vector<128x64xf32>,
    } else {
    }
    %c0 = arith.constant 0 : index
    %c0_1 = arith.constant 0 : index
    %3 = vector.load %arg7[%c0, %c0_1] : memref<128x64xf32, #tpu.memory_space<vmem>>, vector<128x64xf32>
    %c0_2 = arith.constant 0 : index
    %c0_3 = arith.constant 0 : index
    %4 = vector.load %arg2[%c0_2, %c0_3] : memref<128x128xbf16, #tpu.memory_space<vmem>>, vector<128x128xbf16>
    %c0_4 = arith.constant 0 : index
    %c0_5 = arith.constant 0 : index
    %5 = vector.load %arg3[%c0_4, %c0_5] : memref<128x64xbf16, #tpu.memory_space<vmem>>, vector<128x64xbf16>
    %cst = arith.constant dense<0.000000e+00> : vector<128x64xf32>
    %6 = tpu.matmul %4, %5, %cst {dimension_numbers = #tpu.dot_dimension_numbers<[1], [0], [0], [1], [0, 0, 1, 1], [], []>} : vector<128x128xbf16>, vector<128x64xbf16>, vector<128x64xf32> -> vector<128x64xf32>
    %7 = arith.addf %3, %6 : vector<128x64xf32>
    %c0_6 = arith.constant 0 : index
    %c0_7 = arith.constant 0 : index
    %8 = vector.load %arg7[%c0_6, %c0_7] : memref<128x64xf32, #tpu.memory_space<vmem>>, vector<128x64xf32>
    tpu.vector_store %arg7[%c0_6, %c0_7], %7 {strides = array<i32>} : memref<128x64xf32, #tpu.memory_space<vmem>>, vector<128x64xf32>,
    %c4_i32 = arith.constant 4 : i32
    %9 = arith.cmpi eq, %arg1, %c4_i32 : i32
    %10 = arith.extui %9 : i1 to i32
    %c0_i32_8 = arith.constant 0 : i32
    %11 = arith.cmpi ne, %10, %c0_i32_8 : i32
    scf.if %11 {
      %c0_9 = arith.constant 0 : index
      %c0_10 = arith.constant 0 : index
      %12 = vector.load %arg7[%c0_9, %c0_10] : memref<128x64xf32, #tpu.memory_space<vmem>>, vector<128x64xf32>
      %c0_11 = arith.constant 0 : index
      %c0_12 = arith.constant 0 : index
      %13 = vector.load %arg4[%c0_11, %c0_12] : memref<1x64xf32, #tpu.memory_space<vmem>>, vector<1x64xf32>
      %14 = vector.broadcast %13 : vector<1x64xf32> to vector<128x64xf32>
      %15 = arith.addf %12, %14 : vector<128x64xf32>
      %c0_13 = arith.constant 0 : index
      %c0_14 = arith.constant 0 : index
      %16 = vector.load %arg5[%c0_13, %c0_14] : memref<128x64xf32, #tpu.memory_space<vmem>>, vector<128x64xf32>
      %17 = arith.addf %15, %16 : vector<128x64xf32>
      %cst_15 = arith.constant 0.000000e+00 : f32
      %18 = vector.broadcast %cst_15 : f32 to vector<128x64xf32>
      %19 = arith.maximumf %17, %18 : vector<128x64xf32>
      %c0_16 = arith.constant 0 : index
      %c0_17 = arith.constant 0 : index
      %20 = vector.load %arg6[%c0_16, %c0_17] : memref<128x64xf32, #tpu.memory_space<vmem>>, vector<128x64xf32>
      tpu.vector_store %arg6[%c0_16, %c0_17], %19 {strides = array<i32>} : memref<128x64xf32, #tpu.memory_space<vmem>>, vector<128x64xf32>,
    } else {
    }
    return
  }
  func.func @transform_0(%arg0: i32, %arg1: i32) -> (i32, i32) {
    %c0_i32 = arith.constant 0 : i32
    return %arg0, %arg1 : i32, i32
  }
  func.func @transform_1(%arg0: i32, %arg1: i32) -> (i32, i32) {
    %c0_i32 = arith.constant 0 : i32
    %c0_i32_0 = arith.constant 0 : i32
    return %arg1, %c0_i32 : i32, i32
  }
  func.func @transform_2(%arg0: i32, %arg1: i32) -> (i32, i32) {
    %c0_i32 = arith.constant 0 : i32
    %c0_i32_0 = arith.constant 0 : i32
    %c0_i32_1 = arith.constant 0 : i32
    return %c0_i32, %c0_i32_0 : i32, i32
  }
  func.func @transform_3(%arg0: i32, %arg1: i32) -> (i32, i32) {
    %c0_i32 = arith.constant 0 : i32
    %c0_i32_0 = arith.constant 0 : i32
    return %arg0, %c0_i32 : i32, i32
  }
  func.func @transform_4(%arg0: i32, %arg1: i32) -> (i32, i32) {
    %c0_i32 = arith.constant 0 : i32
    %c0_i32_0 = arith.constant 0 : i32
    return %arg0, %c0_i32 : i32, i32
  }
}

module attributes {stable_mosaic.version = 11 : i64} {
  func.func @_matmul_bn_kernel(%arg0: i32, %arg1: i32, %arg2: memref<32x128xbf16, #tpu.memory_space<vmem>>, %arg3: memref<128x128xbf16, #tpu.memory_space<vmem>>, %arg4: memref<1x128xf32, #tpu.memory_space<vmem>>, %arg5: memref<32x128xf32, #tpu.memory_space<vmem>>, %arg6: memref<32x128xf32, #tpu.memory_space<vmem>>) attributes {dimension_semantics = [#tpu.dimension_semantics<parallel>, #tpu.dimension_semantics<arbitrary>], iteration_bounds = array<i64: 1, 5>, scalar_prefetch = 0 : i64, scratch_operands = 1 : i64, tpu.core_type = #tpu.core_type<tc>, window_params = [{transform_indices = @transform_0, window_bounds = array<i64: 32, 128>}, {transform_indices = @transform_1, window_bounds = array<i64: 128, 128>}, {pipeline_mode = #tpu.pipeline_mode<synchronous>, transform_indices = @transform_2, window_bounds = array<i64: 1, 128>}, {transform_indices = @transform_3, window_bounds = array<i64: 32, 128>}]} {
    %c0_i32 = arith.constant 0 : i32
    %0 = arith.cmpi eq, %arg1, %c0_i32 : i32
    %1 = arith.extui %0 : i1 to i32
    %c0_i32_0 = arith.constant 0 : i32
    %2 = arith.cmpi ne, %1, %c0_i32_0 : i32
    scf.if %2 {
      %cst_9 = arith.constant 0.000000e+00 : f32
      %12 = vector.broadcast %cst_9 : f32 to vector<32x128xf32>
      %c0_10 = arith.constant 0 : index
      %c0_11 = arith.constant 0 : index
      %13 = vector.load %arg6[%c0_10, %c0_11] : memref<32x128xf32, #tpu.memory_space<vmem>>, vector<32x128xf32>
      tpu.vector_store %arg6[%c0_10, %c0_11], %12 {strides = array<i32>} : memref<32x128xf32, #tpu.memory_space<vmem>>, vector<32x128xf32>,
    } else {
    }
    %c0 = arith.constant 0 : index
    %c0_1 = arith.constant 0 : index
    %3 = vector.load %arg6[%c0, %c0_1] : memref<32x128xf32, #tpu.memory_space<vmem>>, vector<32x128xf32>
    %c0_2 = arith.constant 0 : index
    %c0_3 = arith.constant 0 : index
    %4 = vector.load %arg2[%c0_2, %c0_3] : memref<32x128xbf16, #tpu.memory_space<vmem>>, vector<32x128xbf16>
    %c0_4 = arith.constant 0 : index
    %c0_5 = arith.constant 0 : index
    %5 = vector.load %arg3[%c0_4, %c0_5] : memref<128x128xbf16, #tpu.memory_space<vmem>>, vector<128x128xbf16>
    %cst = arith.constant dense<0.000000e+00> : vector<32x128xf32>
    %6 = tpu.matmul %4, %5, %cst {dimension_numbers = #tpu.dot_dimension_numbers<[1], [0], [0], [1], [0, 0, 1, 1], [], []>} : vector<32x128xbf16>, vector<128x128xbf16>, vector<32x128xf32> -> vector<32x128xf32>
    %7 = arith.addf %3, %6 : vector<32x128xf32>
    %c0_6 = arith.constant 0 : index
    %c0_7 = arith.constant 0 : index
    %8 = vector.load %arg6[%c0_6, %c0_7] : memref<32x128xf32, #tpu.memory_space<vmem>>, vector<32x128xf32>
    tpu.vector_store %arg6[%c0_6, %c0_7], %7 {strides = array<i32>} : memref<32x128xf32, #tpu.memory_space<vmem>>, vector<32x128xf32>,
    %c4_i32 = arith.constant 4 : i32
    %9 = arith.cmpi eq, %arg1, %c4_i32 : i32
    %10 = arith.extui %9 : i1 to i32
    %c0_i32_8 = arith.constant 0 : i32
    %11 = arith.cmpi ne, %10, %c0_i32_8 : i32
    scf.if %11 {
      %c0_9 = arith.constant 0 : index
      %c0_10 = arith.constant 0 : index
      %12 = vector.load %arg6[%c0_9, %c0_10] : memref<32x128xf32, #tpu.memory_space<vmem>>, vector<32x128xf32>
      %c0_11 = arith.constant 0 : index
      %c0_12 = arith.constant 0 : index
      %13 = vector.load %arg4[%c0_11, %c0_12] : memref<1x128xf32, #tpu.memory_space<vmem>>, vector<1x128xf32>
      %14 = vector.broadcast %13 : vector<1x128xf32> to vector<32x128xf32>
      %15 = arith.addf %12, %14 : vector<32x128xf32>
      %cst_13 = arith.constant 0.000000e+00 : f32
      %16 = vector.broadcast %cst_13 : f32 to vector<32x128xf32>
      %17 = arith.maximumf %15, %16 : vector<32x128xf32>
      %c0_14 = arith.constant 0 : index
      %c0_15 = arith.constant 0 : index
      %18 = vector.load %arg5[%c0_14, %c0_15] : memref<32x128xf32, #tpu.memory_space<vmem>>, vector<32x128xf32>
      tpu.vector_store %arg5[%c0_14, %c0_15], %17 {strides = array<i32>} : memref<32x128xf32, #tpu.memory_space<vmem>>, vector<32x128xf32>,
    } else {
    }
    return
  }
  func.func @transform_0(%arg0: i32, %arg1: i32) -> (i32, i32) {
    %c0_i32 = arith.constant 0 : i32
    return %arg0, %arg1 : i32, i32
  }
  func.func @transform_1(%arg0: i32, %arg1: i32) -> (i32, i32) {
    %c0_i32 = arith.constant 0 : i32
    %c0_i32_0 = arith.constant 0 : i32
    return %arg1, %c0_i32 : i32, i32
  }
  func.func @transform_2(%arg0: i32, %arg1: i32) -> (i32, i32) {
    %c0_i32 = arith.constant 0 : i32
    %c0_i32_0 = arith.constant 0 : i32
    %c0_i32_1 = arith.constant 0 : i32
    return %c0_i32, %c0_i32_0 : i32, i32
  }
  func.func @transform_3(%arg0: i32, %arg1: i32) -> (i32, i32) {
    %c0_i32 = arith.constant 0 : i32
    %c0_i32_0 = arith.constant 0 : i32
    return %arg0, %c0_i32 : i32, i32
  }
}

module attributes {stable_mosaic.version = 11 : i64} {
  func.func @_matmul_bn_kernel(%arg0: i32, %arg1: i32, %arg2: memref<32x128xbf16, #tpu.memory_space<vmem>>, %arg3: memref<128x128xbf16, #tpu.memory_space<vmem>>, %arg4: memref<1x128xf32, #tpu.memory_space<vmem>>, %arg5: memref<32x128xf32, #tpu.memory_space<vmem>>, %arg6: memref<32x128xf32, #tpu.memory_space<vmem>>, %arg7: memref<32x128xf32, #tpu.memory_space<vmem>>) attributes {dimension_semantics = [#tpu.dimension_semantics<parallel>, #tpu.dimension_semantics<arbitrary>], iteration_bounds = array<i64: 1, 9>, scalar_prefetch = 0 : i64, scratch_operands = 1 : i64, tpu.core_type = #tpu.core_type<tc>, window_params = [{transform_indices = @transform_0, window_bounds = array<i64: 32, 128>}, {transform_indices = @transform_1, window_bounds = array<i64: 128, 128>}, {pipeline_mode = #tpu.pipeline_mode<synchronous>, transform_indices = @transform_2, window_bounds = array<i64: 1, 128>}, {transform_indices = @transform_3, window_bounds = array<i64: 32, 128>}, {transform_indices = @transform_4, window_bounds = array<i64: 32, 128>}]} {
    %c0_i32 = arith.constant 0 : i32
    %0 = arith.cmpi eq, %arg1, %c0_i32 : i32
    %1 = arith.extui %0 : i1 to i32
    %c0_i32_0 = arith.constant 0 : i32
    %2 = arith.cmpi ne, %1, %c0_i32_0 : i32
    scf.if %2 {
      %cst_9 = arith.constant 0.000000e+00 : f32
      %12 = vector.broadcast %cst_9 : f32 to vector<32x128xf32>
      %c0_10 = arith.constant 0 : index
      %c0_11 = arith.constant 0 : index
      %13 = vector.load %arg7[%c0_10, %c0_11] : memref<32x128xf32, #tpu.memory_space<vmem>>, vector<32x128xf32>
      tpu.vector_store %arg7[%c0_10, %c0_11], %12 {strides = array<i32>} : memref<32x128xf32, #tpu.memory_space<vmem>>, vector<32x128xf32>,
    } else {
    }
    %c0 = arith.constant 0 : index
    %c0_1 = arith.constant 0 : index
    %3 = vector.load %arg7[%c0, %c0_1] : memref<32x128xf32, #tpu.memory_space<vmem>>, vector<32x128xf32>
    %c0_2 = arith.constant 0 : index
    %c0_3 = arith.constant 0 : index
    %4 = vector.load %arg2[%c0_2, %c0_3] : memref<32x128xbf16, #tpu.memory_space<vmem>>, vector<32x128xbf16>
    %c0_4 = arith.constant 0 : index
    %c0_5 = arith.constant 0 : index
    %5 = vector.load %arg3[%c0_4, %c0_5] : memref<128x128xbf16, #tpu.memory_space<vmem>>, vector<128x128xbf16>
    %cst = arith.constant dense<0.000000e+00> : vector<32x128xf32>
    %6 = tpu.matmul %4, %5, %cst {dimension_numbers = #tpu.dot_dimension_numbers<[1], [0], [0], [1], [0, 0, 1, 1], [], []>} : vector<32x128xbf16>, vector<128x128xbf16>, vector<32x128xf32> -> vector<32x128xf32>
    %7 = arith.addf %3, %6 : vector<32x128xf32>
    %c0_6 = arith.constant 0 : index
    %c0_7 = arith.constant 0 : index
    %8 = vector.load %arg7[%c0_6, %c0_7] : memref<32x128xf32, #tpu.memory_space<vmem>>, vector<32x128xf32>
    tpu.vector_store %arg7[%c0_6, %c0_7], %7 {strides = array<i32>} : memref<32x128xf32, #tpu.memory_space<vmem>>, vector<32x128xf32>,
    %c8_i32 = arith.constant 8 : i32
    %9 = arith.cmpi eq, %arg1, %c8_i32 : i32
    %10 = arith.extui %9 : i1 to i32
    %c0_i32_8 = arith.constant 0 : i32
    %11 = arith.cmpi ne, %10, %c0_i32_8 : i32
    scf.if %11 {
      %c0_9 = arith.constant 0 : index
      %c0_10 = arith.constant 0 : index
      %12 = vector.load %arg7[%c0_9, %c0_10] : memref<32x128xf32, #tpu.memory_space<vmem>>, vector<32x128xf32>
      %c0_11 = arith.constant 0 : index
      %c0_12 = arith.constant 0 : index
      %13 = vector.load %arg4[%c0_11, %c0_12] : memref<1x128xf32, #tpu.memory_space<vmem>>, vector<1x128xf32>
      %14 = vector.broadcast %13 : vector<1x128xf32> to vector<32x128xf32>
      %15 = arith.addf %12, %14 : vector<32x128xf32>
      %c0_13 = arith.constant 0 : index
      %c0_14 = arith.constant 0 : index
      %16 = vector.load %arg5[%c0_13, %c0_14] : memref<32x128xf32, #tpu.memory_space<vmem>>, vector<32x128xf32>
      %17 = arith.addf %15, %16 : vector<32x128xf32>
      %cst_15 = arith.constant 0.000000e+00 : f32
      %18 = vector.broadcast %cst_15 : f32 to vector<32x128xf32>
      %19 = arith.maximumf %17, %18 : vector<32x128xf32>
      %c0_16 = arith.constant 0 : index
      %c0_17 = arith.constant 0 : index
      %20 = vector.load %arg6[%c0_16, %c0_17] : memref<32x128xf32, #tpu.memory_space<vmem>>, vector<32x128xf32>
      tpu.vector_store %arg6[%c0_16, %c0_17], %19 {strides = array<i32>} : memref<32x128xf32, #tpu.memory_space<vmem>>, vector<32x128xf32>,
    } else {
    }
    return
  }
  func.func @transform_0(%arg0: i32, %arg1: i32) -> (i32, i32) {
    %c0_i32 = arith.constant 0 : i32
    return %arg0, %arg1 : i32, i32
  }
  func.func @transform_1(%arg0: i32, %arg1: i32) -> (i32, i32) {
    %c0_i32 = arith.constant 0 : i32
    %c0_i32_0 = arith.constant 0 : i32
    return %arg1, %c0_i32 : i32, i32
  }
  func.func @transform_2(%arg0: i32, %arg1: i32) -> (i32, i32) {
    %c0_i32 = arith.constant 0 : i32
    %c0_i32_0 = arith.constant 0 : i32
    %c0_i32_1 = arith.constant 0 : i32
    return %c0_i32, %c0_i32_0 : i32, i32
  }
  func.func @transform_3(%arg0: i32, %arg1: i32) -> (i32, i32) {
    %c0_i32 = arith.constant 0 : i32
    %c0_i32_0 = arith.constant 0 : i32
    return %arg0, %c0_i32 : i32, i32
  }
  func.func @transform_4(%arg0: i32, %arg1: i32) -> (i32, i32) {
    %c0_i32 = arith.constant 0 : i32
    %c0_i32_0 = arith.constant 0 : i32
    return %arg0, %c0_i32 : i32, i32
  }
}

module attributes {stable_mosaic.version = 11 : i64} {
  func.func @_matmul_bn_kernel(%arg0: i32, %arg1: i32, %arg2: memref<32x128xbf16, #tpu.memory_space<vmem>>, %arg3: memref<128x128xbf16, #tpu.memory_space<vmem>>, %arg4: memref<1x128xf32, #tpu.memory_space<vmem>>, %arg5: memref<32x128xf32, #tpu.memory_space<vmem>>, %arg6: memref<32x128xf32, #tpu.memory_space<vmem>>) attributes {dimension_semantics = [#tpu.dimension_semantics<parallel>, #tpu.dimension_semantics<arbitrary>], iteration_bounds = array<i64: 1, 1>, scalar_prefetch = 0 : i64, scratch_operands = 1 : i64, tpu.core_type = #tpu.core_type<tc>, window_params = [{transform_indices = @transform_0, window_bounds = array<i64: 32, 128>}, {transform_indices = @transform_1, window_bounds = array<i64: 128, 128>}, {pipeline_mode = #tpu.pipeline_mode<synchronous>, transform_indices = @transform_2, window_bounds = array<i64: 1, 128>}, {transform_indices = @transform_3, window_bounds = array<i64: 32, 128>}]} {
    %c0_i32 = arith.constant 0 : i32
    %0 = arith.cmpi eq, %arg1, %c0_i32 : i32
    %1 = arith.extui %0 : i1 to i32
    %c0_i32_0 = arith.constant 0 : i32
    %2 = arith.cmpi ne, %1, %c0_i32_0 : i32
    scf.if %2 {
      %cst_10 = arith.constant 0.000000e+00 : f32
      %12 = vector.broadcast %cst_10 : f32 to vector<32x128xf32>
      %c0_11 = arith.constant 0 : index
      %c0_12 = arith.constant 0 : index
      %13 = vector.load %arg6[%c0_11, %c0_12] : memref<32x128xf32, #tpu.memory_space<vmem>>, vector<32x128xf32>
      tpu.vector_store %arg6[%c0_11, %c0_12], %12 {strides = array<i32>} : memref<32x128xf32, #tpu.memory_space<vmem>>, vector<32x128xf32>,
    } else {
    }
    %c0 = arith.constant 0 : index
    %c0_1 = arith.constant 0 : index
    %3 = vector.load %arg6[%c0, %c0_1] : memref<32x128xf32, #tpu.memory_space<vmem>>, vector<32x128xf32>
    %c0_2 = arith.constant 0 : index
    %c0_3 = arith.constant 0 : index
    %4 = vector.load %arg2[%c0_2, %c0_3] : memref<32x128xbf16, #tpu.memory_space<vmem>>, vector<32x128xbf16>
    %c0_4 = arith.constant 0 : index
    %c0_5 = arith.constant 0 : index
    %5 = vector.load %arg3[%c0_4, %c0_5] : memref<128x128xbf16, #tpu.memory_space<vmem>>, vector<128x128xbf16>
    %cst = arith.constant dense<0.000000e+00> : vector<32x128xf32>
    %6 = tpu.matmul %4, %5, %cst {dimension_numbers = #tpu.dot_dimension_numbers<[1], [0], [0], [1], [0, 0, 1, 1], [], []>} : vector<32x128xbf16>, vector<128x128xbf16>, vector<32x128xf32> -> vector<32x128xf32>
    %7 = arith.addf %3, %6 : vector<32x128xf32>
    %c0_6 = arith.constant 0 : index
    %c0_7 = arith.constant 0 : index
    %8 = vector.load %arg6[%c0_6, %c0_7] : memref<32x128xf32, #tpu.memory_space<vmem>>, vector<32x128xf32>
    tpu.vector_store %arg6[%c0_6, %c0_7], %7 {strides = array<i32>} : memref<32x128xf32, #tpu.memory_space<vmem>>, vector<32x128xf32>,
    %c0_i32_8 = arith.constant 0 : i32
    %9 = arith.cmpi eq, %arg1, %c0_i32_8 : i32
    %10 = arith.extui %9 : i1 to i32
    %c0_i32_9 = arith.constant 0 : i32
    %11 = arith.cmpi ne, %10, %c0_i32_9 : i32
    scf.if %11 {
      %c0_10 = arith.constant 0 : index
      %c0_11 = arith.constant 0 : index
      %12 = vector.load %arg6[%c0_10, %c0_11] : memref<32x128xf32, #tpu.memory_space<vmem>>, vector<32x128xf32>
      %c0_12 = arith.constant 0 : index
      %c0_13 = arith.constant 0 : index
      %13 = vector.load %arg4[%c0_12, %c0_13] : memref<1x128xf32, #tpu.memory_space<vmem>>, vector<1x128xf32>
      %14 = vector.broadcast %13 : vector<1x128xf32> to vector<32x128xf32>
      %15 = arith.addf %12, %14 : vector<32x128xf32>
      %c0_14 = arith.constant 0 : index
      %c0_15 = arith.constant 0 : index
      %16 = vector.load %arg5[%c0_14, %c0_15] : memref<32x128xf32, #tpu.memory_space<vmem>>, vector<32x128xf32>
      tpu.vector_store %arg5[%c0_14, %c0_15], %15 {strides = array<i32>} : memref<32x128xf32, #tpu.memory_space<vmem>>, vector<32x128xf32>,
    } else {
    }
    return
  }
  func.func @transform_0(%arg0: i32, %arg1: i32) -> (i32, i32) {
    %c0_i32 = arith.constant 0 : i32
    return %arg0, %arg1 : i32, i32
  }
  func.func @transform_1(%arg0: i32, %arg1: i32) -> (i32, i32) {
    %c0_i32 = arith.constant 0 : i32
    %c0_i32_0 = arith.constant 0 : i32
    return %arg1, %c0_i32 : i32, i32
  }
  func.func @transform_2(%arg0: i32, %arg1: i32) -> (i32, i32) {
    %c0_i32 = arith.constant 0 : i32
    %c0_i32_0 = arith.constant 0 : i32
    %c0_i32_1 = arith.constant 0 : i32
    return %c0_i32, %c0_i32_0 : i32, i32
  }
  func.func @transform_3(%arg0: i32, %arg1: i32) -> (i32, i32) {
    %c0_i32 = arith.constant 0 : i32
    %c0_i32_0 = arith.constant 0 : i32
    return %arg0, %c0_i32 : i32, i32
  }
}

module attributes {stable_mosaic.version = 11 : i64} {
  func.func @_matmul_bn_kernel(%arg0: i32, %arg1: i32, %arg2: memref<8x128xbf16, #tpu.memory_space<vmem>>, %arg3: memref<128x256xbf16, #tpu.memory_space<vmem>>, %arg4: memref<1x256xf32, #tpu.memory_space<vmem>>, %arg5: memref<8x256xf32, #tpu.memory_space<vmem>>, %arg6: memref<8x256xf32, #tpu.memory_space<vmem>>) attributes {dimension_semantics = [#tpu.dimension_semantics<parallel>, #tpu.dimension_semantics<arbitrary>], iteration_bounds = array<i64: 1, 9>, scalar_prefetch = 0 : i64, scratch_operands = 1 : i64, tpu.core_type = #tpu.core_type<tc>, window_params = [{transform_indices = @transform_0, window_bounds = array<i64: 8, 128>}, {transform_indices = @transform_1, window_bounds = array<i64: 128, 256>}, {pipeline_mode = #tpu.pipeline_mode<synchronous>, transform_indices = @transform_2, window_bounds = array<i64: 1, 256>}, {transform_indices = @transform_3, window_bounds = array<i64: 8, 256>}]} {
    %c0_i32 = arith.constant 0 : i32
    %0 = arith.cmpi eq, %arg1, %c0_i32 : i32
    %1 = arith.extui %0 : i1 to i32
    %c0_i32_0 = arith.constant 0 : i32
    %2 = arith.cmpi ne, %1, %c0_i32_0 : i32
    scf.if %2 {
      %cst_9 = arith.constant 0.000000e+00 : f32
      %12 = vector.broadcast %cst_9 : f32 to vector<8x256xf32>
      %c0_10 = arith.constant 0 : index
      %c0_11 = arith.constant 0 : index
      %13 = vector.load %arg6[%c0_10, %c0_11] : memref<8x256xf32, #tpu.memory_space<vmem>>, vector<8x256xf32>
      tpu.vector_store %arg6[%c0_10, %c0_11], %12 {strides = array<i32>} : memref<8x256xf32, #tpu.memory_space<vmem>>, vector<8x256xf32>,
    } else {
    }
    %c0 = arith.constant 0 : index
    %c0_1 = arith.constant 0 : index
    %3 = vector.load %arg6[%c0, %c0_1] : memref<8x256xf32, #tpu.memory_space<vmem>>, vector<8x256xf32>
    %c0_2 = arith.constant 0 : index
    %c0_3 = arith.constant 0 : index
    %4 = vector.load %arg2[%c0_2, %c0_3] : memref<8x128xbf16, #tpu.memory_space<vmem>>, vector<8x128xbf16>
    %c0_4 = arith.constant 0 : index
    %c0_5 = arith.constant 0 : index
    %5 = vector.load %arg3[%c0_4, %c0_5] : memref<128x256xbf16, #tpu.memory_space<vmem>>, vector<128x256xbf16>
    %cst = arith.constant dense<0.000000e+00> : vector<8x256xf32>
    %6 = tpu.matmul %4, %5, %cst {dimension_numbers = #tpu.dot_dimension_numbers<[1], [0], [0], [1], [0, 0, 1, 1], [], []>} : vector<8x128xbf16>, vector<128x256xbf16>, vector<8x256xf32> -> vector<8x256xf32>
    %7 = arith.addf %3, %6 : vector<8x256xf32>
    %c0_6 = arith.constant 0 : index
    %c0_7 = arith.constant 0 : index
    %8 = vector.load %arg6[%c0_6, %c0_7] : memref<8x256xf32, #tpu.memory_space<vmem>>, vector<8x256xf32>
    tpu.vector_store %arg6[%c0_6, %c0_7], %7 {strides = array<i32>} : memref<8x256xf32, #tpu.memory_space<vmem>>, vector<8x256xf32>,
    %c8_i32 = arith.constant 8 : i32
    %9 = arith.cmpi eq, %arg1, %c8_i32 : i32
    %10 = arith.extui %9 : i1 to i32
    %c0_i32_8 = arith.constant 0 : i32
    %11 = arith.cmpi ne, %10, %c0_i32_8 : i32
    scf.if %11 {
      %c0_9 = arith.constant 0 : index
      %c0_10 = arith.constant 0 : index
      %12 = vector.load %arg6[%c0_9, %c0_10] : memref<8x256xf32, #tpu.memory_space<vmem>>, vector<8x256xf32>
      %c0_11 = arith.constant 0 : index
      %c0_12 = arith.constant 0 : index
      %13 = vector.load %arg4[%c0_11, %c0_12] : memref<1x256xf32, #tpu.memory_space<vmem>>, vector<1x256xf32>
      %14 = vector.broadcast %13 : vector<1x256xf32> to vector<8x256xf32>
      %15 = arith.addf %12, %14 : vector<8x256xf32>
      %cst_13 = arith.constant 0.000000e+00 : f32
      %16 = vector.broadcast %cst_13 : f32 to vector<8x256xf32>
      %17 = arith.maximumf %15, %16 : vector<8x256xf32>
      %c0_14 = arith.constant 0 : index
      %c0_15 = arith.constant 0 : index
      %18 = vector.load %arg5[%c0_14, %c0_15] : memref<8x256xf32, #tpu.memory_space<vmem>>, vector<8x256xf32>
      tpu.vector_store %arg5[%c0_14, %c0_15], %17 {strides = array<i32>} : memref<8x256xf32, #tpu.memory_space<vmem>>, vector<8x256xf32>,
    } else {
    }
    return
  }
  func.func @transform_0(%arg0: i32, %arg1: i32) -> (i32, i32) {
    %c0_i32 = arith.constant 0 : i32
    return %arg0, %arg1 : i32, i32
  }
  func.func @transform_1(%arg0: i32, %arg1: i32) -> (i32, i32) {
    %c0_i32 = arith.constant 0 : i32
    %c0_i32_0 = arith.constant 0 : i32
    return %arg1, %c0_i32 : i32, i32
  }
  func.func @transform_2(%arg0: i32, %arg1: i32) -> (i32, i32) {
    %c0_i32 = arith.constant 0 : i32
    %c0_i32_0 = arith.constant 0 : i32
    %c0_i32_1 = arith.constant 0 : i32
    return %c0_i32, %c0_i32_0 : i32, i32
  }
  func.func @transform_3(%arg0: i32, %arg1: i32) -> (i32, i32) {
    %c0_i32 = arith.constant 0 : i32
    %c0_i32_0 = arith.constant 0 : i32
    return %arg0, %c0_i32 : i32, i32
  }
}

module attributes {stable_mosaic.version = 11 : i64} {
  func.func @_matmul_bn_kernel(%arg0: i32, %arg1: i32, %arg2: memref<8x256xbf16, #tpu.memory_space<vmem>>, %arg3: memref<256x256xbf16, #tpu.memory_space<vmem>>, %arg4: memref<1x256xf32, #tpu.memory_space<vmem>>, %arg5: memref<8x256xf32, #tpu.memory_space<vmem>>, %arg6: memref<8x256xf32, #tpu.memory_space<vmem>>, %arg7: memref<8x256xf32, #tpu.memory_space<vmem>>) attributes {dimension_semantics = [#tpu.dimension_semantics<parallel>, #tpu.dimension_semantics<arbitrary>], iteration_bounds = array<i64: 1, 9>, scalar_prefetch = 0 : i64, scratch_operands = 1 : i64, tpu.core_type = #tpu.core_type<tc>, window_params = [{transform_indices = @transform_0, window_bounds = array<i64: 8, 256>}, {transform_indices = @transform_1, window_bounds = array<i64: 256, 256>}, {pipeline_mode = #tpu.pipeline_mode<synchronous>, transform_indices = @transform_2, window_bounds = array<i64: 1, 256>}, {transform_indices = @transform_3, window_bounds = array<i64: 8, 256>}, {transform_indices = @transform_4, window_bounds = array<i64: 8, 256>}]} {
    %c0_i32 = arith.constant 0 : i32
    %0 = arith.cmpi eq, %arg1, %c0_i32 : i32
    %1 = arith.extui %0 : i1 to i32
    %c0_i32_0 = arith.constant 0 : i32
    %2 = arith.cmpi ne, %1, %c0_i32_0 : i32
    scf.if %2 {
      %cst_9 = arith.constant 0.000000e+00 : f32
      %12 = vector.broadcast %cst_9 : f32 to vector<8x256xf32>
      %c0_10 = arith.constant 0 : index
      %c0_11 = arith.constant 0 : index
      %13 = vector.load %arg7[%c0_10, %c0_11] : memref<8x256xf32, #tpu.memory_space<vmem>>, vector<8x256xf32>
      tpu.vector_store %arg7[%c0_10, %c0_11], %12 {strides = array<i32>} : memref<8x256xf32, #tpu.memory_space<vmem>>, vector<8x256xf32>,
    } else {
    }
    %c0 = arith.constant 0 : index
    %c0_1 = arith.constant 0 : index
    %3 = vector.load %arg7[%c0, %c0_1] : memref<8x256xf32, #tpu.memory_space<vmem>>, vector<8x256xf32>
    %c0_2 = arith.constant 0 : index
    %c0_3 = arith.constant 0 : index
    %4 = vector.load %arg2[%c0_2, %c0_3] : memref<8x256xbf16, #tpu.memory_space<vmem>>, vector<8x256xbf16>
    %c0_4 = arith.constant 0 : index
    %c0_5 = arith.constant 0 : index
    %5 = vector.load %arg3[%c0_4, %c0_5] : memref<256x256xbf16, #tpu.memory_space<vmem>>, vector<256x256xbf16>
    %cst = arith.constant dense<0.000000e+00> : vector<8x256xf32>
    %6 = tpu.matmul %4, %5, %cst {dimension_numbers = #tpu.dot_dimension_numbers<[1], [0], [0], [1], [0, 0, 1, 1], [], []>} : vector<8x256xbf16>, vector<256x256xbf16>, vector<8x256xf32> -> vector<8x256xf32>
    %7 = arith.addf %3, %6 : vector<8x256xf32>
    %c0_6 = arith.constant 0 : index
    %c0_7 = arith.constant 0 : index
    %8 = vector.load %arg7[%c0_6, %c0_7] : memref<8x256xf32, #tpu.memory_space<vmem>>, vector<8x256xf32>
    tpu.vector_store %arg7[%c0_6, %c0_7], %7 {strides = array<i32>} : memref<8x256xf32, #tpu.memory_space<vmem>>, vector<8x256xf32>,
    %c8_i32 = arith.constant 8 : i32
    %9 = arith.cmpi eq, %arg1, %c8_i32 : i32
    %10 = arith.extui %9 : i1 to i32
    %c0_i32_8 = arith.constant 0 : i32
    %11 = arith.cmpi ne, %10, %c0_i32_8 : i32
    scf.if %11 {
      %c0_9 = arith.constant 0 : index
      %c0_10 = arith.constant 0 : index
      %12 = vector.load %arg7[%c0_9, %c0_10] : memref<8x256xf32, #tpu.memory_space<vmem>>, vector<8x256xf32>
      %c0_11 = arith.constant 0 : index
      %c0_12 = arith.constant 0 : index
      %13 = vector.load %arg4[%c0_11, %c0_12] : memref<1x256xf32, #tpu.memory_space<vmem>>, vector<1x256xf32>
      %14 = vector.broadcast %13 : vector<1x256xf32> to vector<8x256xf32>
      %15 = arith.addf %12, %14 : vector<8x256xf32>
      %c0_13 = arith.constant 0 : index
      %c0_14 = arith.constant 0 : index
      %16 = vector.load %arg5[%c0_13, %c0_14] : memref<8x256xf32, #tpu.memory_space<vmem>>, vector<8x256xf32>
      %17 = arith.addf %15, %16 : vector<8x256xf32>
      %cst_15 = arith.constant 0.000000e+00 : f32
      %18 = vector.broadcast %cst_15 : f32 to vector<8x256xf32>
      %19 = arith.maximumf %17, %18 : vector<8x256xf32>
      %c0_16 = arith.constant 0 : index
      %c0_17 = arith.constant 0 : index
      %20 = vector.load %arg6[%c0_16, %c0_17] : memref<8x256xf32, #tpu.memory_space<vmem>>, vector<8x256xf32>
      tpu.vector_store %arg6[%c0_16, %c0_17], %19 {strides = array<i32>} : memref<8x256xf32, #tpu.memory_space<vmem>>, vector<8x256xf32>,
    } else {
    }
    return
  }
  func.func @transform_0(%arg0: i32, %arg1: i32) -> (i32, i32) {
    %c0_i32 = arith.constant 0 : i32
    return %arg0, %arg1 : i32, i32
  }
  func.func @transform_1(%arg0: i32, %arg1: i32) -> (i32, i32) {
    %c0_i32 = arith.constant 0 : i32
    %c0_i32_0 = arith.constant 0 : i32
    return %arg1, %c0_i32 : i32, i32
  }
  func.func @transform_2(%arg0: i32, %arg1: i32) -> (i32, i32) {
    %c0_i32 = arith.constant 0 : i32
    %c0_i32_0 = arith.constant 0 : i32
    %c0_i32_1 = arith.constant 0 : i32
    return %c0_i32, %c0_i32_0 : i32, i32
  }
  func.func @transform_3(%arg0: i32, %arg1: i32) -> (i32, i32) {
    %c0_i32 = arith.constant 0 : i32
    %c0_i32_0 = arith.constant 0 : i32
    return %arg0, %c0_i32 : i32, i32
  }
  func.func @transform_4(%arg0: i32, %arg1: i32) -> (i32, i32) {
    %c0_i32 = arith.constant 0 : i32
    %c0_i32_0 = arith.constant 0 : i32
    return %arg0, %c0_i32 : i32, i32
  }
}

module attributes {stable_mosaic.version = 11 : i64} {
  func.func @_matmul_bn_kernel(%arg0: i32, %arg1: i32, %arg2: memref<8x128xbf16, #tpu.memory_space<vmem>>, %arg3: memref<128x256xbf16, #tpu.memory_space<vmem>>, %arg4: memref<1x256xf32, #tpu.memory_space<vmem>>, %arg5: memref<8x256xf32, #tpu.memory_space<vmem>>, %arg6: memref<8x256xf32, #tpu.memory_space<vmem>>) attributes {dimension_semantics = [#tpu.dimension_semantics<parallel>, #tpu.dimension_semantics<arbitrary>], iteration_bounds = array<i64: 1, 1>, scalar_prefetch = 0 : i64, scratch_operands = 1 : i64, tpu.core_type = #tpu.core_type<tc>, window_params = [{transform_indices = @transform_0, window_bounds = array<i64: 8, 128>}, {transform_indices = @transform_1, window_bounds = array<i64: 128, 256>}, {pipeline_mode = #tpu.pipeline_mode<synchronous>, transform_indices = @transform_2, window_bounds = array<i64: 1, 256>}, {transform_indices = @transform_3, window_bounds = array<i64: 8, 256>}]} {
    %c0_i32 = arith.constant 0 : i32
    %0 = arith.cmpi eq, %arg1, %c0_i32 : i32
    %1 = arith.extui %0 : i1 to i32
    %c0_i32_0 = arith.constant 0 : i32
    %2 = arith.cmpi ne, %1, %c0_i32_0 : i32
    scf.if %2 {
      %cst_10 = arith.constant 0.000000e+00 : f32
      %12 = vector.broadcast %cst_10 : f32 to vector<8x256xf32>
      %c0_11 = arith.constant 0 : index
      %c0_12 = arith.constant 0 : index
      %13 = vector.load %arg6[%c0_11, %c0_12] : memref<8x256xf32, #tpu.memory_space<vmem>>, vector<8x256xf32>
      tpu.vector_store %arg6[%c0_11, %c0_12], %12 {strides = array<i32>} : memref<8x256xf32, #tpu.memory_space<vmem>>, vector<8x256xf32>,
    } else {
    }
    %c0 = arith.constant 0 : index
    %c0_1 = arith.constant 0 : index
    %3 = vector.load %arg6[%c0, %c0_1] : memref<8x256xf32, #tpu.memory_space<vmem>>, vector<8x256xf32>
    %c0_2 = arith.constant 0 : index
    %c0_3 = arith.constant 0 : index
    %4 = vector.load %arg2[%c0_2, %c0_3] : memref<8x128xbf16, #tpu.memory_space<vmem>>, vector<8x128xbf16>
    %c0_4 = arith.constant 0 : index
    %c0_5 = arith.constant 0 : index
    %5 = vector.load %arg3[%c0_4, %c0_5] : memref<128x256xbf16, #tpu.memory_space<vmem>>, vector<128x256xbf16>
    %cst = arith.constant dense<0.000000e+00> : vector<8x256xf32>
    %6 = tpu.matmul %4, %5, %cst {dimension_numbers = #tpu.dot_dimension_numbers<[1], [0], [0], [1], [0, 0, 1, 1], [], []>} : vector<8x128xbf16>, vector<128x256xbf16>, vector<8x256xf32> -> vector<8x256xf32>
    %7 = arith.addf %3, %6 : vector<8x256xf32>
    %c0_6 = arith.constant 0 : index
    %c0_7 = arith.constant 0 : index
    %8 = vector.load %arg6[%c0_6, %c0_7] : memref<8x256xf32, #tpu.memory_space<vmem>>, vector<8x256xf32>
    tpu.vector_store %arg6[%c0_6, %c0_7], %7 {strides = array<i32>} : memref<8x256xf32, #tpu.memory_space<vmem>>, vector<8x256xf32>,
    %c0_i32_8 = arith.constant 0 : i32
    %9 = arith.cmpi eq, %arg1, %c0_i32_8 : i32
    %10 = arith.extui %9 : i1 to i32
    %c0_i32_9 = arith.constant 0 : i32
    %11 = arith.cmpi ne, %10, %c0_i32_9 : i32
    scf.if %11 {
      %c0_10 = arith.constant 0 : index
      %c0_11 = arith.constant 0 : index
      %12 = vector.load %arg6[%c0_10, %c0_11] : memref<8x256xf32, #tpu.memory_space<vmem>>, vector<8x256xf32>
      %c0_12 = arith.constant 0 : index
      %c0_13 = arith.constant 0 : index
      %13 = vector.load %arg4[%c0_12, %c0_13] : memref<1x256xf32, #tpu.memory_space<vmem>>, vector<1x256xf32>
      %14 = vector.broadcast %13 : vector<1x256xf32> to vector<8x256xf32>
      %15 = arith.addf %12, %14 : vector<8x256xf32>
      %c0_14 = arith.constant 0 : index
      %c0_15 = arith.constant 0 : index
      %16 = vector.load %arg5[%c0_14, %c0_15] : memref<8x256xf32, #tpu.memory_space<vmem>>, vector<8x256xf32>
      tpu.vector_store %arg5[%c0_14, %c0_15], %15 {strides = array<i32>} : memref<8x256xf32, #tpu.memory_space<vmem>>, vector<8x256xf32>,
    } else {
    }
    return
  }
  func.func @transform_0(%arg0: i32, %arg1: i32) -> (i32, i32) {
    %c0_i32 = arith.constant 0 : i32
    return %arg0, %arg1 : i32, i32
  }
  func.func @transform_1(%arg0: i32, %arg1: i32) -> (i32, i32) {
    %c0_i32 = arith.constant 0 : i32
    %c0_i32_0 = arith.constant 0 : i32
    return %arg1, %c0_i32 : i32, i32
  }
  func.func @transform_2(%arg0: i32, %arg1: i32) -> (i32, i32) {
    %c0_i32 = arith.constant 0 : i32
    %c0_i32_0 = arith.constant 0 : i32
    %c0_i32_1 = arith.constant 0 : i32
    return %c0_i32, %c0_i32_0 : i32, i32
  }
  func.func @transform_3(%arg0: i32, %arg1: i32) -> (i32, i32) {
    %c0_i32 = arith.constant 0 : i32
    %c0_i32_0 = arith.constant 0 : i32
    return %arg0, %c0_i32 : i32, i32
  }
}

module attributes {stable_mosaic.version = 11 : i64} {
  func.func @_matmul_bn_kernel(%arg0: i32, %arg1: i32, %arg2: memref<8x256xbf16, #tpu.memory_space<vmem>>, %arg3: memref<256x512xbf16, #tpu.memory_space<vmem>>, %arg4: memref<1x512xf32, #tpu.memory_space<vmem>>, %arg5: memref<8x512xf32, #tpu.memory_space<vmem>>, %arg6: memref<8x512xf32, #tpu.memory_space<vmem>>) attributes {dimension_semantics = [#tpu.dimension_semantics<parallel>, #tpu.dimension_semantics<arbitrary>], iteration_bounds = array<i64: 1, 9>, scalar_prefetch = 0 : i64, scratch_operands = 1 : i64, tpu.core_type = #tpu.core_type<tc>, window_params = [{transform_indices = @transform_0, window_bounds = array<i64: 8, 256>}, {transform_indices = @transform_1, window_bounds = array<i64: 256, 512>}, {pipeline_mode = #tpu.pipeline_mode<synchronous>, transform_indices = @transform_2, window_bounds = array<i64: 1, 512>}, {transform_indices = @transform_3, window_bounds = array<i64: 8, 512>}]} {
    %c0_i32 = arith.constant 0 : i32
    %0 = arith.cmpi eq, %arg1, %c0_i32 : i32
    %1 = arith.extui %0 : i1 to i32
    %c0_i32_0 = arith.constant 0 : i32
    %2 = arith.cmpi ne, %1, %c0_i32_0 : i32
    scf.if %2 {
      %cst_9 = arith.constant 0.000000e+00 : f32
      %12 = vector.broadcast %cst_9 : f32 to vector<8x512xf32>
      %c0_10 = arith.constant 0 : index
      %c0_11 = arith.constant 0 : index
      %13 = vector.load %arg6[%c0_10, %c0_11] : memref<8x512xf32, #tpu.memory_space<vmem>>, vector<8x512xf32>
      tpu.vector_store %arg6[%c0_10, %c0_11], %12 {strides = array<i32>} : memref<8x512xf32, #tpu.memory_space<vmem>>, vector<8x512xf32>,
    } else {
    }
    %c0 = arith.constant 0 : index
    %c0_1 = arith.constant 0 : index
    %3 = vector.load %arg6[%c0, %c0_1] : memref<8x512xf32, #tpu.memory_space<vmem>>, vector<8x512xf32>
    %c0_2 = arith.constant 0 : index
    %c0_3 = arith.constant 0 : index
    %4 = vector.load %arg2[%c0_2, %c0_3] : memref<8x256xbf16, #tpu.memory_space<vmem>>, vector<8x256xbf16>
    %c0_4 = arith.constant 0 : index
    %c0_5 = arith.constant 0 : index
    %5 = vector.load %arg3[%c0_4, %c0_5] : memref<256x512xbf16, #tpu.memory_space<vmem>>, vector<256x512xbf16>
    %cst = arith.constant dense<0.000000e+00> : vector<8x512xf32>
    %6 = tpu.matmul %4, %5, %cst {dimension_numbers = #tpu.dot_dimension_numbers<[1], [0], [0], [1], [0, 0, 1, 1], [], []>} : vector<8x256xbf16>, vector<256x512xbf16>, vector<8x512xf32> -> vector<8x512xf32>
    %7 = arith.addf %3, %6 : vector<8x512xf32>
    %c0_6 = arith.constant 0 : index
    %c0_7 = arith.constant 0 : index
    %8 = vector.load %arg6[%c0_6, %c0_7] : memref<8x512xf32, #tpu.memory_space<vmem>>, vector<8x512xf32>
    tpu.vector_store %arg6[%c0_6, %c0_7], %7 {strides = array<i32>} : memref<8x512xf32, #tpu.memory_space<vmem>>, vector<8x512xf32>,
    %c8_i32 = arith.constant 8 : i32
    %9 = arith.cmpi eq, %arg1, %c8_i32 : i32
    %10 = arith.extui %9 : i1 to i32
    %c0_i32_8 = arith.constant 0 : i32
    %11 = arith.cmpi ne, %10, %c0_i32_8 : i32
    scf.if %11 {
      %c0_9 = arith.constant 0 : index
      %c0_10 = arith.constant 0 : index
      %12 = vector.load %arg6[%c0_9, %c0_10] : memref<8x512xf32, #tpu.memory_space<vmem>>, vector<8x512xf32>
      %c0_11 = arith.constant 0 : index
      %c0_12 = arith.constant 0 : index
      %13 = vector.load %arg4[%c0_11, %c0_12] : memref<1x512xf32, #tpu.memory_space<vmem>>, vector<1x512xf32>
      %14 = vector.broadcast %13 : vector<1x512xf32> to vector<8x512xf32>
      %15 = arith.addf %12, %14 : vector<8x512xf32>
      %cst_13 = arith.constant 0.000000e+00 : f32
      %16 = vector.broadcast %cst_13 : f32 to vector<8x512xf32>
      %17 = arith.maximumf %15, %16 : vector<8x512xf32>
      %c0_14 = arith.constant 0 : index
      %c0_15 = arith.constant 0 : index
      %18 = vector.load %arg5[%c0_14, %c0_15] : memref<8x512xf32, #tpu.memory_space<vmem>>, vector<8x512xf32>
      tpu.vector_store %arg5[%c0_14, %c0_15], %17 {strides = array<i32>} : memref<8x512xf32, #tpu.memory_space<vmem>>, vector<8x512xf32>,
    } else {
    }
    return
  }
  func.func @transform_0(%arg0: i32, %arg1: i32) -> (i32, i32) {
    %c0_i32 = arith.constant 0 : i32
    return %arg0, %arg1 : i32, i32
  }
  func.func @transform_1(%arg0: i32, %arg1: i32) -> (i32, i32) {
    %c0_i32 = arith.constant 0 : i32
    %c0_i32_0 = arith.constant 0 : i32
    return %arg1, %c0_i32 : i32, i32
  }
  func.func @transform_2(%arg0: i32, %arg1: i32) -> (i32, i32) {
    %c0_i32 = arith.constant 0 : i32
    %c0_i32_0 = arith.constant 0 : i32
    %c0_i32_1 = arith.constant 0 : i32
    return %c0_i32, %c0_i32_0 : i32, i32
  }
  func.func @transform_3(%arg0: i32, %arg1: i32) -> (i32, i32) {
    %c0_i32 = arith.constant 0 : i32
    %c0_i32_0 = arith.constant 0 : i32
    return %arg0, %c0_i32 : i32, i32
  }
}

module attributes {stable_mosaic.version = 11 : i64} {
  func.func @_matmul_bn_kernel(%arg0: i32, %arg1: i32, %arg2: memref<8x256xbf16, #tpu.memory_space<vmem>>, %arg3: memref<256x512xbf16, #tpu.memory_space<vmem>>, %arg4: memref<1x512xf32, #tpu.memory_space<vmem>>, %arg5: memref<8x512xf32, #tpu.memory_space<vmem>>, %arg6: memref<8x512xf32, #tpu.memory_space<vmem>>) attributes {dimension_semantics = [#tpu.dimension_semantics<parallel>, #tpu.dimension_semantics<arbitrary>], iteration_bounds = array<i64: 1, 1>, scalar_prefetch = 0 : i64, scratch_operands = 1 : i64, tpu.core_type = #tpu.core_type<tc>, window_params = [{transform_indices = @transform_0, window_bounds = array<i64: 8, 256>}, {transform_indices = @transform_1, window_bounds = array<i64: 256, 512>}, {pipeline_mode = #tpu.pipeline_mode<synchronous>, transform_indices = @transform_2, window_bounds = array<i64: 1, 512>}, {transform_indices = @transform_3, window_bounds = array<i64: 8, 512>}]} {
    %c0_i32 = arith.constant 0 : i32
    %0 = arith.cmpi eq, %arg1, %c0_i32 : i32
    %1 = arith.extui %0 : i1 to i32
    %c0_i32_0 = arith.constant 0 : i32
    %2 = arith.cmpi ne, %1, %c0_i32_0 : i32
    scf.if %2 {
      %cst_10 = arith.constant 0.000000e+00 : f32
      %12 = vector.broadcast %cst_10 : f32 to vector<8x512xf32>
      %c0_11 = arith.constant 0 : index
      %c0_12 = arith.constant 0 : index
      %13 = vector.load %arg6[%c0_11, %c0_12] : memref<8x512xf32, #tpu.memory_space<vmem>>, vector<8x512xf32>
      tpu.vector_store %arg6[%c0_11, %c0_12], %12 {strides = array<i32>} : memref<8x512xf32, #tpu.memory_space<vmem>>, vector<8x512xf32>,
    } else {
    }
    %c0 = arith.constant 0 : index
    %c0_1 = arith.constant 0 : index
    %3 = vector.load %arg6[%c0, %c0_1] : memref<8x512xf32, #tpu.memory_space<vmem>>, vector<8x512xf32>
    %c0_2 = arith.constant 0 : index
    %c0_3 = arith.constant 0 : index
    %4 = vector.load %arg2[%c0_2, %c0_3] : memref<8x256xbf16, #tpu.memory_space<vmem>>, vector<8x256xbf16>
    %c0_4 = arith.constant 0 : index
    %c0_5 = arith.constant 0 : index
    %5 = vector.load %arg3[%c0_4, %c0_5] : memref<256x512xbf16, #tpu.memory_space<vmem>>, vector<256x512xbf16>
    %cst = arith.constant dense<0.000000e+00> : vector<8x512xf32>
    %6 = tpu.matmul %4, %5, %cst {dimension_numbers = #tpu.dot_dimension_numbers<[1], [0], [0], [1], [0, 0, 1, 1], [], []>} : vector<8x256xbf16>, vector<256x512xbf16>, vector<8x512xf32> -> vector<8x512xf32>
    %7 = arith.addf %3, %6 : vector<8x512xf32>
    %c0_6 = arith.constant 0 : index
    %c0_7 = arith.constant 0 : index
    %8 = vector.load %arg6[%c0_6, %c0_7] : memref<8x512xf32, #tpu.memory_space<vmem>>, vector<8x512xf32>
    tpu.vector_store %arg6[%c0_6, %c0_7], %7 {strides = array<i32>} : memref<8x512xf32, #tpu.memory_space<vmem>>, vector<8x512xf32>,
    %c0_i32_8 = arith.constant 0 : i32
    %9 = arith.cmpi eq, %arg1, %c0_i32_8 : i32
    %10 = arith.extui %9 : i1 to i32
    %c0_i32_9 = arith.constant 0 : i32
    %11 = arith.cmpi ne, %10, %c0_i32_9 : i32
    scf.if %11 {
      %c0_10 = arith.constant 0 : index
      %c0_11 = arith.constant 0 : index
      %12 = vector.load %arg6[%c0_10, %c0_11] : memref<8x512xf32, #tpu.memory_space<vmem>>, vector<8x512xf32>
      %c0_12 = arith.constant 0 : index
      %c0_13 = arith.constant 0 : index
      %13 = vector.load %arg4[%c0_12, %c0_13] : memref<1x512xf32, #tpu.memory_space<vmem>>, vector<1x512xf32>
      %14 = vector.broadcast %13 : vector<1x512xf32> to vector<8x512xf32>
      %15 = arith.addf %12, %14 : vector<8x512xf32>
      %c0_14 = arith.constant 0 : index
      %c0_15 = arith.constant 0 : index
      %16 = vector.load %arg5[%c0_14, %c0_15] : memref<8x512xf32, #tpu.memory_space<vmem>>, vector<8x512xf32>
      tpu.vector_store %arg5[%c0_14, %c0_15], %15 {strides = array<i32>} : memref<8x512xf32, #tpu.memory_space<vmem>>, vector<8x512xf32>,
    } else {
    }
    return
  }
  func.func @transform_0(%arg0: i32, %arg1: i32) -> (i32, i32) {
    %c0_i32 = arith.constant 0 : i32
    return %arg0, %arg1 : i32, i32
  }
  func.func @transform_1(%arg0: i32, %arg1: i32) -> (i32, i32) {
    %c0_i32 = arith.constant 0 : i32
    %c0_i32_0 = arith.constant 0 : i32
    return %arg1, %c0_i32 : i32, i32
  }
  func.func @transform_2(%arg0: i32, %arg1: i32) -> (i32, i32) {
    %c0_i32 = arith.constant 0 : i32
    %c0_i32_0 = arith.constant 0 : i32
    %c0_i32_1 = arith.constant 0 : i32
    return %c0_i32, %c0_i32_0 : i32, i32
  }
  func.func @transform_3(%arg0: i32, %arg1: i32) -> (i32, i32) {
    %c0_i32 = arith.constant 0 : i32
    %c0_i32_0 = arith.constant 0 : i32
    return %arg0, %c0_i32 : i32, i32
  }
}

module attributes {stable_mosaic.version = 11 : i64} {
  func.func @_matmul_bn_kernel(%arg0: i32, %arg1: i32, %arg2: memref<8x512xbf16, #tpu.memory_space<vmem>>, %arg3: memref<512x512xbf16, #tpu.memory_space<vmem>>, %arg4: memref<1x512xf32, #tpu.memory_space<vmem>>, %arg5: memref<8x512xf32, #tpu.memory_space<vmem>>, %arg6: memref<8x512xf32, #tpu.memory_space<vmem>>, %arg7: memref<8x512xf32, #tpu.memory_space<vmem>>) attributes {dimension_semantics = [#tpu.dimension_semantics<parallel>, #tpu.dimension_semantics<arbitrary>], iteration_bounds = array<i64: 1, 9>, scalar_prefetch = 0 : i64, scratch_operands = 1 : i64, tpu.core_type = #tpu.core_type<tc>, window_params = [{transform_indices = @transform_0, window_bounds = array<i64: 8, 512>}, {transform_indices = @transform_1, window_bounds = array<i64: 512, 512>}, {pipeline_mode = #tpu.pipeline_mode<synchronous>, transform_indices = @transform_2, window_bounds = array<i64: 1, 512>}, {transform_indices = @transform_3, window_bounds = array<i64: 8, 512>}, {transform_indices = @transform_4, window_bounds = array<i64: 8, 512>}]} {
    %c0_i32 = arith.constant 0 : i32
    %0 = arith.cmpi eq, %arg1, %c0_i32 : i32
    %1 = arith.extui %0 : i1 to i32
    %c0_i32_0 = arith.constant 0 : i32
    %2 = arith.cmpi ne, %1, %c0_i32_0 : i32
    scf.if %2 {
      %cst_9 = arith.constant 0.000000e+00 : f32
      %12 = vector.broadcast %cst_9 : f32 to vector<8x512xf32>
      %c0_10 = arith.constant 0 : index
      %c0_11 = arith.constant 0 : index
      %13 = vector.load %arg7[%c0_10, %c0_11] : memref<8x512xf32, #tpu.memory_space<vmem>>, vector<8x512xf32>
      tpu.vector_store %arg7[%c0_10, %c0_11], %12 {strides = array<i32>} : memref<8x512xf32, #tpu.memory_space<vmem>>, vector<8x512xf32>,
    } else {
    }
    %c0 = arith.constant 0 : index
    %c0_1 = arith.constant 0 : index
    %3 = vector.load %arg7[%c0, %c0_1] : memref<8x512xf32, #tpu.memory_space<vmem>>, vector<8x512xf32>
    %c0_2 = arith.constant 0 : index
    %c0_3 = arith.constant 0 : index
    %4 = vector.load %arg2[%c0_2, %c0_3] : memref<8x512xbf16, #tpu.memory_space<vmem>>, vector<8x512xbf16>
    %c0_4 = arith.constant 0 : index
    %c0_5 = arith.constant 0 : index
    %5 = vector.load %arg3[%c0_4, %c0_5] : memref<512x512xbf16, #tpu.memory_space<vmem>>, vector<512x512xbf16>
    %cst = arith.constant dense<0.000000e+00> : vector<8x512xf32>
    %6 = tpu.matmul %4, %5, %cst {dimension_numbers = #tpu.dot_dimension_numbers<[1], [0], [0], [1], [0, 0, 1, 1], [], []>} : vector<8x512xbf16>, vector<512x512xbf16>, vector<8x512xf32> -> vector<8x512xf32>
    %7 = arith.addf %3, %6 : vector<8x512xf32>
    %c0_6 = arith.constant 0 : index
    %c0_7 = arith.constant 0 : index
    %8 = vector.load %arg7[%c0_6, %c0_7] : memref<8x512xf32, #tpu.memory_space<vmem>>, vector<8x512xf32>
    tpu.vector_store %arg7[%c0_6, %c0_7], %7 {strides = array<i32>} : memref<8x512xf32, #tpu.memory_space<vmem>>, vector<8x512xf32>,
    %c8_i32 = arith.constant 8 : i32
    %9 = arith.cmpi eq, %arg1, %c8_i32 : i32
    %10 = arith.extui %9 : i1 to i32
    %c0_i32_8 = arith.constant 0 : i32
    %11 = arith.cmpi ne, %10, %c0_i32_8 : i32
    scf.if %11 {
      %c0_9 = arith.constant 0 : index
      %c0_10 = arith.constant 0 : index
      %12 = vector.load %arg7[%c0_9, %c0_10] : memref<8x512xf32, #tpu.memory_space<vmem>>, vector<8x512xf32>
      %c0_11 = arith.constant 0 : index
      %c0_12 = arith.constant 0 : index
      %13 = vector.load %arg4[%c0_11, %c0_12] : memref<1x512xf32, #tpu.memory_space<vmem>>, vector<1x512xf32>
      %14 = vector.broadcast %13 : vector<1x512xf32> to vector<8x512xf32>
      %15 = arith.addf %12, %14 : vector<8x512xf32>
      %c0_13 = arith.constant 0 : index
      %c0_14 = arith.constant 0 : index
      %16 = vector.load %arg5[%c0_13, %c0_14] : memref<8x512xf32, #tpu.memory_space<vmem>>, vector<8x512xf32>
      %17 = arith.addf %15, %16 : vector<8x512xf32>
      %cst_15 = arith.constant 0.000000e+00 : f32
      %18 = vector.broadcast %cst_15 : f32 to vector<8x512xf32>
      %19 = arith.maximumf %17, %18 : vector<8x512xf32>
      %c0_16 = arith.constant 0 : index
      %c0_17 = arith.constant 0 : index
      %20 = vector.load %arg6[%c0_16, %c0_17] : memref<8x512xf32, #tpu.memory_space<vmem>>, vector<8x512xf32>
      tpu.vector_store %arg6[%c0_16, %c0_17], %19 {strides = array<i32>} : memref<8x512xf32, #tpu.memory_space<vmem>>, vector<8x512xf32>,
    } else {
    }
    return
  }
  func.func @transform_0(%arg0: i32, %arg1: i32) -> (i32, i32) {
    %c0_i32 = arith.constant 0 : i32
    return %arg0, %arg1 : i32, i32
  }
  func.func @transform_1(%arg0: i32, %arg1: i32) -> (i32, i32) {
    %c0_i32 = arith.constant 0 : i32
    %c0_i32_0 = arith.constant 0 : i32
    return %arg1, %c0_i32 : i32, i32
  }
  func.func @transform_2(%arg0: i32, %arg1: i32) -> (i32, i32) {
    %c0_i32 = arith.constant 0 : i32
    %c0_i32_0 = arith.constant 0 : i32
    %c0_i32_1 = arith.constant 0 : i32
    return %c0_i32, %c0_i32_0 : i32, i32
  }
  func.func @transform_3(%arg0: i32, %arg1: i32) -> (i32, i32) {
    %c0_i32 = arith.constant 0 : i32
    %c0_i32_0 = arith.constant 0 : i32
    return %arg0, %c0_i32 : i32, i32
  }
  func.func @transform_4(%arg0: i32, %arg1: i32) -> (i32, i32) {
    %c0_i32 = arith.constant 0 : i32
    %c0_i32_0 = arith.constant 0 : i32
    return %arg0, %c0_i32 : i32, i32
  }
}

module attributes {stable_mosaic.version = 11 : i64} {
  func.func @_avgpool_fc_kernel(%arg0: i32, %arg1: memref<2x1x512xf32, #tpu.memory_space<vmem>>, %arg2: memref<512x10xf32, #tpu.memory_space<vmem>>, %arg3: memref<1x10xf32, #tpu.memory_space<vmem>>, %arg4: memref<2x10xf32, #tpu.memory_space<vmem>>) attributes {dimension_semantics = [#tpu.dimension_semantics<arbitrary>], iteration_bounds = array<i64: 1>, scalar_prefetch = 0 : i64, scratch_operands = 0 : i64, tpu.core_type = #tpu.core_type<tc>, window_params = [{pipeline_mode = #tpu.pipeline_mode<synchronous>, transform_indices = @transform_0, window_bounds = array<i64: 2, 1, 512>}, {pipeline_mode = #tpu.pipeline_mode<synchronous>, transform_indices = @transform_1, window_bounds = array<i64: 512, 10>}, {pipeline_mode = #tpu.pipeline_mode<synchronous>, transform_indices = @transform_2, window_bounds = array<i64: 1, 10>}, {pipeline_mode = #tpu.pipeline_mode<synchronous>, transform_indices = @transform_3, window_bounds = array<i64: 2, 10>}]} {
    %c0 = arith.constant 0 : index
    %c0_0 = arith.constant 0 : index
    %c0_1 = arith.constant 0 : index
    %0 = vector.load %arg1[%c0, %c0_0, %c0_1] : memref<2x1x512xf32, #tpu.memory_space<vmem>>, vector<2x1x512xf32>
    %cst = arith.constant dense<0.000000e+00> : vector<2x512xf32>
    %1 = vector.multi_reduction <add>, %0, %cst [1] : vector<2x1x512xf32> to vector<2x512xf32>
    %cst_2 = arith.constant 1.000000e+00 : f32
    %2 = vector.broadcast %cst_2 : f32 to vector<2x512xf32>
    %3 = arith.divf %1, %2 : vector<2x512xf32>
    %c0_3 = arith.constant 0 : index
    %c0_4 = arith.constant 0 : index
    %4 = vector.load %arg2[%c0_3, %c0_4] : memref<512x10xf32, #tpu.memory_space<vmem>>, vector<512x10xf32>
    %cst_5 = arith.constant dense<0.000000e+00> : vector<2x10xf32>
    %5 = tpu.matmul %3, %4, %cst_5 {dimension_numbers = #tpu.dot_dimension_numbers<[1], [0], [0], [1], [0, 0, 1, 1], [], []>} : vector<2x512xf32>, vector<512x10xf32>, vector<2x10xf32> -> vector<2x10xf32>
    %c0_6 = arith.constant 0 : index
    %c0_7 = arith.constant 0 : index
    %6 = vector.load %arg3[%c0_6, %c0_7] : memref<1x10xf32, #tpu.memory_space<vmem>>, vector<1x10xf32>
    %7 = vector.broadcast %6 : vector<1x10xf32> to vector<2x10xf32>
    %8 = arith.addf %5, %7 : vector<2x10xf32>
    %c0_8 = arith.constant 0 : index
    %c0_9 = arith.constant 0 : index
    %9 = vector.load %arg4[%c0_8, %c0_9] : memref<2x10xf32, #tpu.memory_space<vmem>>, vector<2x10xf32>
    tpu.vector_store %arg4[%c0_8, %c0_9], %8 {strides = array<i32>} : memref<2x10xf32, #tpu.memory_space<vmem>>, vector<2x10xf32>,
    return
  }
  func.func @transform_0(%arg0: i32) -> (i32, i32, i32) {
    %c0_i32 = arith.constant 0 : i32
    %c0_i32_0 = arith.constant 0 : i32
    %c0_i32_1 = arith.constant 0 : i32
    %c0_i32_2 = arith.constant 0 : i32
    return %c0_i32, %c0_i32_0, %c0_i32_1 : i32, i32, i32
  }
  func.func @transform_1(%arg0: i32) -> (i32, i32) {
    %c0_i32 = arith.constant 0 : i32
    %c0_i32_0 = arith.constant 0 : i32
    %c0_i32_1 = arith.constant 0 : i32
    return %c0_i32, %c0_i32_0 : i32, i32
  }
  func.func @transform_2(%arg0: i32) -> (i32, i32) {
    %c0_i32 = arith.constant 0 : i32
    %c0_i32_0 = arith.constant 0 : i32
    %c0_i32_1 = arith.constant 0 : i32
    return %c0_i32, %c0_i32_0 : i32, i32
  }
  func.func @transform_3(%arg0: i32) -> (i32, i32) {
    %c0_i32 = arith.constant 0 : i32
    %c0_i32_0 = arith.constant 0 : i32
    %c0_i32_1 = arith.constant 0 : i32
    return %c0_i32, %c0_i32_0 : i32, i32
  }
}

</mosaic_0001>

<bundles_post_ra>
// kernel: _lambda_.15
= control target key start
LH: loop header
LB: loop body
LE: loop exit
PB: predicated region body
PF: predicated region fallthrough
CT: control target
= control target key end

     0   :  { %s391_s6 = smov 0   ;;  %s393_s7 = smov 0   ;;  %s637_s0 = inlined_call_operand.vmem [shape: f32[9,128,64], index: 0, kind: input, shape index: {}]   ;;  %s638_s1 = inlined_call_operand.vmem [shape: f32[128,64], index: 1, kind: output, shape index: {}]  }
   0x1   :  { %s395_s8 = smov 0  }
   0x2 LB: > { %s20_s9 = sadd.s32 1, %s375_s7  ;;  %p323_p0 = scmp.ge.s32.totalorder %s379_s8, 1  ;;  %s379_s8 = sphi %s395_s8, %s11_s8   ;;  %s375_s7 = sphi %s393_s7, %s640_s7   ;;  %s371_s6 = sphi %s391_s6, %s639_s6  }
   0x3   : > { %p21_p1 = scmp.ge.s32.totalorder %s20_s9, 9  ;;  %p106_p2 = scmp.lt.s32.totalorder %s379_s8, 10 }
   0x5   : > { %s642_s9 = smov (%p21_p1, %s20_s9), 0  ;;  %p107_p3 = pnand %p323_p0, %p106_p2 }
   0x6   : > { %p131_p4 = scmp.lt.s32.totalorder (!%p107_p3), %s371_s6, 8  ;;  %p326_p5 = scmp.ne.s32.totalorder (!%p107_p3), %s371_s6, 0 }
   0x7   : > { %110 = sbr.rel (%p107_p3) target bundleno = 44 (0x2c), region = 24 }
   0xe   : > { %s132_s10 = scalar_select %p131_p4, %s371_s6, 8 }
   0xf   : > { %149 = sbr.rel (%p326_p5) target bundleno = 27 (0x1b), region = 28  ;;  %vm166_vm0 = vcmask (!%p326_p5), 523264  }
  0x10   : > { %s332_s11 = sshll.u32 %s132_s10, 7 }
  0x11   : > { %s416_s14 = scalar_lea.vmem %s637_s0, %s332_s11 }
  0x12   : > { %v150_v0 = vld [vmem:[%s416_s14] sm:$0xff] (!%p326_p5)  ;;  %v151_v1 = vld [vmem:[%s416_s14 + $0x8] sm:$0xff] (!%p326_p5)  ;;  %v152_v2 = vld [vmem:[%s416_s14 + $0x10] sm:$0xff] (!%p326_p5) }
  0x13   : > { %167 = vst.msk [vmem:[%s638_s1] sm:$0xff] (!%p326_p5), %vm166_vm0, %v150_v0  ;;  %168 = vst.msk [vmem:[%s638_s1 + $0x8] sm:$0xff] (!%p326_p5), %vm166_vm0, %v151_v1  ;;  %v153_v3 = vld [vmem:[%s416_s14 + $0x18] sm:$0xff] (!%p326_p5)  ;;  %v154_v4 = vld [vmem:[%s416_s14 + $0x20] sm:$0xff] (!%p326_p5) }
  0x14   : > { %169 = vst.msk [vmem:[%s638_s1 + $0x10] sm:$0xff] (!%p326_p5), %vm166_vm0, %v152_v2  ;;  %v155_v5 = vld [vmem:[%s416_s14 + $0x28] sm:$0xff] (!%p326_p5)  ;;  %170 = vst.msk [vmem:[%s638_s1 + $0x18] sm:$0xff] (!%p326_p5), %vm166_vm0, %v153_v3  ;;  %v156_v6 = vld [vmem:[%s416_s14 + $0x30] sm:$0xff] (!%p326_p5) }
  0x15   : > { %171 = vst.msk [vmem:[%s638_s1 + $0x20] sm:$0xff] (!%p326_p5), %vm166_vm0, %v154_v4  ;;  %172 = vst.msk [vmem:[%s638_s1 + $0x28] sm:$0xff] (!%p326_p5), %vm166_vm0, %v155_v5  ;;  %v157_v7 = vld [vmem:[%s416_s14 + $0x38] sm:$0xff] (!%p326_p5)  ;;  %v158_v8 = vld [vmem:[%s416_s14 + $0x40] sm:$0xff] (!%p326_p5) }
  0x16   : > { %173 = vst.msk [vmem:[%s638_s1 + $0x30] sm:$0xff] %vm166_vm0, %v156_v6  ;;  %174 = vst.msk [vmem:[%s638_s1 + $0x38] sm:$0xff] %vm166_vm0, %v157_v7  ;;  %v159_v9 = vld [vmem:[%s416_s14 + $0x48] sm:$0xff]  ;;  %v160_v10 = vld [vmem:[%s416_s14 + $0x50] sm:$0xff] }
  0x17   : > { %175 = vst.msk [vmem:[%s638_s1 + $0x40] sm:$0xff] %vm166_vm0, %v158_v8  ;;  %v161_v11 = vld [vmem:[%s416_s14 + $0x58] sm:$0xff]  ;;  %176 = vst.msk [vmem:[%s638_s1 + $0x48] sm:$0xff] %vm166_vm0, %v159_v9  ;;  %v162_v12 = vld [vmem:[%s416_s14 + $0x60] sm:$0xff] }
  0x18   : > { %177 = vst.msk [vmem:[%s638_s1 + $0x50] sm:$0xff] %vm166_vm0, %v160_v10  ;;  %178 = vst.msk [vmem:[%s638_s1 + $0x58] sm:$0xff] %vm166_vm0, %v161_v11  ;;  %v163_v13 = vld [vmem:[%s416_s14 + $0x68] sm:$0xff]  ;;  %v164_v14 = vld [vmem:[%s416_s14 + $0x70] sm:$0xff] }
  0x19   : > { %179 = vst.msk [vmem:[%s638_s1 + $0x60] sm:$0xff] %vm166_vm0, %v162_v12  ;;  %180 = vst.msk [vmem:[%s638_s1 + $0x68] sm:$0xff] %vm166_vm0, %v163_v13  ;;  %v165_v15 = vld [vmem:[%s416_s14 + $0x78] sm:$0xff] }
  0x1a   : > { %181 = vst.msk [vmem:[%s638_s1 + $0x70] sm:$0xff] %vm166_vm0, %v164_v14  ;;  %182 = vst.msk [vmem:[%s638_s1 + $0x78] sm:$0xff] %vm166_vm0, %v165_v15 }
  0x1b PF: > { %p327_p6 = scmp.le.s32.totalorder %s371_s6, 0 }
  0x1c   : > { %v203_v17 = vld [vmem:[%s416_s14] sm:$0xff] (!%p327_p6)  ;;  %vm235_vm1 = vcmask (!%p327_p6), 523264   ;;  %v204_v20 = vld [vmem:[%s416_s14 + $0x8] sm:$0xff] (!%p327_p6)  ;;  %v205_v22 = vld [vmem:[%s416_s14 + $0x10] sm:$0xff] (!%p327_p6) }
  0x1d   : > { %186 = sbr.rel (%p327_p6) target bundleno = 44 (0x2c), region = 32  ;;  %v206_v26 = vld [vmem:[%s416_s14 + $0x18] sm:$0xff] (!%p327_p6)  ;;  %v207_v29 = vld [vmem:[%s416_s14 + $0x20] sm:$0xff] (!%p327_p6)  ;;  %v208_v31 = vld [vmem:[%s416_s14 + $0x28] sm:$0xff] (!%p327_p6) }
  0x1e   : > { %v209_v35 = vld [vmem:[%s416_s14 + $0x30] sm:$0xff] (!%p327_p6)  ;;  %v210_v38 = vld [vmem:[%s416_s14 + $0x38] sm:$0xff] (!%p327_p6)  ;;  %v195_v39 = vld [vmem:[%s638_s1 + $0x40] sm:$0xff] (!%p327_p6) }
  0x1f   : > { %v187_v16 = vld [vmem:[%s638_s1] sm:$0xff] (!%p327_p6)  ;;  %v188_v18 = vld [vmem:[%s638_s1 + $0x8] sm:$0xff] (!%p327_p6)  ;;  %v197_v45 = vld [vmem:[%s638_s1 + $0x50] sm:$0xff] (!%p327_p6) }
  0x20   : > { %v219_v19 = vmax.f32 (!%p327_p6), %v187_v16, %v203_v17  ;;  %v189_v21 = vld [vmem:[%s638_s1 + $0x10] sm:$0xff] (!%p327_p6)  ;;  %v220_v23 = vmax.f32 (!%p327_p6), %v188_v18, %v204_v20  ;;  %v190_v25 = vld [vmem:[%s638_s1 + $0x18] sm:$0xff] (!%p327_p6)  ;;  %v211_v40 = vld [vmem:[%s416_s14 + $0x40] sm:$0xff] (!%p327_p6) }
  0x21   : > { %v221_v24 = vmax.f32 (!%p327_p6), %v189_v21, %v205_v22  ;;  %v191_v27 = vld [vmem:[%s638_s1 + $0x20] sm:$0xff] (!%p327_p6)  ;;  %v222_v28 = vmax.f32 (!%p327_p6), %v190_v25, %v206_v26  ;;  %v192_v30 = vld [vmem:[%s638_s1 + $0x28] sm:$0xff] (!%p327_p6)  ;;  %v227_v42 = vmax.f32 (!%p327_p6), %v195_v39, %v211_v40  ;;  %v213_v47 = vld [vmem:[%s416_s14 + $0x50] sm:$0xff] (!%p327_p6) }
  0x22   : > { %236 = vst.msk [vmem:[%s638_s1] sm:$0xff] (!%p327_p6), %vm235_vm1, %v219_v19  ;;  %237 = vst.msk [vmem:[%s638_s1 + $0x8] sm:$0xff] (!%p327_p6), %vm235_vm1, %v220_v23  ;;  %v223_v32 = vmax.f32 (!%p327_p6), %v191_v27, %v207_v29  ;;  %v224_v33 = vmax.f32 (!%p327_p6), %v192_v30, %v208_v31  ;;  %v193_v34 = vld [vmem:[%s638_s1 + $0x30] sm:$0xff] (!%p327_p6)  ;;  %v194_v36 = vld [vmem:[%s638_s1 + $0x38] sm:$0xff] (!%p327_p6)  ;;  %v229_v50 = vmax.f32 (!%p327_p6), %v197_v45, %v213_v47 }
  0x23   : > { %238 = vst.msk [vmem:[%s638_s1 + $0x10] sm:$0xff] (!%p327_p6), %vm235_vm1, %v221_v24  ;;  %239 = vst.msk [vmem:[%s638_s1 + $0x18] sm:$0xff] (!%p327_p6), %vm235_vm1, %v222_v28  ;;  %v225_v37 = vmax.f32 (!%p327_p6), %v193_v34, %v209_v35  ;;  %v226_v41 = vmax.f32 (!%p327_p6), %v194_v36, %v210_v38  ;;  %v196_v43 = vld [vmem:[%s638_s1 + $0x48] sm:$0xff] (!%p327_p6)  ;;  %v198_v48 = vld [vmem:[%s638_s1 + $0x58] sm:$0xff] (!%p327_p6) }
  0x24   : > { %240 = vst.msk [vmem:[%s638_s1 + $0x20] sm:$0xff] %vm235_vm1, %v223_v32  ;;  %241 = vst.msk [vmem:[%s638_s1 + $0x28] sm:$0xff] %vm235_vm1, %v224_v33  ;;  %v212_v44 = vld [vmem:[%s416_s14 + $0x48] sm:$0xff]  ;;  %v214_v49 = vld [vmem:[%s416_s14 + $0x58] sm:$0xff] }
  0x25   : > { %242 = vst.msk [vmem:[%s638_s1 + $0x30] sm:$0xff] %vm235_vm1, %v225_v37  ;;  %v228_v46 = vmax.f32 %v196_v43, %v212_v44  ;;  %243 = vst.msk [vmem:[%s638_s1 + $0x38] sm:$0xff] %vm235_vm1, %v226_v41  ;;  %v230_v51 = vmax.f32 %v198_v48, %v214_v49  ;;  %v199_v52 = vld [vmem:[%s638_s1 + $0x60] sm:$0xff]  ;;  %v200_v54 = vld [vmem:[%s638_s1 + $0x68] sm:$0xff] }
  0x26   : > { %244 = vst.msk [vmem:[%s638_s1 + $0x40] sm:$0xff] %vm235_vm1, %v227_v42  ;;  %v215_v53 = vld [vmem:[%s416_s14 + $0x60] sm:$0xff]  ;;  %v216_v56 = vld [vmem:[%s416_s14 + $0x68] sm:$0xff]  ;;  %v201_v57 = vld [vmem:[%s638_s1 + $0x70] sm:$0xff] }
  0x27   : > { %245 = vst.msk [vmem:[%s638_s1 + $0x48] sm:$0xff] %vm235_vm1, %v228_v46  ;;  %v231_v55 = vmax.f32 %v199_v52, %v215_v53  ;;  %v217_v58 = vld [vmem:[%s416_s14 + $0x70] sm:$0xff]  ;;  %246 = vst.msk [vmem:[%s638_s1 + $0x50] sm:$0xff] %vm235_vm1, %v229_v50  ;;  %v232_v59 = vmax.f32 %v200_v54, %v216_v56  ;;  %v202_v61 = vld [vmem:[%s638_s1 + $0x78] sm:$0xff] }
  0x28   : > { %247 = vst.msk [vmem:[%s638_s1 + $0x58] sm:$0xff] %vm235_vm1, %v230_v51  ;;  %v233_v60 = vmax.f32 %v201_v57, %v217_v58  ;;  %v218_v62 = vld [vmem:[%s416_s14 + $0x78] sm:$0xff] }
  0x29   : > { %248 = vst.msk [vmem:[%s638_s1 + $0x60] sm:$0xff] %vm235_vm1, %v231_v55  ;;  %v234_v63 = vmax.f32 %v202_v61, %v218_v62  ;;  %249 = vst.msk [vmem:[%s638_s1 + $0x68] sm:$0xff] %vm235_vm1, %v232_v59 }
  0x2a   : > { %250 = vst.msk [vmem:[%s638_s1 + $0x70] sm:$0xff] %vm235_vm1, %v233_v60 }
  0x2b   : > { %251 = vst.msk [vmem:[%s638_s1 + $0x78] sm:$0xff] %vm235_vm1, %v234_v63 }
  0x2c PF: > { %s11_s8 = sadd.s32 1, %s379_s8   ;;  %s639_s6 = smov %s375_s7 }
  0x2d   : > { %p8_p7 = scmp.ge.s32.totalorder %s11_s8, 11   ;;  %s640_s7 = smov %s642_s9 }
  0x2f   :  { %10 = sbr.rel (!%p8_p7) target bundleno = 2 (0x2), region = 62 }

// kernel: _lambda_.14
= control target key start
LH: loop header
LB: loop body
LE: loop exit
PB: predicated region body
PF: predicated region fallthrough
CT: control target
= control target key end

     0   :  { %s1392_s12 = smov 0   ;;  %s1394_s13 = smov 0   ;;  %s1681_s0 = inlined_call_operand.vmem [shape: bf16[512,256], index: 0, kind: input, shape index: {}]   ;;  %s1682_s1 = inlined_call_operand.vmem [shape: bf16[256,64], index: 1, kind: input, shape index: {}]   ;;  %s1683_s2 = inlined_call_operand.vmem [shape: f32[1,64], index: 2, kind: input, shape index: {}]   ;;  %s1684_s3 = inlined_call_operand.vmem [shape: f32[512,64], index: 3, kind: output, shape index: {}]  }
   0x1   :  { %s1396_s14 = smov 0  }
   0x2 LB: > { %s25_s15 = sadd.s32 1, %s1365_s13  ;;  %p1072_p0 = scmp.ge.s32.totalorder %s1369_s14, 1  ;;  %s1369_s14 = sphi %s1396_s14, %s13_s14   ;;  %s1365_s13 = sphi %s1394_s13, %s1686_s13   ;;  %s1361_s12 = sphi %s1392_s12, %s1685_s12  }
   0x3   : > { %p27_p1 = scmp.ge.s32.totalorder %s25_s15, 2  ;;  %p169_p2 = scmp.lt.s32.totalorder %s1369_s14, 3 }
   0x5   : > { %s1688_s15 = smov (%p27_p1, %s25_s15), 0  ;;  %p170_p3 = pnand %p1072_p0, %p169_p2 }
   0x6   : > { %v1283_v0 = vld [vmem:[%s1682_s1 + $0x40] sm:$0xff] (!%p170_p3)   ;;  %s1073_s18 = sshll.u32 (!%p170_p3), %s1361_s12, 5  ;;  %v1285_v2 = vld [vmem:[%s1682_s1 + $0x48] sm:$0xff] (!%p170_p3)   ;;  %v1287_v4 = vld [vmem:[%s1682_s1 + $0x50] sm:$0xff] (!%p170_p3)   ;;  %vm232_vm0 = vcmask (!%p170_p3), 523264   ;;  %v1371_v48 = vmov (!%p170_p3), 0.0  }
   0x7   : > { %173 = sbr.rel (%p170_p3) target bundleno = 328 (0x148), region = 32  ;;  %v1284_v1 = vld [vmem:[%s1682_s1] sm:$0xff] (!%p170_p3)   ;;  %1130 = vmatprep.subr.bf16.mxu0 (!%p170_p3), %v1283_v0  ;;  %1242 = vmatprep.subr.bf16.mxu1 (!%p170_p3), %v1283_v0  ;;  %v1286_v3 = vld [vmem:[%s1682_s1 + $0x8] sm:$0xff] (!%p170_p3)   ;;  %p205_p4 = scmp.lt.s32.totalorder (!%p170_p3), %s1073_s18, 63  ;;  %v1288_v5 = vld [vmem:[%s1682_s1 + $0x10] sm:$0xff] (!%p170_p3)   ;;  %233 = vst.msk [vmem:[#allocation2] sm:$0xff] (!%p170_p3), %vm232_vm0, %v1371_v48 }
   0x8   : > { %1131 = vmatpush3.bf16.msra.mxu0 (!%p170_p3), %v1284_v1  ;;  %1250 = vmatpush3.bf16.msra.mxu1 (!%p170_p3), %v1284_v1  ;;  %v1289_v6 = vld [vmem:[%s1682_s1 + $0x58] sm:$0xff] (!%p170_p3)   ;;  %v1291_v8 = vld [vmem:[%s1682_s1 + $0x60] sm:$0xff] (!%p170_p3)   ;;  %v1293_v10 = vld [vmem:[%s1682_s1 + $0x68] sm:$0xff] (!%p170_p3)   ;;  %234 = vst.msk [vmem:[#allocation2 + $0x8] sm:$0xff] (!%p170_p3), %vm232_vm0, %v1371_v48 }
   0x9   : > { %1132 = vmatprep.subr.bf16.mxu0 (!%p170_p3), %v1285_v2  ;;  %1243 = vmatprep.subr.bf16.mxu1 (!%p170_p3), %v1285_v2  ;;  %v1290_v7 = vld [vmem:[%s1682_s1 + $0x18] sm:$0xff] (!%p170_p3)   ;;  %v1292_v9 = vld [vmem:[%s1682_s1 + $0x20] sm:$0xff] (!%p170_p3)   ;;  %v1294_v13 = vld [vmem:[%s1682_s1 + $0x28] sm:$0xff] (!%p170_p3)   ;;  %235 = vst.msk [vmem:[#allocation2 + $0x10] sm:$0xff] (!%p170_p3), %vm232_vm0, %v1371_v48 }
   0xa   : > { %v1295_v14 = vld [vmem:[%s1682_s1 + $0x70] sm:$0xff] (!%p170_p3)   ;;  %v1297_v16 = vld [vmem:[%s1682_s1 + $0x78] sm:$0xff] (!%p170_p3)   ;;  %236 = vst.msk [vmem:[#allocation2 + $0x18] sm:$0xff] (!%p170_p3), %vm232_vm0, %v1371_v48  ;;  %237 = vst.msk [vmem:[#allocation2 + $0x20] sm:$0xff] (!%p170_p3), %vm232_vm0, %v1371_v48 }
   0xb   : > { %v1296_v15 = vld [vmem:[%s1682_s1 + $0x30] sm:$0xff] (!%p170_p3)   ;;  %v1298_v17 = vld [vmem:[%s1682_s1 + $0x38] sm:$0xff] (!%p170_p3)   ;;  %238 = vst.msk [vmem:[#allocation2 + $0x28] sm:$0xff] (!%p170_p3), %vm232_vm0, %v1371_v48  ;;  %239 = vst.msk [vmem:[#allocation2 + $0x30] sm:$0xff] (!%p170_p3), %vm232_vm0, %v1371_v48 }
   0xc   : > { %1133 = vmatpush3.bf16.msra.mxu0 (!%p170_p3), %v1286_v3  ;;  %1251 = vmatpush3.bf16.msra.mxu1 (!%p170_p3), %v1286_v3  ;;  %240 = vst.msk [vmem:[#allocation2 + $0x38] sm:$0xff] (!%p170_p3), %vm232_vm0, %v1371_v48  ;;  %241 = vst.msk [vmem:[#allocation2 + $0x40] sm:$0xff] (!%p170_p3), %vm232_vm0, %v1371_v48 }
   0xd   : > { %1134 = vmatprep.subr.bf16.mxu0 (!%p170_p3), %v1287_v4  ;;  %1244 = vmatprep.subr.bf16.mxu1 (!%p170_p3), %v1287_v4  ;;  %242 = vst.msk [vmem:[#allocation2 + $0x48] sm:$0xff] (!%p170_p3), %vm232_vm0, %v1371_v48  ;;  %243 = vst.msk [vmem:[#allocation2 + $0x50] sm:$0xff] (!%p170_p3), %vm232_vm0, %v1371_v48 }
   0xe   : > { %s1690_s18 = smov (!%p205_p4, %s1073_s18), 63  ;;  %244 = vst.msk [vmem:[#allocation2 + $0x58] sm:$0xff] %vm232_vm0, %v1371_v48  ;;  %245 = vst.msk [vmem:[#allocation2 + $0x60] sm:$0xff] %vm232_vm0, %v1371_v48  ;;  %v265_v51 = vld [vmem:[#allocation2] sm:$0xff] }
   0xf   : > { %s1129_s6 = sshll.u32 %s1690_s18, 3  ;;  %246 = vst.msk [vmem:[#allocation2 + $0x68] sm:$0xff] %vm232_vm0, %v1371_v48  ;;  %247 = vst.msk [vmem:[#allocation2 + $0x70] sm:$0xff] %vm232_vm0, %v1371_v48  ;;  %v266_v59 = vld [vmem:[#allocation2 + $0x8] sm:$0xff] }
  0x10   : > { %1135 = vmatpush3.bf16.msra.mxu0 %v1288_v5  ;;  %1252 = vmatpush3.bf16.msra.mxu1 %v1288_v5  ;;  %s1445_s11 = scalar_lea.vmem %s1681_s0, %s1129_s6  ;;  %248 = vst.msk [vmem:[#allocation2 + $0x78] sm:$0xff] %vm232_vm0, %v1371_v48  ;;  %249 = vst.msk [vmem:[#allocation2 + $0x80] sm:$0xff] %vm232_vm0, %v1371_v48  ;;  %s1550_s8 = scalar_lea.vmem %s1684_s3, %s1129_s6 }
  0x11   : > { %1136 = vmatprep.subr.bf16.mxu0 %v1289_v6  ;;  %1245 = vmatprep.subr.bf16.mxu1 %v1289_v6  ;;  %v1301_v11 = vld [vmem:[%s1445_s11 + $0x4] ss:$8 sps:$4 sm:$0xff]   ;;  %v1299_v18 = vld [vmem:[%s1445_s11] ss:$8 sps:$4 sm:$0xff]   ;;  %v1305_v20 = vld [vmem:[%s1445_s11 + $0x14] ss:$8 sps:$4 sm:$0xff]  }
  0x12   : > { %v1304_v12 = vld [vmem:[%s1445_s11 + $0x84] ss:$8 sps:$4 sm:$0xff]   ;;  %649 = vmatprep.mubr.bf16.mxu0 %v1301_v11  ;;  %v1302_v19 = vld [vmem:[%s1445_s11 + $0x80] ss:$8 sps:$4 sm:$0xff]   ;;  %v1307_v21 = vld [vmem:[%s1445_s11 + $0x94] ss:$8 sps:$4 sm:$0xff]  }
  0x13   : > { %713 = vmatprep.mubr.bf16.mxu1 %v1304_v12  ;;  %v1309_v22 = vld [vmem:[%s1445_s11 + $0x10] ss:$8 sps:$4 sm:$0xff]   ;;  %v1311_v24 = vld [vmem:[%s1445_s11 + $0x24] ss:$8 sps:$4 sm:$0xff]   ;;  %v1315_v26 = vld [vmem:[%s1445_s11 + $0x20] ss:$8 sps:$4 sm:$0xff]  }
  0x14   : > { %1137 = vmatpush3.bf16.msra.mxu0 %v1290_v7  ;;  %1253 = vmatpush3.bf16.msra.mxu1 %v1290_v7  ;;  %v1310_v23 = vld [vmem:[%s1445_s11 + $0x90] ss:$8 sps:$4 sm:$0xff]   ;;  %v1313_v25 = vld [vmem:[%s1445_s11 + $0xa4] ss:$8 sps:$4 sm:$0xff]   ;;  %v1316_v27 = vld [vmem:[%s1445_s11 + $0xa0] ss:$8 sps:$4 sm:$0xff]  }
  0x15   : > { %1138 = vmatprep.subr.bf16.mxu0 %v1291_v8  ;;  %1246 = vmatprep.subr.bf16.mxu1 %v1291_v8  ;;  %v1317_v28 = vld [vmem:[%s1445_s11 + $0x34] ss:$8 sps:$4 sm:$0xff]   ;;  %v1321_v30 = vld [vmem:[%s1445_s11 + $0x30] ss:$8 sps:$4 sm:$0xff]   ;;  %v1323_v32 = vld [vmem:[%s1445_s11 + $0x44] ss:$8 sps:$4 sm:$0xff]  }
  0x16   : > { %v1319_v29 = vld [vmem:[%s1445_s11 + $0xb4] ss:$8 sps:$4 sm:$0xff]   ;;  %v1322_v31 = vld [vmem:[%s1445_s11 + $0xb0] ss:$8 sps:$4 sm:$0xff]   ;;  %v1325_v33 = vld [vmem:[%s1445_s11 + $0xc4] ss:$8 sps:$4 sm:$0xff]  }
  0x17   : > { %v1327_v34 = vld [vmem:[%s1445_s11 + $0x40] ss:$8 sps:$4 sm:$0xff]   ;;  %v1329_v36 = vld [vmem:[%s1445_s11 + $0x54] ss:$8 sps:$4 sm:$0xff]   ;;  %v1333_v38 = vld [vmem:[%s1445_s11 + $0x50] ss:$8 sps:$4 sm:$0xff]  }
  0x18   : > { %1139 = vmatpush3.bf16.msra.mxu0 %v1292_v9  ;;  %1254 = vmatpush3.bf16.msra.mxu1 %v1292_v9  ;;  %v1328_v35 = vld [vmem:[%s1445_s11 + $0xc0] ss:$8 sps:$4 sm:$0xff]   ;;  %v1331_v37 = vld [vmem:[%s1445_s11 + $0xd4] ss:$8 sps:$4 sm:$0xff]   ;;  %v1334_v39 = vld [vmem:[%s1445_s11 + $0xd0] ss:$8 sps:$4 sm:$0xff]  }
  0x19   : > { %1140 = vmatprep.subr.bf16.mxu0 %v1293_v10  ;;  %1247 = vmatprep.subr.bf16.mxu1 %v1293_v10  ;;  %v1335_v40 = vld [vmem:[%s1445_s11 + $0x64] ss:$8 sps:$4 sm:$0xff]   ;;  %v1339_v42 = vld [vmem:[%s1445_s11 + $0x60] ss:$8 sps:$4 sm:$0xff]   ;;  %v1341_v44 = vld [vmem:[%s1445_s11 + $0x74] ss:$8 sps:$4 sm:$0xff]  }
  0x1a   : > { %v1337_v41 = vld [vmem:[%s1445_s11 + $0xe4] ss:$8 sps:$4 sm:$0xff]   ;;  %v1340_v43 = vld [vmem:[%s1445_s11 + $0xe0] ss:$8 sps:$4 sm:$0xff]   ;;  %v1343_v45 = vld [vmem:[%s1445_s11 + $0xf4] ss:$8 sps:$4 sm:$0xff]  }
  0x1b   : > { %v1345_v46 = vld [vmem:[%s1445_s11 + $0x70] ss:$8 sps:$4 sm:$0xff]   ;;  %250 = vst.msk [vmem:[#allocation2 + $0x88] sm:$0xff] %vm232_vm0, %v1371_v48  ;;  %251 = vst.msk [vmem:[#allocation2 + $0x90] sm:$0xff] %vm232_vm0, %v1371_v48  ;;  %v281_v53 = vld [vmem:[#allocation2 + $0x80] sm:$0xff] }
  0x1c   : > { %1141 = vmatpush3.bf16.msra.mxu0 %v1294_v13  ;;  %1255 = vmatpush3.bf16.msra.mxu1 %v1294_v13  ;;  %v1346_v47 = vld [vmem:[%s1445_s11 + $0xf0] ss:$8 sps:$4 sm:$0xff]   ;;  %252 = vst.msk [vmem:[#allocation2 + $0x98] sm:$0xff] %vm232_vm0, %v1371_v48  ;;  %253 = vst.msk [vmem:[#allocation2 + $0xa0] sm:$0xff] %vm232_vm0, %v1371_v48 }
  0x1d   : > { %1142 = vmatprep.subr.bf16.mxu0 %v1295_v14  ;;  %1248 = vmatprep.subr.bf16.mxu1 %v1295_v14  ;;  %254 = vst.msk [vmem:[#allocation2 + $0xa8] sm:$0xff] %vm232_vm0, %v1371_v48  ;;  %255 = vst.msk [vmem:[#allocation2 + $0xb0] sm:$0xff] %vm232_vm0, %v1371_v48  ;;  %v267_v7 = vld [vmem:[#allocation2 + $0x10] sm:$0xff] }
  0x1e   : > { %256 = vst.msk [vmem:[#allocation2 + $0xb8] sm:$0xff] %vm232_vm0, %v1371_v48  ;;  %257 = vst.msk [vmem:[#allocation2 + $0xc0] sm:$0xff] %vm232_vm0, %v1371_v48 }
  0x1f   : > { %258 = vst.msk [vmem:[#allocation2 + $0xc8] sm:$0xff] %vm232_vm0, %v1371_v48  ;;  %259 = vst.msk [vmem:[#allocation2 + $0xd0] sm:$0xff] %vm232_vm0, %v1371_v48 }
  0x20   : > { %1143 = vmatpush3.bf16.msra.mxu0 %v1296_v15  ;;  %1256 = vmatpush3.bf16.msra.mxu1 %v1296_v15  ;;  %260 = vst.msk [vmem:[#allocation2 + $0xd8] sm:$0xff] %vm232_vm0, %v1371_v48  ;;  %261 = vst.msk [vmem:[#allocation2 + $0xe0] sm:$0xff] %vm232_vm0, %v1371_v48  ;;  %v1539_v15 = vld [vmem:[%s1683_s2] ss:$0 sm:$0xff] }
  0x21   : > { %1144 = vmatprep.subr.bf16.mxu0 %v1297_v16  ;;  %1249 = vmatprep.subr.bf16.mxu1 %v1297_v16  ;;  %262 = vst.msk [vmem:[#allocation2 + $0xe8] sm:$0xff] %vm232_vm0, %v1371_v48  ;;  %263 = vst.msk [vmem:[#allocation2 + $0xf0] sm:$0xff] %vm232_vm0, %v1371_v48  ;;  %v268_v16 = vld [vmem:[#allocation2 + $0x18] sm:$0xff] }
  0x22   : > { %264 = vst.msk [vmem:[#allocation2 + $0xf8] sm:$0xff] %vm232_vm0, %v1371_v48  ;;  %v282_v61 = vld [vmem:[#allocation2 + $0x88] sm:$0xff]  ;;  %v283_v9 = vld [vmem:[#allocation2 + $0x90] sm:$0xff] }
  0x23   : > { %v270_v48 = vld [vmem:[#allocation2 + $0x28] sm:$0xff] }
  0x24   : > { %1145 = vmatpush3.bf16.msra.mxu0 %v1298_v17  ;;  %1257 = vmatpush3.bf16.msra.mxu1 %v1298_v17 }
  0x27   : > { %650 = vmatmul.mubr.bf16.vlgmr.msra.gmra.mrb[0].mxu0 %v1299_v18  ;;  %714 = vmatmul.mubr.bf16.vlgmr.msra.gmra.mrb[0].mxu1 %v1302_v19  ;;  %v284_v18 = vld [vmem:[#allocation2 + $0x98] sm:$0xff] }
  0x28   : > { %657 = vmatprep.mubr.bf16.mxu0 %v1305_v20  ;;  %721 = vmatprep.mubr.bf16.mxu1 %v1307_v21 }
  0x2f   : > { %658 = vmatmul.mubr.bf16.gmra.mrb[4].mxu0 %v1309_v22  ;;  %722 = vmatmul.mubr.bf16.gmra.mrb[4].mxu1 %v1310_v23 }
  0x30   : > { %665 = vmatprep.mubr.bf16.mxu0 %v1311_v24  ;;  %729 = vmatprep.mubr.bf16.mxu1 %v1313_v25 }
  0x37   : > { %666 = vmatmul.mubr.bf16.gmra.mrb[8].mxu0 %v1315_v26  ;;  %730 = vmatmul.mubr.bf16.gmra.mrb[8].mxu1 %v1316_v27 }
  0x38   : > { %673 = vmatprep.mubr.bf16.mxu0 %v1317_v28  ;;  %737 = vmatprep.mubr.bf16.mxu1 %v1319_v29 }
  0x3f   : > { %674 = vmatmul.mubr.bf16.gmra.mrb[12].mxu0 %v1321_v30  ;;  %738 = vmatmul.mubr.bf16.gmra.mrb[12].mxu1 %v1322_v31 }
  0x40   : > { %681 = vmatprep.mubr.bf16.mxu0 %v1323_v32  ;;  %745 = vmatprep.mubr.bf16.mxu1 %v1325_v33 }
  0x47   : > { %682 = vmatmul.mubr.bf16.gmra.mrb[16].mxu0 %v1327_v34  ;;  %746 = vmatmul.mubr.bf16.gmra.mrb[16].mxu1 %v1328_v35 }
  0x48   : > { %689 = vmatprep.mubr.bf16.mxu0 %v1329_v36  ;;  %753 = vmatprep.mubr.bf16.mxu1 %v1331_v37 }
  0x4f   : > { %690 = vmatmul.mubr.bf16.gmra.mrb[20].mxu0 %v1333_v38  ;;  %754 = vmatmul.mubr.bf16.gmra.mrb[20].mxu1 %v1334_v39  ;;  %v269_v38 = vld [vmem:[#allocation2 + $0x20] sm:$0xff] }
  0x50   : > { %697 = vmatprep.mubr.bf16.mxu0 %v1335_v40  ;;  %761 = vmatprep.mubr.bf16.mxu1 %v1337_v41  ;;  %v285_v40 = vld [vmem:[#allocation2 + $0xa0] sm:$0xff] }
  0x57   : > { %698 = vmatmul.mubr.bf16.gmra.mrb[24].mxu0 %v1339_v42  ;;  %762 = vmatmul.mubr.bf16.gmra.mrb[24].mxu1 %v1340_v43 }
  0x58   : > { %705 = vmatprep.mubr.bf16.mxu0 %v1341_v44  ;;  %769 = vmatprep.mubr.bf16.mxu1 %v1343_v45 }
  0x5f   : > { %706 = vmatmul.mubr.bf16.gmra.mrb[28].mxu0 %v1345_v46  ;;  %770 = vmatmul.mubr.bf16.gmra.mrb[28].mxu1 %v1346_v47 }
  0xfa   : > { %v1146_v49 = vpop.f32.mrb[0].mxu0  ;;  %v1194_v50 = vpop.f32.mrb[0].mxu1 }
  0xfb   : > { %v1147_v52 = vpop.f32.mrb[1].mxu0  ;;  %v1195_v54 = vpop.f32.mrb[1].mxu1 }
  0xfc   : > { %v1148_v55 = vadd.f32 %v1147_v52, %v1146_v49  ;;  %v1196_v56 = vadd.f32 %v1195_v54, %v1194_v50  ;;  %v1149_v57 = vpop.f32.mrb[2].mxu0  ;;  %v1197_v58 = vpop.f32.mrb[2].mxu1  ;;  %v286_v50 = vld [vmem:[#allocation2 + $0xa8] sm:$0xff] }
  0xfd   : > { %v1150_v60 = vpop.f32.mrb[3].mxu0  ;;  %v1198_v62 = vpop.f32.mrb[3].mxu1 }
  0xfe   : > { %v778_v63 = vadd.f32 %v1148_v55, %v265_v51  ;;  %v794_v0 = vadd.f32 %v1196_v56, %v281_v53  ;;  %v1151_v1 = vadd.f32 %v1150_v60, %v1149_v57  ;;  %v1199_v2 = vadd.f32 %v1198_v62, %v1197_v58 }
 0x100   : > { %811 = vst.msk [vmem:[#allocation2] sm:$0xff] %vm232_vm0, %v778_v63  ;;  %827 = vst.msk [vmem:[#allocation2 + $0x80] sm:$0xff] %vm232_vm0, %v794_v0  ;;  %v779_v3 = vadd.f32 %v1151_v1, %v266_v59  ;;  %v795_v4 = vadd.f32 %v1199_v2, %v282_v61 }
 0x102   : > { %812 = vst.msk [vmem:[#allocation2 + $0x8] sm:$0xff] %vm232_vm0, %v779_v3  ;;  %828 = vst.msk [vmem:[#allocation2 + $0x88] sm:$0xff] %vm232_vm0, %v795_v4  ;;  %v1152_v5 = vpop.f32.mrb[4].mxu0  ;;  %v1200_v6 = vpop.f32.mrb[4].mxu1 }
 0x103   : > { %v1153_v8 = vpop.f32.mrb[5].mxu0  ;;  %v1201_v10 = vpop.f32.mrb[5].mxu1 }
 0x104   : > { %v1154_v11 = vadd.f32 %v1153_v8, %v1152_v5  ;;  %v1202_v12 = vadd.f32 %v1201_v10, %v1200_v6  ;;  %v1155_v13 = vpop.f32.mrb[6].mxu0  ;;  %v1203_v14 = vpop.f32.mrb[6].mxu1  ;;  %v271_v6 = vld [vmem:[#allocation2 + $0x30] sm:$0xff] }
 0x105   : > { %v1156_v17 = vpop.f32.mrb[7].mxu0  ;;  %v1204_v19 = vpop.f32.mrb[7].mxu1  ;;  %v287_v8 = vld [vmem:[#allocation2 + $0xb0] sm:$0xff] }
 0x106   : > { %v780_v20 = vadd.f32 %v1154_v11, %v267_v7  ;;  %v796_v21 = vadd.f32 %v1202_v12, %v283_v9  ;;  %v1157_v22 = vadd.f32 %v1156_v17, %v1155_v13  ;;  %v1205_v23 = vadd.f32 %v1204_v19, %v1203_v14  ;;  %v272_v17 = vld [vmem:[#allocation2 + $0x38] sm:$0xff] }
 0x107   : > { %v846_v24 = vld [vmem:[#allocation2] sm:$0xff]  ;;  %v288_v19 = vld [vmem:[#allocation2 + $0xb8] sm:$0xff] }
 0x108   : > { %v862_v25 = vld [vmem:[#allocation2 + $0x80] sm:$0xff]  ;;  %v885_v26 = vadd.f32 %v1539_v15, %v846_v24  ;;  %813 = vst.msk [vmem:[#allocation2 + $0x10] sm:$0xff] %vm232_vm0, %v780_v20  ;;  %829 = vst.msk [vmem:[#allocation2 + $0x90] sm:$0xff] %vm232_vm0, %v796_v21  ;;  %v781_v28 = vadd.f32 %v1157_v22, %v268_v16  ;;  %v797_v29 = vadd.f32 %v1205_v23, %v284_v18 }
 0x109   : > { %v901_v27 = vadd.f32 %v1539_v15, %v862_v25  ;;  %v847_v30 = vld [vmem:[#allocation2 + $0x8] sm:$0xff] }
 0x10a   : > { %v863_v31 = vld [vmem:[#allocation2 + $0x88] sm:$0xff]  ;;  %v917_v32 = vmax.f32 %v885_v26, 0.0  ;;  %v886_v34 = vadd.f32 %v1539_v15, %v847_v30  ;;  %814 = vst.msk [vmem:[#allocation2 + $0x18] sm:$0xff] %vm232_vm0, %v781_v28  ;;  %830 = vst.msk [vmem:[#allocation2 + $0x98] sm:$0xff] %vm232_vm0, %v797_v29  ;;  %v1158_v36 = vpop.f32.mrb[8].mxu0  ;;  %v1206_v37 = vpop.f32.mrb[8].mxu1 }
 0x10b   : > { %v933_v33 = vmax.f32 %v901_v27, 0.0  ;;  %v902_v35 = vadd.f32 %v1539_v15, %v863_v31  ;;  %v1159_v39 = vpop.f32.mrb[9].mxu0  ;;  %v1207_v41 = vpop.f32.mrb[9].mxu1 }
 0x10c   : > { %949 = vst.msk [vmem:[%s1550_s8] sm:$0xff] %vm232_vm0, %v917_v32  ;;  %v918_v42 = vmax.f32 %v886_v34, 0.0  ;;  %v1160_v44 = vadd.f32 %v1159_v39, %v1158_v36  ;;  %v1208_v45 = vadd.f32 %v1207_v41, %v1206_v37  ;;  %v1161_v46 = vpop.f32.mrb[10].mxu0  ;;  %v1209_v47 = vpop.f32.mrb[10].mxu1  ;;  %v273_v39 = vld [vmem:[#allocation2 + $0x40] sm:$0xff] }
 0x10d   : > { %965 = vst.msk [vmem:[%s1550_s8 + $0x80] sm:$0xff] %vm232_vm0, %v933_v33  ;;  %v934_v43 = vmax.f32 %v902_v35, 0.0  ;;  %v1162_v49 = vpop.f32.mrb[11].mxu0  ;;  %v1210_v51 = vpop.f32.mrb[11].mxu1  ;;  %v289_v41 = vld [vmem:[#allocation2 + $0xc0] sm:$0xff] }
 0x10e   : > { %950 = vst.msk [vmem:[%s1550_s8 + $0x8] sm:$0xff] %vm232_vm0, %v918_v42  ;;  %v782_v52 = vadd.f32 %v1160_v44, %v269_v38  ;;  %v798_v53 = vadd.f32 %v1208_v45, %v285_v40  ;;  %v1163_v54 = vadd.f32 %v1162_v49, %v1161_v46  ;;  %v1211_v55 = vadd.f32 %v1210_v51, %v1209_v47  ;;  %v274_v49 = vld [vmem:[#allocation2 + $0x48] sm:$0xff] }
 0x10f   : > { %966 = vst.msk [vmem:[%s1550_s8 + $0x88] sm:$0xff] %vm232_vm0, %v934_v43  ;;  %v848_v56 = vld [vmem:[#allocation2 + $0x10] sm:$0xff]  ;;  %v290_v51 = vld [vmem:[#allocation2 + $0xc8] sm:$0xff] }
 0x110   : > { %v864_v57 = vld [vmem:[#allocation2 + $0x90] sm:$0xff]  ;;  %v887_v58 = vadd.f32 %v1539_v15, %v848_v56  ;;  %815 = vst.msk [vmem:[#allocation2 + $0x20] sm:$0xff] %vm232_vm0, %v782_v52  ;;  %831 = vst.msk [vmem:[#allocation2 + $0xa0] sm:$0xff] %vm232_vm0, %v798_v53  ;;  %v783_v60 = vadd.f32 %v1163_v54, %v270_v48  ;;  %v799_v61 = vadd.f32 %v1211_v55, %v286_v50 }
 0x111   : > { %v903_v59 = vadd.f32 %v1539_v15, %v864_v57  ;;  %v849_v62 = vld [vmem:[#allocation2 + $0x18] sm:$0xff] }
 0x112   : > { %v865_v63 = vld [vmem:[#allocation2 + $0x98] sm:$0xff]  ;;  %v919_v0 = vmax.f32 %v887_v58, 0.0  ;;  %v888_v2 = vadd.f32 %v1539_v15, %v849_v62  ;;  %816 = vst.msk [vmem:[#allocation2 + $0x28] sm:$0xff] %vm232_vm0, %v783_v60  ;;  %832 = vst.msk [vmem:[#allocation2 + $0xa8] sm:$0xff] %vm232_vm0, %v799_v61  ;;  %v1164_v4 = vpop.f32.mrb[12].mxu0  ;;  %v1212_v5 = vpop.f32.mrb[12].mxu1 }
 0x113   : > { %v935_v1 = vmax.f32 %v903_v59, 0.0  ;;  %v904_v3 = vadd.f32 %v1539_v15, %v865_v63  ;;  %v1165_v7 = vpop.f32.mrb[13].mxu0  ;;  %v1213_v9 = vpop.f32.mrb[13].mxu1 }
 0x114   : > { %951 = vst.msk [vmem:[%s1550_s8 + $0x10] sm:$0xff] %vm232_vm0, %v919_v0  ;;  %v920_v10 = vmax.f32 %v888_v2, 0.0  ;;  %v1166_v12 = vadd.f32 %v1165_v7, %v1164_v4  ;;  %v1214_v13 = vadd.f32 %v1213_v9, %v1212_v5  ;;  %v1167_v14 = vpop.f32.mrb[14].mxu0  ;;  %v1215_v16 = vpop.f32.mrb[14].mxu1  ;;  %v275_v7 = vld [vmem:[#allocation2 + $0x50] sm:$0xff] }
 0x115   : > { %967 = vst.msk [vmem:[%s1550_s8 + $0x90] sm:$0xff] %vm232_vm0, %v935_v1  ;;  %v936_v11 = vmax.f32 %v904_v3, 0.0  ;;  %v1168_v18 = vpop.f32.mrb[15].mxu0  ;;  %v1216_v20 = vpop.f32.mrb[15].mxu1  ;;  %v291_v9 = vld [vmem:[#allocation2 + $0xd0] sm:$0xff] }
 0x116   : > { %952 = vst.msk [vmem:[%s1550_s8 + $0x18] sm:$0xff] %vm232_vm0, %v920_v10  ;;  %v784_v21 = vadd.f32 %v1166_v12, %v271_v6  ;;  %v800_v22 = vadd.f32 %v1214_v13, %v287_v8  ;;  %v1169_v23 = vadd.f32 %v1168_v18, %v1167_v14  ;;  %v1217_v24 = vadd.f32 %v1216_v20, %v1215_v16  ;;  %v276_v18 = vld [vmem:[#allocation2 + $0x58] sm:$0xff] }
 0x117   : > { %968 = vst.msk [vmem:[%s1550_s8 + $0x98] sm:$0xff] %vm232_vm0, %v936_v11  ;;  %v850_v25 = vld [vmem:[#allocation2 + $0x20] sm:$0xff]  ;;  %v292_v20 = vld [vmem:[#allocation2 + $0xd8] sm:$0xff] }
 0x118   : > { %v866_v26 = vld [vmem:[#allocation2 + $0xa0] sm:$0xff]  ;;  %v889_v27 = vadd.f32 %v1539_v15, %v850_v25  ;;  %817 = vst.msk [vmem:[#allocation2 + $0x30] sm:$0xff] %vm232_vm0, %v784_v21  ;;  %833 = vst.msk [vmem:[#allocation2 + $0xb0] sm:$0xff] %vm232_vm0, %v800_v22  ;;  %v785_v29 = vadd.f32 %v1169_v23, %v272_v17  ;;  %v801_v30 = vadd.f32 %v1217_v24, %v288_v19 }
 0x119   : > { %v905_v28 = vadd.f32 %v1539_v15, %v866_v26  ;;  %v851_v31 = vld [vmem:[#allocation2 + $0x28] sm:$0xff] }
 0x11a   : > { %v867_v32 = vld [vmem:[#allocation2 + $0xa8] sm:$0xff]  ;;  %v921_v33 = vmax.f32 %v889_v27, 0.0  ;;  %v890_v35 = vadd.f32 %v1539_v15, %v851_v31  ;;  %818 = vst.msk [vmem:[#allocation2 + $0x38] sm:$0xff] %vm232_vm0, %v785_v29  ;;  %834 = vst.msk [vmem:[#allocation2 + $0xb8] sm:$0xff] %vm232_vm0, %v801_v30  ;;  %v1170_v37 = vpop.f32.mrb[16].mxu0  ;;  %v1218_v38 = vpop.f32.mrb[16].mxu1 }
 0x11b   : > { %v937_v34 = vmax.f32 %v905_v28, 0.0  ;;  %v906_v36 = vadd.f32 %v1539_v15, %v867_v32  ;;  %v1171_v40 = vpop.f32.mrb[17].mxu0  ;;  %v1219_v42 = vpop.f32.mrb[17].mxu1 }
 0x11c   : > { %953 = vst.msk [vmem:[%s1550_s8 + $0x20] sm:$0xff] %vm232_vm0, %v921_v33  ;;  %v922_v43 = vmax.f32 %v890_v35, 0.0  ;;  %v1172_v45 = vadd.f32 %v1171_v40, %v1170_v37  ;;  %v1220_v46 = vadd.f32 %v1219_v42, %v1218_v38  ;;  %v1173_v47 = vpop.f32.mrb[18].mxu0  ;;  %v1221_v48 = vpop.f32.mrb[18].mxu1  ;;  %v277_v40 = vld [vmem:[#allocation2 + $0x60] sm:$0xff] }
 0x11d   : > { %969 = vst.msk [vmem:[%s1550_s8 + $0xa0] sm:$0xff] %vm232_vm0, %v937_v34  ;;  %v938_v44 = vmax.f32 %v906_v36, 0.0  ;;  %v1174_v50 = vpop.f32.mrb[19].mxu0  ;;  %v1222_v52 = vpop.f32.mrb[19].mxu1  ;;  %v293_v42 = vld [vmem:[#allocation2 + $0xe0] sm:$0xff] }
 0x11e   : > { %954 = vst.msk [vmem:[%s1550_s8 + $0x28] sm:$0xff] %vm232_vm0, %v922_v43  ;;  %v786_v53 = vadd.f32 %v1172_v45, %v273_v39  ;;  %v802_v54 = vadd.f32 %v1220_v46, %v289_v41  ;;  %v1175_v55 = vadd.f32 %v1174_v50, %v1173_v47  ;;  %v1223_v56 = vadd.f32 %v1222_v52, %v1221_v48  ;;  %v278_v50 = vld [vmem:[#allocation2 + $0x68] sm:$0xff] }
 0x11f   : > { %970 = vst.msk [vmem:[%s1550_s8 + $0xa8] sm:$0xff] %vm232_vm0, %v938_v44  ;;  %v852_v57 = vld [vmem:[#allocation2 + $0x30] sm:$0xff]  ;;  %v294_v52 = vld [vmem:[#allocation2 + $0xe8] sm:$0xff] }
 0x120   : > { %v868_v58 = vld [vmem:[#allocation2 + $0xb0] sm:$0xff]  ;;  %v891_v59 = vadd.f32 %v1539_v15, %v852_v57  ;;  %819 = vst.msk [vmem:[#allocation2 + $0x40] sm:$0xff] %vm232_vm0, %v786_v53  ;;  %835 = vst.msk [vmem:[#allocation2 + $0xc0] sm:$0xff] %vm232_vm0, %v802_v54  ;;  %v787_v61 = vadd.f32 %v1175_v55, %v274_v49  ;;  %v803_v62 = vadd.f32 %v1223_v56, %v290_v51 }
 0x121   : > { %v907_v60 = vadd.f32 %v1539_v15, %v868_v58  ;;  %v853_v63 = vld [vmem:[#allocation2 + $0x38] sm:$0xff] }
 0x122   : > { %v869_v0 = vld [vmem:[#allocation2 + $0xb8] sm:$0xff]  ;;  %v923_v1 = vmax.f32 %v891_v59, 0.0  ;;  %v892_v3 = vadd.f32 %v1539_v15, %v853_v63  ;;  %820 = vst.msk [vmem:[#allocation2 + $0x48] sm:$0xff] %vm232_vm0, %v787_v61  ;;  %836 = vst.msk [vmem:[#allocation2 + $0xc8] sm:$0xff] %vm232_vm0, %v803_v62  ;;  %v1176_v5 = vpop.f32.mrb[20].mxu0  ;;  %v1224_v6 = vpop.f32.mrb[20].mxu1 }
 0x123   : > { %v939_v2 = vmax.f32 %v907_v60, 0.0  ;;  %v908_v4 = vadd.f32 %v1539_v15, %v869_v0  ;;  %v1177_v8 = vpop.f32.mrb[21].mxu0  ;;  %v1225_v10 = vpop.f32.mrb[21].mxu1 }
 0x124   : > { %955 = vst.msk [vmem:[%s1550_s8 + $0x30] sm:$0xff] %vm232_vm0, %v923_v1  ;;  %v924_v11 = vmax.f32 %v892_v3, 0.0  ;;  %v1178_v13 = vadd.f32 %v1177_v8, %v1176_v5  ;;  %v1226_v14 = vadd.f32 %v1225_v10, %v1224_v6  ;;  %v1179_v16 = vpop.f32.mrb[22].mxu0  ;;  %v1227_v17 = vpop.f32.mrb[22].mxu1  ;;  %v279_v8 = vld [vmem:[#allocation2 + $0x70] sm:$0xff] }
 0x125   : > { %971 = vst.msk [vmem:[%s1550_s8 + $0xb0] sm:$0xff] %vm232_vm0, %v939_v2  ;;  %v940_v12 = vmax.f32 %v908_v4, 0.0  ;;  %v1180_v19 = vpop.f32.mrb[23].mxu0  ;;  %v1228_v21 = vpop.f32.mrb[23].mxu1  ;;  %v295_v10 = vld [vmem:[#allocation2 + $0xf0] sm:$0xff] }
 0x126   : > { %956 = vst.msk [vmem:[%s1550_s8 + $0x38] sm:$0xff] %vm232_vm0, %v924_v11  ;;  %v788_v22 = vadd.f32 %v1178_v13, %v275_v7  ;;  %v804_v23 = vadd.f32 %v1226_v14, %v291_v9  ;;  %v1181_v24 = vadd.f32 %v1180_v19, %v1179_v16  ;;  %v1229_v25 = vadd.f32 %v1228_v21, %v1227_v17  ;;  %v280_v19 = vld [vmem:[#allocation2 + $0x78] sm:$0xff] }
 0x127   : > { %972 = vst.msk [vmem:[%s1550_s8 + $0xb8] sm:$0xff] %vm232_vm0, %v940_v12  ;;  %v854_v26 = vld [vmem:[#allocation2 + $0x40] sm:$0xff]  ;;  %v296_v21 = vld [vmem:[#allocation2 + $0xf8] sm:$0xff] }
 0x128   : > { %v870_v27 = vld [vmem:[#allocation2 + $0xc0] sm:$0xff]  ;;  %v893_v28 = vadd.f32 %v1539_v15, %v854_v26  ;;  %821 = vst.msk [vmem:[#allocation2 + $0x50] sm:$0xff] %vm232_vm0, %v788_v22  ;;  %837 = vst.msk [vmem:[#allocation2 + $0xd0] sm:$0xff] %vm232_vm0, %v804_v23  ;;  %v789_v30 = vadd.f32 %v1181_v24, %v276_v18  ;;  %v805_v31 = vadd.f32 %v1229_v25, %v292_v20 }
 0x129   : > { %v909_v29 = vadd.f32 %v1539_v15, %v870_v27  ;;  %v855_v32 = vld [vmem:[#allocation2 + $0x48] sm:$0xff] }
 0x12a   : > { %v871_v33 = vld [vmem:[#allocation2 + $0xc8] sm:$0xff]  ;;  %v925_v34 = vmax.f32 %v893_v28, 0.0  ;;  %v894_v36 = vadd.f32 %v1539_v15, %v855_v32  ;;  %822 = vst.msk [vmem:[#allocation2 + $0x58] sm:$0xff] %vm232_vm0, %v789_v30  ;;  %838 = vst.msk [vmem:[#allocation2 + $0xd8] sm:$0xff] %vm232_vm0, %v805_v31  ;;  %v1182_v38 = vpop.f32.mrb[24].mxu0  ;;  %v1230_v39 = vpop.f32.mrb[24].mxu1 }
 0x12b   : > { %v941_v35 = vmax.f32 %v909_v29, 0.0  ;;  %v910_v37 = vadd.f32 %v1539_v15, %v871_v33  ;;  %v1183_v41 = vpop.f32.mrb[25].mxu0  ;;  %v1231_v43 = vpop.f32.mrb[25].mxu1 }
 0x12c   : > { %957 = vst.msk [vmem:[%s1550_s8 + $0x40] sm:$0xff] %vm232_vm0, %v925_v34  ;;  %v926_v44 = vmax.f32 %v894_v36, 0.0  ;;  %v1184_v46 = vadd.f32 %v1183_v41, %v1182_v38  ;;  %v1232_v47 = vadd.f32 %v1231_v43, %v1230_v39  ;;  %v1185_v48 = vpop.f32.mrb[26].mxu0  ;;  %v1233_v49 = vpop.f32.mrb[26].mxu1 }
 0x12d   : > { %973 = vst.msk [vmem:[%s1550_s8 + $0xc0] sm:$0xff] %vm232_vm0, %v941_v35  ;;  %v942_v45 = vmax.f32 %v910_v37, 0.0  ;;  %v1186_v51 = vpop.f32.mrb[27].mxu0  ;;  %v1234_v53 = vpop.f32.mrb[27].mxu1 }
 0x12e   : > { %958 = vst.msk [vmem:[%s1550_s8 + $0x48] sm:$0xff] %vm232_vm0, %v926_v44  ;;  %v790_v54 = vadd.f32 %v1184_v46, %v277_v40  ;;  %v806_v55 = vadd.f32 %v1232_v47, %v293_v42  ;;  %v1187_v56 = vadd.f32 %v1186_v51, %v1185_v48  ;;  %v1235_v57 = vadd.f32 %v1234_v53, %v1233_v49 }
 0x12f   : > { %974 = vst.msk [vmem:[%s1550_s8 + $0xc8] sm:$0xff] %vm232_vm0, %v942_v45  ;;  %v856_v58 = vld [vmem:[#allocation2 + $0x50] sm:$0xff] }
 0x130   : > { %v872_v59 = vld [vmem:[#allocation2 + $0xd0] sm:$0xff]  ;;  %v895_v60 = vadd.f32 %v1539_v15, %v856_v58  ;;  %823 = vst.msk [vmem:[#allocation2 + $0x60] sm:$0xff] %vm232_vm0, %v790_v54  ;;  %839 = vst.msk [vmem:[#allocation2 + $0xe0] sm:$0xff] %vm232_vm0, %v806_v55  ;;  %v791_v62 = vadd.f32 %v1187_v56, %v278_v50  ;;  %v807_v63 = vadd.f32 %v1235_v57, %v294_v52 }
 0x131   : > { %v911_v61 = vadd.f32 %v1539_v15, %v872_v59  ;;  %v857_v0 = vld [vmem:[#allocation2 + $0x58] sm:$0xff] }
 0x132   : > { %v873_v1 = vld [vmem:[#allocation2 + $0xd8] sm:$0xff]  ;;  %v927_v2 = vmax.f32 %v895_v60, 0.0  ;;  %v896_v4 = vadd.f32 %v1539_v15, %v857_v0  ;;  %824 = vst.msk [vmem:[#allocation2 + $0x68] sm:$0xff] %vm232_vm0, %v791_v62  ;;  %840 = vst.msk [vmem:[#allocation2 + $0xe8] sm:$0xff] %vm232_vm0, %v807_v63  ;;  %v1188_v6 = vpop.f32.mrb[28].mxu0  ;;  %v1236_v7 = vpop.f32.mrb[28].mxu1 }
 0x133   : > { %v943_v3 = vmax.f32 %v911_v61, 0.0  ;;  %v912_v5 = vadd.f32 %v1539_v15, %v873_v1  ;;  %v1189_v9 = vpop.f32.mrb[29].mxu0  ;;  %v1237_v11 = vpop.f32.mrb[29].mxu1 }
 0x134   : > { %959 = vst.msk [vmem:[%s1550_s8 + $0x50] sm:$0xff] %vm232_vm0, %v927_v2  ;;  %v928_v12 = vmax.f32 %v896_v4, 0.0  ;;  %v1190_v14 = vadd.f32 %v1189_v9, %v1188_v6  ;;  %v1238_v16 = vadd.f32 %v1237_v11, %v1236_v7  ;;  %v1191_v17 = vpop.f32.mrb[30].mxu0  ;;  %v1239_v18 = vpop.f32.mrb[30].mxu1 }
 0x135   : > { %975 = vst.msk [vmem:[%s1550_s8 + $0xd0] sm:$0xff] %vm232_vm0, %v943_v3  ;;  %v944_v13 = vmax.f32 %v912_v5, 0.0  ;;  %v1192_v20 = vpop.f32.mrb[31].mxu0  ;;  %v1240_v22 = vpop.f32.mrb[31].mxu1 }
 0x136   : > { %960 = vst.msk [vmem:[%s1550_s8 + $0x58] sm:$0xff] %vm232_vm0, %v928_v12  ;;  %v792_v23 = vadd.f32 %v1190_v14, %v279_v8  ;;  %v808_v24 = vadd.f32 %v1238_v16, %v295_v10  ;;  %v1193_v25 = vadd.f32 %v1192_v20, %v1191_v17  ;;  %v1241_v26 = vadd.f32 %v1240_v22, %v1239_v18 }
 0x137   : > { %976 = vst.msk [vmem:[%s1550_s8 + $0xd8] sm:$0xff] %vm232_vm0, %v944_v13  ;;  %v858_v27 = vld [vmem:[#allocation2 + $0x60] sm:$0xff] }
 0x138   : > { %v874_v28 = vld [vmem:[#allocation2 + $0xe0] sm:$0xff]  ;;  %v897_v29 = vadd.f32 %v1539_v15, %v858_v27  ;;  %825 = vst.msk [vmem:[#allocation2 + $0x70] sm:$0xff] %vm232_vm0, %v792_v23  ;;  %841 = vst.msk [vmem:[#allocation2 + $0xf0] sm:$0xff] %vm232_vm0, %v808_v24  ;;  %v793_v31 = vadd.f32 %v1193_v25, %v280_v19  ;;  %v809_v32 = vadd.f32 %v1241_v26, %v296_v21 }
 0x139   : > { %v913_v30 = vadd.f32 %v1539_v15, %v874_v28  ;;  %v859_v33 = vld [vmem:[#allocation2 + $0x68] sm:$0xff] }
 0x13a   : > { %v875_v34 = vld [vmem:[#allocation2 + $0xe8] sm:$0xff]  ;;  %v929_v35 = vmax.f32 %v897_v29, 0.0  ;;  %v898_v37 = vadd.f32 %v1539_v15, %v859_v33  ;;  %826 = vst.msk [vmem:[#allocation2 + $0x78] sm:$0xff] %vm232_vm0, %v793_v31  ;;  %842 = vst.msk [vmem:[#allocation2 + $0xf8] sm:$0xff] %vm232_vm0, %v809_v32 }
 0x13b   : > { %v945_v36 = vmax.f32 %v913_v30, 0.0  ;;  %v914_v38 = vadd.f32 %v1539_v15, %v875_v34 }
 0x13c   : > { %961 = vst.msk [vmem:[%s1550_s8 + $0x60] sm:$0xff] %vm232_vm0, %v929_v35  ;;  %v930_v39 = vmax.f32 %v898_v37, 0.0 }
 0x13d   : > { %977 = vst.msk [vmem:[%s1550_s8 + $0xe0] sm:$0xff] %vm232_vm0, %v945_v36  ;;  %v946_v40 = vmax.f32 %v914_v38, 0.0 }
 0x13e   : > { %962 = vst.msk [vmem:[%s1550_s8 + $0x68] sm:$0xff] %vm232_vm0, %v930_v39 }
 0x13f   : > { %978 = vst.msk [vmem:[%s1550_s8 + $0xe8] sm:$0xff] %vm232_vm0, %v946_v40  ;;  %v860_v41 = vld [vmem:[#allocation2 + $0x70] sm:$0xff] }
 0x140   : > { %v876_v42 = vld [vmem:[#allocation2 + $0xf0] sm:$0xff]  ;;  %v899_v43 = vadd.f32 %v1539_v15, %v860_v41 }
 0x141   : > { %v915_v44 = vadd.f32 %v1539_v15, %v876_v42  ;;  %v861_v45 = vld [vmem:[#allocation2 + $0x78] sm:$0xff] }
 0x142   : > { %v877_v46 = vld [vmem:[#allocation2 + $0xf8] sm:$0xff]  ;;  %v931_v47 = vmax.f32 %v899_v43, 0.0  ;;  %v900_v49 = vadd.f32 %v1539_v15, %v861_v45 }
 0x143   : > { %v947_v48 = vmax.f32 %v915_v44, 0.0  ;;  %v916_v50 = vadd.f32 %v1539_v15, %v877_v46 }
 0x144   : > { %963 = vst.msk [vmem:[%s1550_s8 + $0x70] sm:$0xff] %vm232_vm0, %v931_v47  ;;  %v932_v51 = vmax.f32 %v900_v49, 0.0 }
 0x145   : > { %979 = vst.msk [vmem:[%s1550_s8 + $0xf0] sm:$0xff] %vm232_vm0, %v947_v48  ;;  %v948_v52 = vmax.f32 %v916_v50, 0.0 }
 0x146   : > { %964 = vst.msk [vmem:[%s1550_s8 + $0x78] sm:$0xff] %vm232_vm0, %v932_v51 }
 0x147   : > { %980 = vst.msk [vmem:[%s1550_s8 + $0xf8] sm:$0xff] %vm232_vm0, %v948_v52 }
 0x148 PF: > { %s13_s14 = sadd.s32 1, %s1369_s14   ;;  %s1685_s12 = smov %s1365_s13 }
 0x149   : > { %p10_p5 = scmp.ge.s32.totalorder %s13_s14, 4   ;;  %s1686_s13 = smov %s1688_s15 }
 0x14b   :  { %12 = sbr.rel (!%p10_p5) target bundleno = 2 (0x2), region = 73 }

// kernel: _lambda_.16
= control target key start
LH: loop header
LB: loop body
LE: loop exit
PB: predicated region body
PF: predicated region fallthrough
CT: control target
= control target key end

     0   :  { %s980_s12 = smov 0   ;;  %s982_s13 = smov 0   ;;  %s1184_s0 = inlined_call_operand.vmem [shape: bf16[128,640], index: 0, kind: input, shape index: {}]   ;;  %s1185_s1 = inlined_call_operand.vmem [shape: bf16[640,64], index: 1, kind: input, shape index: {}]   ;;  %s1186_s2 = inlined_call_operand.vmem [shape: f32[1,64], index: 2, kind: input, shape index: {}]   ;;  %s1187_s3 = inlined_call_operand.vmem [shape: f32[128,64], index: 3, kind: output, shape index: {}]  }
   0x1   :  { %s984_s14 = smov 0   ;;  %s986_s15 = smov 0  }
   0x2   :  { %s988_s16 = smov 0  }
   0x3 LB: > { %s22_s17 = sadd.s32 1, %s953_s15  ;;  %p41_p1 = scmp.ne.s32.totalorder %s945_s13, %s941_s12  ;;  %s957_s16 = sphi %s988_s16, %s13_s16   ;;  %s953_s15 = sphi %s986_s15, %s1191_s15   ;;  %s949_s14 = sphi %s984_s14, %s1190_s14   ;;  %s945_s13 = sphi %s982_s13, %s1189_s13   ;;  %s941_s12 = sphi %s980_s12, %s1188_s12  }
   0x4   : > { %p23_p0 = scmp.ge.s32.totalorder %s22_s17, 5  ;;  %p42_p2 = scmp.eq.s32.totalorder %s957_s16, 0 }
   0x5   : > { %s34_s19 = sadd.s32 1, %s945_s13  ;;  %p768_p5 = scmp.ge.s32.totalorder %s957_s16, 5 }
   0x6   : > { %s1193_s17 = smov (%p23_p0, %s22_s17), 0  ;;  %p43_p3 = por %p42_p2, %p41_p1 }
   0x7   : > { %s30_s18 = ssub.s32 %s953_s15, %s1193_s17  ;;  %143 = sbr.rel (%p768_p5) target bundleno = 28 (0x1c), region = 20 }
   0x8   : > { %p32_p4 = scmp.eq.s32.totalorder %s30_s18, 0 }
   0xa   : > { %s1015_s20 = scalar_select %p32_p4, %s945_s13, %s34_s19  }
   0xe   : > { %146 = sbr.rel (!%p43_p3) target bundleno = 28 (0x1c), region = 24  ;;  %s148_s21 = sand.u32 (%p43_p3), 1, %s945_s13  }
   0xf   : > { %s770_s22 = sshll.u32 (%p43_p3), %s953_s15, 2  ;;  %s769_s23 = sshll.u32 (%p43_p3), %s148_s21, 6 }
  0x10   : > { %s1023_s26 = scalar_lea.vmem (%p43_p3), %s1184_s0, %s770_s22  ;;  %s150_s27 = scalar_lea.vmem (%p43_p3), [#allocation3], %s769_s23 }
  0x11   : > { %v171_v0 = vld [vmem:[%s1023_s26] sm:$0xf] (%p43_p3)  ;;  %v173_v1 = vld [vmem:[%s1023_s26 + $0x14] sm:$0xf] (%p43_p3)  ;;  %v175_v2 = vld [vmem:[%s1023_s26 + $0x28] sm:$0xf] (%p43_p3) }
  0x12   : > { %172 = vst [vmem:[%s150_s27] sm:$0xf] (%p43_p3), %v171_v0  ;;  %174 = vst [vmem:[%s150_s27 + $0x4] sm:$0xf] (%p43_p3), %v173_v1  ;;  %v177_v3 = vld [vmem:[%s1023_s26 + $0x3c] sm:$0xf] (%p43_p3) }
  0x13   : > { %v179_v4 = vld [vmem:[%s1023_s26 + $0x50] sm:$0xf] (%p43_p3)  ;;  %176 = vst [vmem:[%s150_s27 + $0x8] sm:$0xf] (%p43_p3), %v175_v2  ;;  %178 = vst [vmem:[%s150_s27 + $0xc] sm:$0xf] (%p43_p3), %v177_v3 }
  0x14   : > { %180 = vst [vmem:[%s150_s27 + $0x10] sm:$0xf] (%p43_p3), %v179_v4  ;;  %v181_v5 = vld [vmem:[%s1023_s26 + $0x64] sm:$0xf] (%p43_p3)  ;;  %v183_v6 = vld [vmem:[%s1023_s26 + $0x78] sm:$0xf] (%p43_p3) }
  0x15   : > { %v185_v7 = vld [vmem:[%s1023_s26 + $0x8c] sm:$0xf]  ;;  %182 = vst [vmem:[%s150_s27 + $0x14] sm:$0xf] %v181_v5  ;;  %184 = vst [vmem:[%s150_s27 + $0x18] sm:$0xf] %v183_v6 }
  0x16   : > { %186 = vst [vmem:[%s150_s27 + $0x1c] sm:$0xf] %v185_v7  ;;  %v187_v8 = vld [vmem:[%s1023_s26 + $0xa0] sm:$0xf]  ;;  %v189_v9 = vld [vmem:[%s1023_s26 + $0xb4] sm:$0xf] }
  0x17   : > { %v191_v10 = vld [vmem:[%s1023_s26 + $0xc8] sm:$0xf]  ;;  %188 = vst [vmem:[%s150_s27 + $0x20] sm:$0xf] %v187_v8  ;;  %190 = vst [vmem:[%s150_s27 + $0x24] sm:$0xf] %v189_v9 }
  0x18   : > { %192 = vst [vmem:[%s150_s27 + $0x28] sm:$0xf] %v191_v10  ;;  %v193_v11 = vld [vmem:[%s1023_s26 + $0xdc] sm:$0xf]  ;;  %v195_v12 = vld [vmem:[%s1023_s26 + $0xf0] sm:$0xf] }
  0x19   : > { %v197_v13 = vld [vmem:[%s1023_s26 + $0x104] sm:$0xf]  ;;  %194 = vst [vmem:[%s150_s27 + $0x2c] sm:$0xf] %v193_v11  ;;  %196 = vst [vmem:[%s150_s27 + $0x30] sm:$0xf] %v195_v12 }
  0x1a   : > { %198 = vst [vmem:[%s150_s27 + $0x34] sm:$0xf] %v197_v13  ;;  %v199_v14 = vld [vmem:[%s1023_s26 + $0x118] sm:$0xf]  ;;  %v201_v15 = vld [vmem:[%s1023_s26 + $0x12c] sm:$0xf] }
  0x1b   : > { %200 = vst [vmem:[%s150_s27 + $0x38] sm:$0xf] %v199_v14  ;;  %202 = vst [vmem:[%s150_s27 + $0x3c] sm:$0xf] %v201_v15 }
  0x1c PF: > { %p771_p6 = scmp.ge.s32.totalorder %s957_s16, 1  ;;  %p265_p7 = scmp.lt.s32.totalorder %s957_s16, 6 }
  0x1e   : > { %p266_p8 = pnand %p771_p6, %p265_p7 }
  0x1f   : > { %s272_s28 = sand.u32 (!%p266_p8), 1, %s941_s12   ;;  %s773_s29 = sshll.u32 (!%p266_p8), %s949_s14, 4 }
  0x20   : > { %269 = sbr.rel (%p266_p8) target bundleno = 321 (0x141), region = 69  ;;  %s772_s30 = sshll.u32 (!%p266_p8), %s272_s28, 6 }
  0x21   : > { %p302_p9 = scmp.lt.s32.totalorder (!%p266_p8), %s773_s29, 79  ;;  %s1050_s8 = scalar_lea.vmem (!%p266_p8), [#allocation3], %s772_s30 }
  0x22   : > { %p775_p10 = scmp.ne.s32.totalorder (!%p266_p8), %s949_s14, 0 }
  0x27   : > { %s1195_s29 = smov (!%p302_p9, %s773_s29), 79  ;;  %317 = sbr.rel (%p775_p10) target bundleno = 49 (0x31), region = 77 }
  0x28   : > { %s774_s4 = sshll.u32 %s1195_s29, 2  ;;  %vm318_vm0 = vcmask (!%p775_p10), 523264   ;;  %v959_v16 = vmov (!%p775_p10), 0.0  }
  0x29   : > { %s1048_s7 = scalar_lea.vmem %s1185_s1, %s774_s4  ;;  %319 = vst.msk [vmem:[#allocation2] sm:$0xff] (!%p775_p10), %vm318_vm0, %v959_v16  ;;  %320 = vst.msk [vmem:[#allocation2 + $0x8] sm:$0xff] (!%p775_p10), %vm318_vm0, %v959_v16 }
  0x2a   : > { %321 = vst.msk [vmem:[#allocation2 + $0x10] sm:$0xff] (!%p775_p10), %vm318_vm0, %v959_v16  ;;  %322 = vst.msk [vmem:[#allocation2 + $0x18] sm:$0xff] (!%p775_p10), %vm318_vm0, %v959_v16 }
  0x2b   : > { %323 = vst.msk [vmem:[#allocation2 + $0x20] sm:$0xff] (!%p775_p10), %vm318_vm0, %v959_v16  ;;  %324 = vst.msk [vmem:[#allocation2 + $0x28] sm:$0xff] (!%p775_p10), %vm318_vm0, %v959_v16 }
  0x2c   : > { %325 = vst.msk [vmem:[#allocation2 + $0x30] sm:$0xff] (!%p775_p10), %vm318_vm0, %v959_v16  ;;  %326 = vst.msk [vmem:[#allocation2 + $0x38] sm:$0xff] (!%p775_p10), %vm318_vm0, %v959_v16 }
  0x2d   : > { %327 = vst.msk [vmem:[#allocation2 + $0x40] sm:$0xff] (!%p775_p10), %vm318_vm0, %v959_v16  ;;  %328 = vst.msk [vmem:[#allocation2 + $0x48] sm:$0xff] (!%p775_p10), %vm318_vm0, %v959_v16 }
  0x2e   : > { %329 = vst.msk [vmem:[#allocation2 + $0x50] sm:$0xff] %vm318_vm0, %v959_v16  ;;  %330 = vst.msk [vmem:[#allocation2 + $0x58] sm:$0xff] %vm318_vm0, %v959_v16 }
  0x2f   : > { %331 = vst.msk [vmem:[#allocation2 + $0x60] sm:$0xff] %vm318_vm0, %v959_v16  ;;  %332 = vst.msk [vmem:[#allocation2 + $0x68] sm:$0xff] %vm318_vm0, %v959_v16 }
  0x30   : > { %333 = vst.msk [vmem:[#allocation2 + $0x70] sm:$0xff] %vm318_vm0, %v959_v16  ;;  %334 = vst.msk [vmem:[#allocation2 + $0x78] sm:$0xff] %vm318_vm0, %v959_v16 }
  0x31 PF: > { %v903_v17 = vld [vmem:[%s1048_s7] sm:$0xff]   ;;  %v904_v18 = vld [vmem:[%s1048_s7 + $0x8] sm:$0xff]   ;;  %v905_v19 = vld [vmem:[%s1048_s7 + $0x10] sm:$0xff]   ;;  %vm592_vm1 = vcmask 523264   ;;  %p792_p11 = scmp.ne.s32.totalorder %s949_s14, 4 }
  0x32   : > { %814 = vmatprep.subr.bf16.mxu0 %v903_v17  ;;  %846 = vmatprep.subr.bf16.mxu1 %v903_v17  ;;  %v906_v20 = vld [vmem:[%s1048_s7 + $0x18] sm:$0xff]   ;;  %v911_v21 = vld [vmem:[%s1050_s8] sm:$0xff]   ;;  %v908_v24 = vld [vmem:[%s1048_s7 + $0x28] sm:$0xff]  }
  0x33   : > { %815 = vmatpush3.bf16.msra.mxu0 %v903_v17  ;;  %854 = vmatpush3.bf16.msra.mxu1 %v903_v17  ;;  %v912_v22 = vld [vmem:[%s1050_s8 + $0x20] sm:$0xff]   ;;  %v909_v25 = vld [vmem:[%s1048_s7 + $0x30] sm:$0xff]   ;;  %v910_v26 = vld [vmem:[%s1048_s7 + $0x38] sm:$0xff]  }
  0x34   : > { %816 = vmatprep.subr.bf16.mxu0 %v904_v18  ;;  %847 = vmatprep.subr.bf16.mxu1 %v904_v18  ;;  %v907_v23 = vld [vmem:[%s1048_s7 + $0x20] sm:$0xff]   ;;  %v913_v27 = vld [vmem:[%s1050_s8 + $0x8] sm:$0xff]   ;;  %v915_v29 = vld [vmem:[%s1050_s8 + $0x10] sm:$0xff]  }
  0x35   : > { %830 = vmatprep.mubr.bf16.mxu0 %v911_v21  ;;  %838 = vmatprep.mubr.bf16.mxu1 %v912_v22  ;;  %v914_v28 = vld [vmem:[%s1050_s8 + $0x28] sm:$0xff]   ;;  %v916_v30 = vld [vmem:[%s1050_s8 + $0x30] sm:$0xff]   ;;  %v917_v31 = vld [vmem:[%s1050_s8 + $0x18] sm:$0xff]  }
  0x36   : > { %v918_v32 = vld [vmem:[%s1050_s8 + $0x38] sm:$0xff]   ;;  %v337_v33 = vld [vmem:[#allocation2 + $0x10] sm:$0xff]  ;;  %v335_v35 = vld [vmem:[#allocation2] sm:$0xff] }
  0x37   : > { %817 = vmatpush3.bf16.msra.mxu0 %v904_v18  ;;  %855 = vmatpush3.bf16.msra.mxu1 %v904_v18  ;;  %v345_v34 = vld [vmem:[#allocation2 + $0x50] sm:$0xff]  ;;  %v343_v36 = vld [vmem:[#allocation2 + $0x40] sm:$0xff]  ;;  %v338_v39 = vld [vmem:[#allocation2 + $0x18] sm:$0xff] }
  0x38   : > { %818 = vmatprep.subr.bf16.mxu0 %v905_v19  ;;  %848 = vmatprep.subr.bf16.mxu1 %v905_v19  ;;  %v346_v40 = vld [vmem:[#allocation2 + $0x58] sm:$0xff]  ;;  %v336_v45 = vld [vmem:[#allocation2 + $0x8] sm:$0xff]  ;;  %v341_v57 = vld [vmem:[#allocation2 + $0x30] sm:$0xff] }
  0x39   : > { %v344_v46 = vld [vmem:[#allocation2 + $0x48] sm:$0xff]  ;;  %v349_v58 = vld [vmem:[#allocation2 + $0x70] sm:$0xff]  ;;  %v339_v59 = vld [vmem:[#allocation2 + $0x20] sm:$0xff] }
  0x3a   : > { %v347_v60 = vld [vmem:[#allocation2 + $0x60] sm:$0xff]  ;;  %v342_v63 = vld [vmem:[#allocation2 + $0x38] sm:$0xff]  ;;  %v340_v5 = vld [vmem:[#allocation2 + $0x28] sm:$0xff] }
  0x3b   : > { %819 = vmatpush3.bf16.msra.mxu0 %v905_v19  ;;  %856 = vmatpush3.bf16.msra.mxu1 %v905_v19  ;;  %v350_v0 = vld [vmem:[#allocation2 + $0x78] sm:$0xff]  ;;  %v348_v6 = vld [vmem:[#allocation2 + $0x68] sm:$0xff]  ;;  %v793_v18 = vld [vmem:[%s1186_s2] ss:$0 sm:$0xff] (!%p792_p11) }
  0x3c   : > { %820 = vmatprep.subr.bf16.mxu0 %v906_v20  ;;  %849 = vmatprep.subr.bf16.mxu1 %v906_v20 }
  0x3f   : > { %821 = vmatpush3.bf16.msra.mxu0 %v906_v20  ;;  %857 = vmatpush3.bf16.msra.mxu1 %v906_v20 }
  0x40   : > { %822 = vmatprep.subr.bf16.mxu0 %v907_v23  ;;  %850 = vmatprep.subr.bf16.mxu1 %v907_v23 }
  0x43   : > { %823 = vmatpush3.bf16.msra.mxu0 %v907_v23  ;;  %858 = vmatpush3.bf16.msra.mxu1 %v907_v23 }
  0x44   : > { %824 = vmatprep.subr.bf16.mxu0 %v908_v24  ;;  %851 = vmatprep.subr.bf16.mxu1 %v908_v24 }
  0x47   : > { %825 = vmatpush3.bf16.msra.mxu0 %v908_v24  ;;  %859 = vmatpush3.bf16.msra.mxu1 %v908_v24 }
  0x48   : > { %826 = vmatprep.subr.bf16.mxu0 %v909_v25  ;;  %852 = vmatprep.subr.bf16.mxu1 %v909_v25 }
  0x4b   : > { %827 = vmatpush3.bf16.msra.mxu0 %v909_v25  ;;  %860 = vmatpush3.bf16.msra.mxu1 %v909_v25 }
  0x4c   : > { %828 = vmatprep.subr.bf16.mxu0 %v910_v26  ;;  %853 = vmatprep.subr.bf16.mxu1 %v910_v26 }
  0x4f   : > { %829 = vmatpush3.bf16.msra.mxu0 %v910_v26  ;;  %861 = vmatpush3.bf16.msra.mxu1 %v910_v26 }
  0x52   : > { %831 = vmatmul.mubr.bf16.vlgmr.msra.gmra.mrb[0].mxu0 %v913_v27  ;;  %839 = vmatmul.mubr.bf16.vlgmr.msra.gmra.mrb[0].mxu1 %v914_v28 }
  0x53   : > { %834 = vmatprep.mubr.bf16.mxu0 %v915_v29  ;;  %842 = vmatprep.mubr.bf16.mxu1 %v916_v30 }
  0x5a   : > { %835 = vmatmul.mubr.bf16.gmra.mrb[4].mxu0 %v917_v31  ;;  %843 = vmatmul.mubr.bf16.gmra.mrb[4].mxu1 %v918_v32 }
 0x125   : > { %v832_v37 = vpop.f32.mrb[0].mxu0  ;;  %v840_v38 = vpop.f32.mrb[0].mxu1 }
 0x126   : > { %v578_v41 = vadd.f32 %v832_v37, %v337_v33  ;;  %v586_v42 = vadd.f32 %v840_v38, %v345_v34  ;;  %v513_v43 = vpop.f32.mrb[1].mxu0  ;;  %v545_v44 = vpop.f32.mrb[1].mxu1 }
 0x127   : > { %v576_v47 = vadd.f32 %v513_v43, %v335_v35  ;;  %v584_v48 = vadd.f32 %v545_v44, %v343_v36  ;;  %v833_v49 = vpop.f32.mrb[2].mxu0  ;;  %v841_v50 = vpop.f32.mrb[2].mxu1 }
 0x128   : > { %595 = vst.msk [vmem:[#allocation2 + $0x10] sm:$0xff] %vm592_vm1, %v578_v41  ;;  %603 = vst.msk [vmem:[#allocation2 + $0x50] sm:$0xff] %vm592_vm1, %v586_v42  ;;  %v579_v51 = vadd.f32 %v833_v49, %v338_v39  ;;  %v587_v52 = vadd.f32 %v841_v50, %v346_v40  ;;  %v516_v53 = vpop.f32.mrb[3].mxu0  ;;  %v548_v54 = vpop.f32.mrb[3].mxu1 }
 0x129   : > { %593 = vst.msk [vmem:[#allocation2] sm:$0xff] %vm592_vm1, %v576_v47  ;;  %601 = vst.msk [vmem:[#allocation2 + $0x40] sm:$0xff] %vm592_vm1, %v584_v48  ;;  %v577_v55 = vadd.f32 %v516_v53, %v336_v45  ;;  %v585_v56 = vadd.f32 %v548_v54, %v344_v46 }
 0x12a   : > { %596 = vst.msk [vmem:[#allocation2 + $0x18] sm:$0xff] %vm592_vm1, %v579_v51  ;;  %604 = vst.msk [vmem:[#allocation2 + $0x58] sm:$0xff] %vm592_vm1, %v587_v52 }
 0x12b   : > { %594 = vst.msk [vmem:[#allocation2 + $0x8] sm:$0xff] %vm592_vm1, %v577_v55  ;;  %602 = vst.msk [vmem:[#allocation2 + $0x48] sm:$0xff] %vm592_vm1, %v585_v56 }
 0x12d   : > { %v836_v61 = vpop.f32.mrb[4].mxu0  ;;  %v844_v62 = vpop.f32.mrb[4].mxu1  ;;  %612 = sbr.rel (%p792_p11) target bundleno = 321 (0x141), region = 81 }
 0x12e   : > { %v582_v1 = vadd.f32 %v836_v61, %v341_v57  ;;  %v590_v2 = vadd.f32 %v844_v62, %v349_v58  ;;  %v529_v3 = vpop.f32.mrb[5].mxu0  ;;  %v561_v4 = vpop.f32.mrb[5].mxu1 }
 0x12f   : > { %v580_v7 = vadd.f32 %v529_v3, %v339_v59  ;;  %v588_v8 = vadd.f32 %v561_v4, %v347_v60  ;;  %v837_v9 = vpop.f32.mrb[6].mxu0  ;;  %v845_v10 = vpop.f32.mrb[6].mxu1  ;;  %v615_v22 = vld [vmem:[#allocation2 + $0x10] sm:$0xff] (!%p792_p11) }
 0x130   : > { %599 = vst.msk [vmem:[#allocation2 + $0x30] sm:$0xff] %vm592_vm1, %v582_v1  ;;  %607 = vst.msk [vmem:[#allocation2 + $0x70] sm:$0xff] %vm592_vm1, %v590_v2  ;;  %v583_v11 = vadd.f32 %v837_v9, %v342_v63  ;;  %v591_v12 = vadd.f32 %v845_v10, %v350_v0  ;;  %v532_v13 = vpop.f32.mrb[7].mxu0  ;;  %v564_v14 = vpop.f32.mrb[7].mxu1  ;;  %v613_v17 = vld [vmem:[#allocation2] sm:$0xff] (!%p792_p11)  ;;  %v638_v25 = vadd.f32 (!%p792_p11), %v793_v18, %v615_v22  ;;  %v623_v37 = vld [vmem:[#allocation2 + $0x50] sm:$0xff] (!%p792_p11) }
 0x131   : > { %597 = vst.msk [vmem:[#allocation2 + $0x20] sm:$0xff] %vm592_vm1, %v580_v7  ;;  %605 = vst.msk [vmem:[#allocation2 + $0x60] sm:$0xff] %vm592_vm1, %v588_v8  ;;  %v581_v15 = vadd.f32 %v532_v13, %v340_v5  ;;  %v589_v16 = vadd.f32 %v564_v14, %v348_v6  ;;  %v636_v20 = vadd.f32 (!%p792_p11), %v793_v18, %v613_v17  ;;  %v616_v23 = vld [vmem:[#allocation2 + $0x18] sm:$0xff] (!%p792_p11)  ;;  %v621_v35 = vld [vmem:[#allocation2 + $0x40] sm:$0xff] (!%p792_p11) }
 0x132   : > { %600 = vst.msk [vmem:[#allocation2 + $0x38] sm:$0xff] %vm592_vm1, %v583_v11  ;;  %608 = vst.msk [vmem:[#allocation2 + $0x78] sm:$0xff] %vm592_vm1, %v591_v12  ;;  %v614_v19 = vld [vmem:[#allocation2 + $0x8] sm:$0xff] (!%p792_p11)  ;;  %v639_v26 = vadd.f32 (!%p792_p11), %v793_v18, %v616_v23  ;;  %v654_v38 = vmax.f32 (!%p792_p11), %v638_v25, 0.0  ;;  %v624_v42 = vld [vmem:[#allocation2 + $0x58] sm:$0xff] (!%p792_p11)  ;;  %v644_v47 = vadd.f32 (!%p792_p11), %v793_v18, %v621_v35  ;;  %v646_v52 = vadd.f32 (!%p792_p11), %v793_v18, %v623_v37 }
 0x133   : > { %598 = vst.msk [vmem:[#allocation2 + $0x28] sm:$0xff] %vm592_vm1, %v581_v15  ;;  %606 = vst.msk [vmem:[#allocation2 + $0x68] sm:$0xff] %vm592_vm1, %v589_v16  ;;  %v637_v21 = vadd.f32 (!%p792_p11), %v793_v18, %v614_v19  ;;  %v652_v31 = vmax.f32 (!%p792_p11), %v636_v20, 0.0  ;;  %v622_v36 = vld [vmem:[#allocation2 + $0x48] sm:$0xff] (!%p792_p11)  ;;  %v647_v53 = vadd.f32 (!%p792_p11), %v793_v18, %v624_v42 }
 0x134   : > { %v655_v39 = vmax.f32 %v639_v26, 0.0  ;;  %v645_v48 = vadd.f32 %v793_v18, %v622_v36  ;;  %670 = vst.msk [vmem:[%s1187_s3 + $0x10] sm:$0xff] %vm592_vm1, %v654_v38  ;;  %v660_v55 = vmax.f32 %v644_v47, 0.0  ;;  %v662_v59 = vmax.f32 %v646_v52, 0.0 }
 0x135   : > { %v653_v32 = vmax.f32 %v637_v21, 0.0  ;;  %668 = vst.msk [vmem:[%s1187_s3] sm:$0xff] %vm592_vm1, %v652_v31  ;;  %v663_v60 = vmax.f32 %v647_v53, 0.0 }
 0x136   : > { %671 = vst.msk [vmem:[%s1187_s3 + $0x18] sm:$0xff] %vm592_vm1, %v655_v39  ;;  %v661_v56 = vmax.f32 %v645_v48, 0.0  ;;  %676 = vst.msk [vmem:[%s1187_s3 + $0x40] sm:$0xff] %vm592_vm1, %v660_v55 }
 0x137   : > { %v619_v29 = vld [vmem:[#allocation2 + $0x30] sm:$0xff]  ;;  %669 = vst.msk [vmem:[%s1187_s3 + $0x8] sm:$0xff] %vm592_vm1, %v653_v32  ;;  %678 = vst.msk [vmem:[%s1187_s3 + $0x50] sm:$0xff] %vm592_vm1, %v662_v59 }
 0x138   : > { %v617_v24 = vld [vmem:[#allocation2 + $0x20] sm:$0xff]  ;;  %v642_v34 = vadd.f32 %v793_v18, %v619_v29  ;;  %v627_v49 = vld [vmem:[#allocation2 + $0x70] sm:$0xff]  ;;  %677 = vst.msk [vmem:[%s1187_s3 + $0x48] sm:$0xff] %vm592_vm1, %v661_v56  ;;  %679 = vst.msk [vmem:[%s1187_s3 + $0x58] sm:$0xff] %vm592_vm1, %v663_v60 }
 0x139   : > { %v640_v27 = vadd.f32 %v793_v18, %v617_v24  ;;  %v620_v30 = vld [vmem:[#allocation2 + $0x38] sm:$0xff]  ;;  %v625_v43 = vld [vmem:[#allocation2 + $0x60] sm:$0xff]  ;;  %v650_v58 = vadd.f32 %v793_v18, %v627_v49 }
 0x13a   : > { %v618_v28 = vld [vmem:[#allocation2 + $0x28] sm:$0xff]  ;;  %v643_v41 = vadd.f32 %v793_v18, %v620_v30  ;;  %v658_v46 = vmax.f32 %v642_v34, 0.0  ;;  %v628_v50 = vld [vmem:[#allocation2 + $0x78] sm:$0xff]  ;;  %v648_v54 = vadd.f32 %v793_v18, %v625_v43 }
 0x13b   : > { %v641_v33 = vadd.f32 %v793_v18, %v618_v28  ;;  %v656_v40 = vmax.f32 %v640_v27, 0.0  ;;  %v626_v44 = vld [vmem:[#allocation2 + $0x68] sm:$0xff]  ;;  %v651_v62 = vadd.f32 %v793_v18, %v628_v50  ;;  %v666_v0 = vmax.f32 %v650_v58, 0.0 }
 0x13c   : > { %v659_v51 = vmax.f32 %v643_v41, 0.0  ;;  %674 = vst.msk [vmem:[%s1187_s3 + $0x30] sm:$0xff] %vm592_vm1, %v658_v46  ;;  %v649_v57 = vadd.f32 %v793_v18, %v626_v44  ;;  %v664_v61 = vmax.f32 %v648_v54, 0.0 }
 0x13d   : > { %v657_v45 = vmax.f32 %v641_v33, 0.0  ;;  %672 = vst.msk [vmem:[%s1187_s3 + $0x20] sm:$0xff] %vm592_vm1, %v656_v40  ;;  %v667_v1 = vmax.f32 %v651_v62, 0.0  ;;  %682 = vst.msk [vmem:[%s1187_s3 + $0x70] sm:$0xff] %vm592_vm1, %v666_v0 }
 0x13e   : > { %675 = vst.msk [vmem:[%s1187_s3 + $0x38] sm:$0xff] %vm592_vm1, %v659_v51  ;;  %v665_v63 = vmax.f32 %v649_v57, 0.0  ;;  %680 = vst.msk [vmem:[%s1187_s3 + $0x60] sm:$0xff] %vm592_vm1, %v664_v61 }
 0x13f   : > { %673 = vst.msk [vmem:[%s1187_s3 + $0x28] sm:$0xff] %vm592_vm1, %v657_v45  ;;  %683 = vst.msk [vmem:[%s1187_s3 + $0x78] sm:$0xff] %vm592_vm1, %v667_v1 }
 0x140   : > { %681 = vst.msk [vmem:[%s1187_s3 + $0x68] sm:$0xff] %vm592_vm1, %v665_v63 }
 0x141 PF: > { %s13_s16 = sadd.s32 1, %s957_s16   ;;  %s1188_s12 = smov %s945_s13 }
 0x142   : > { %p10_p12 = scmp.ge.s32.totalorder %s13_s16, 7   ;;  %s1189_s13 = smov %s1015_s20 }
 0x143   : > { %s1190_s14 = smov %s953_s15  ;;  %s1191_s15 = smov %s1193_s17 }
 0x144   :  { %12 = sbr.rel (!%p10_p12) target bundleno = 3 (0x3), region = 119 }

// kernel: _lambda_.17
= control target key start
LH: loop header
LB: loop body
LE: loop exit
PB: predicated region body
PF: predicated region fallthrough
CT: control target
= control target key end

     0   :  { %s1082_s15 = smov 0   ;;  %s1084_s16 = smov 0   ;;  %s1352_s0 = inlined_call_operand.vmem [shape: bf16[128,640], index: 0, kind: input, shape index: {}]   ;;  %s1353_s1 = inlined_call_operand.vmem [shape: bf16[640,64], index: 1, kind: input, shape index: {}]   ;;  %s1354_s2 = inlined_call_operand.vmem [shape: f32[1,64], index: 2, kind: input, shape index: {}]   ;;  %s1355_s3 = inlined_call_operand.vmem [shape: f32[128,64], index: 3, kind: input, shape index: {}]   ;;  %s1356_s4 = inlined_call_operand.vmem [shape: f32[128,64], index: 4, kind: output, shape index: {}]  }
   0x1   :  { %s1086_s17 = smov 0   ;;  %s1088_s18 = smov 0  }
   0x2   :  { %s1090_s19 = smov 0  }
   0x3 LB: > { %s23_s20 = sadd.s32 1, %s1050_s18  ;;  %p42_p1 = scmp.ne.s32.totalorder %s1042_s16, %s1038_s15  ;;  %s1054_s19 = sphi %s1090_s19, %s14_s19   ;;  %s1050_s18 = sphi %s1088_s18, %s1360_s18   ;;  %s1046_s17 = sphi %s1086_s17, %s1359_s17   ;;  %s1042_s16 = sphi %s1084_s16, %s1358_s16   ;;  %s1038_s15 = sphi %s1082_s15, %s1357_s15  }
   0x4   : > { %p24_p0 = scmp.ge.s32.totalorder %s23_s20, 5  ;;  %p43_p2 = scmp.eq.s32.totalorder %s1054_s19, 0 }
   0x5   : > { %s35_s22 = sadd.s32 1, %s1042_s16  ;;  %p865_p5 = scmp.ge.s32.totalorder %s1054_s19, 5 }
   0x6   : > { %s1362_s20 = smov (%p24_p0, %s23_s20), 0  ;;  %p44_p3 = por %p43_p2, %p42_p1 }
   0x7   : > { %s31_s21 = ssub.s32 %s1050_s18, %s1362_s20  ;;  %179 = sbr.rel (%p865_p5) target bundleno = 28 (0x1c), region = 24 }
   0x8   : > { %p33_p4 = scmp.eq.s32.totalorder %s31_s21, 0 }
   0xa   : > { %s1117_s23 = scalar_select %p33_p4, %s1042_s16, %s35_s22  }
   0xe   : > { %182 = sbr.rel (!%p44_p3) target bundleno = 28 (0x1c), region = 28  ;;  %s184_s24 = sand.u32 (%p44_p3), 1, %s1042_s16  }
   0xf   : > { %s867_s25 = sshll.u32 (%p44_p3), %s1050_s18, 2  ;;  %s866_s26 = sshll.u32 (%p44_p3), %s184_s24, 6 }
  0x10   : > { %s1125_s29 = scalar_lea.vmem (%p44_p3), %s1352_s0, %s867_s25  ;;  %s186_s30 = scalar_lea.vmem (%p44_p3), [#allocation3], %s866_s26 }
  0x11   : > { %v207_v0 = vld [vmem:[%s1125_s29] sm:$0xf] (%p44_p3)  ;;  %v209_v1 = vld [vmem:[%s1125_s29 + $0x14] sm:$0xf] (%p44_p3)  ;;  %v211_v2 = vld [vmem:[%s1125_s29 + $0x28] sm:$0xf] (%p44_p3) }
  0x12   : > { %208 = vst [vmem:[%s186_s30] sm:$0xf] (%p44_p3), %v207_v0  ;;  %210 = vst [vmem:[%s186_s30 + $0x4] sm:$0xf] (%p44_p3), %v209_v1  ;;  %v213_v3 = vld [vmem:[%s1125_s29 + $0x3c] sm:$0xf] (%p44_p3) }
  0x13   : > { %v215_v4 = vld [vmem:[%s1125_s29 + $0x50] sm:$0xf] (%p44_p3)  ;;  %212 = vst [vmem:[%s186_s30 + $0x8] sm:$0xf] (%p44_p3), %v211_v2  ;;  %214 = vst [vmem:[%s186_s30 + $0xc] sm:$0xf] (%p44_p3), %v213_v3 }
  0x14   : > { %216 = vst [vmem:[%s186_s30 + $0x10] sm:$0xf] (%p44_p3), %v215_v4  ;;  %v217_v5 = vld [vmem:[%s1125_s29 + $0x64] sm:$0xf] (%p44_p3)  ;;  %v219_v6 = vld [vmem:[%s1125_s29 + $0x78] sm:$0xf] (%p44_p3) }
  0x15   : > { %v221_v7 = vld [vmem:[%s1125_s29 + $0x8c] sm:$0xf]  ;;  %218 = vst [vmem:[%s186_s30 + $0x14] sm:$0xf] %v217_v5  ;;  %220 = vst [vmem:[%s186_s30 + $0x18] sm:$0xf] %v219_v6 }
  0x16   : > { %222 = vst [vmem:[%s186_s30 + $0x1c] sm:$0xf] %v221_v7  ;;  %v223_v8 = vld [vmem:[%s1125_s29 + $0xa0] sm:$0xf]  ;;  %v225_v9 = vld [vmem:[%s1125_s29 + $0xb4] sm:$0xf] }
  0x17   : > { %v227_v10 = vld [vmem:[%s1125_s29 + $0xc8] sm:$0xf]  ;;  %224 = vst [vmem:[%s186_s30 + $0x20] sm:$0xf] %v223_v8  ;;  %226 = vst [vmem:[%s186_s30 + $0x24] sm:$0xf] %v225_v9 }
  0x18   : > { %228 = vst [vmem:[%s186_s30 + $0x28] sm:$0xf] %v227_v10  ;;  %v229_v11 = vld [vmem:[%s1125_s29 + $0xdc] sm:$0xf]  ;;  %v231_v12 = vld [vmem:[%s1125_s29 + $0xf0] sm:$0xf] }
  0x19   : > { %v233_v13 = vld [vmem:[%s1125_s29 + $0x104] sm:$0xf]  ;;  %230 = vst [vmem:[%s186_s30 + $0x2c] sm:$0xf] %v229_v11  ;;  %232 = vst [vmem:[%s186_s30 + $0x30] sm:$0xf] %v231_v12 }
  0x1a   : > { %234 = vst [vmem:[%s186_s30 + $0x34] sm:$0xf] %v233_v13  ;;  %v235_v14 = vld [vmem:[%s1125_s29 + $0x118] sm:$0xf]  ;;  %v237_v15 = vld [vmem:[%s1125_s29 + $0x12c] sm:$0xf] }
  0x1b   : > { %236 = vst [vmem:[%s186_s30 + $0x38] sm:$0xf] %v235_v14  ;;  %238 = vst [vmem:[%s186_s30 + $0x3c] sm:$0xf] %v237_v15 }
  0x1c PF: > { %p868_p6 = scmp.ge.s32.totalorder %s1054_s19, 1  ;;  %p301_p7 = scmp.lt.s32.totalorder %s1054_s19, 6 }
  0x1e   : > { %p302_p8 = pnand %p868_p6, %p301_p7 }
  0x1f   : > { %s308_s5 = sand.u32 (!%p302_p8), 1, %s1038_s15   ;;  %s870_s6 = sshll.u32 (!%p302_p8), %s1046_s17, 4 }
  0x20   : > { %305 = sbr.rel (%p302_p8) target bundleno = 323 (0x143), region = 73  ;;  %s869_s7 = sshll.u32 (!%p302_p8), %s308_s5, 6 }
  0x21   : > { %p345_p9 = scmp.lt.s32.totalorder (!%p302_p8), %s870_s6, 79  ;;  %s1152_s12 = scalar_lea.vmem (!%p302_p8), [#allocation3], %s869_s7 }
  0x22   : > { %p872_p10 = scmp.ne.s32.totalorder (!%p302_p8), %s1046_s17, 0 }
  0x27   : > { %s1364_s6 = smov (!%p345_p9, %s870_s6), 79  ;;  %366 = sbr.rel (%p872_p10) target bundleno = 49 (0x31), region = 81 }
  0x28   : > { %s871_s8 = sshll.u32 %s1364_s6, 2  ;;  %vm367_vm0 = vcmask (!%p872_p10), 523264   ;;  %v1056_v16 = vmov (!%p872_p10), 0.0  }
  0x29   : > { %s1150_s11 = scalar_lea.vmem %s1353_s1, %s871_s8  ;;  %368 = vst.msk [vmem:[#allocation2] sm:$0xff] (!%p872_p10), %vm367_vm0, %v1056_v16  ;;  %369 = vst.msk [vmem:[#allocation2 + $0x8] sm:$0xff] (!%p872_p10), %vm367_vm0, %v1056_v16 }
  0x2a   : > { %370 = vst.msk [vmem:[#allocation2 + $0x10] sm:$0xff] (!%p872_p10), %vm367_vm0, %v1056_v16  ;;  %371 = vst.msk [vmem:[#allocation2 + $0x18] sm:$0xff] (!%p872_p10), %vm367_vm0, %v1056_v16 }
  0x2b   : > { %372 = vst.msk [vmem:[#allocation2 + $0x20] sm:$0xff] (!%p872_p10), %vm367_vm0, %v1056_v16  ;;  %373 = vst.msk [vmem:[#allocation2 + $0x28] sm:$0xff] (!%p872_p10), %vm367_vm0, %v1056_v16 }
  0x2c   : > { %374 = vst.msk [vmem:[#allocation2 + $0x30] sm:$0xff] (!%p872_p10), %vm367_vm0, %v1056_v16  ;;  %375 = vst.msk [vmem:[#allocation2 + $0x38] sm:$0xff] (!%p872_p10), %vm367_vm0, %v1056_v16 }
  0x2d   : > { %376 = vst.msk [vmem:[#allocation2 + $0x40] sm:$0xff] (!%p872_p10), %vm367_vm0, %v1056_v16  ;;  %377 = vst.msk [vmem:[#allocation2 + $0x48] sm:$0xff] (!%p872_p10), %vm367_vm0, %v1056_v16 }
  0x2e   : > { %378 = vst.msk [vmem:[#allocation2 + $0x50] sm:$0xff] %vm367_vm0, %v1056_v16  ;;  %379 = vst.msk [vmem:[#allocation2 + $0x58] sm:$0xff] %vm367_vm0, %v1056_v16 }
  0x2f   : > { %380 = vst.msk [vmem:[#allocation2 + $0x60] sm:$0xff] %vm367_vm0, %v1056_v16  ;;  %381 = vst.msk [vmem:[#allocation2 + $0x68] sm:$0xff] %vm367_vm0, %v1056_v16 }
  0x30   : > { %382 = vst.msk [vmem:[#allocation2 + $0x70] sm:$0xff] %vm367_vm0, %v1056_v16  ;;  %383 = vst.msk [vmem:[#allocation2 + $0x78] sm:$0xff] %vm367_vm0, %v1056_v16 }
  0x31 PF: > { %v1000_v17 = vld [vmem:[%s1150_s11] sm:$0xff]   ;;  %v1001_v18 = vld [vmem:[%s1150_s11 + $0x8] sm:$0xff]   ;;  %v1002_v19 = vld [vmem:[%s1150_s11 + $0x10] sm:$0xff]   ;;  %vm641_vm1 = vcmask 523264   ;;  %p889_p11 = scmp.ne.s32.totalorder %s1046_s17, 4 }
  0x32   : > { %911 = vmatprep.subr.bf16.mxu0 %v1000_v17  ;;  %943 = vmatprep.subr.bf16.mxu1 %v1000_v17  ;;  %v1003_v20 = vld [vmem:[%s1150_s11 + $0x18] sm:$0xff]   ;;  %v1008_v21 = vld [vmem:[%s1152_s12] sm:$0xff]   ;;  %v1005_v24 = vld [vmem:[%s1150_s11 + $0x28] sm:$0xff]  }
  0x33   : > { %912 = vmatpush3.bf16.msra.mxu0 %v1000_v17  ;;  %951 = vmatpush3.bf16.msra.mxu1 %v1000_v17  ;;  %v1009_v22 = vld [vmem:[%s1152_s12 + $0x20] sm:$0xff]   ;;  %v1006_v25 = vld [vmem:[%s1150_s11 + $0x30] sm:$0xff]   ;;  %v1007_v26 = vld [vmem:[%s1150_s11 + $0x38] sm:$0xff]  }
  0x34   : > { %913 = vmatprep.subr.bf16.mxu0 %v1001_v18  ;;  %944 = vmatprep.subr.bf16.mxu1 %v1001_v18  ;;  %v1004_v23 = vld [vmem:[%s1150_s11 + $0x20] sm:$0xff]   ;;  %v1010_v27 = vld [vmem:[%s1152_s12 + $0x8] sm:$0xff]   ;;  %v1012_v29 = vld [vmem:[%s1152_s12 + $0x10] sm:$0xff]  }
  0x35   : > { %927 = vmatprep.mubr.bf16.mxu0 %v1008_v21  ;;  %935 = vmatprep.mubr.bf16.mxu1 %v1009_v22  ;;  %v1011_v28 = vld [vmem:[%s1152_s12 + $0x28] sm:$0xff]   ;;  %v1013_v30 = vld [vmem:[%s1152_s12 + $0x30] sm:$0xff]   ;;  %v1014_v31 = vld [vmem:[%s1152_s12 + $0x18] sm:$0xff]  }
  0x36   : > { %v1015_v32 = vld [vmem:[%s1152_s12 + $0x38] sm:$0xff]   ;;  %v386_v33 = vld [vmem:[#allocation2 + $0x10] sm:$0xff]  ;;  %v384_v35 = vld [vmem:[#allocation2] sm:$0xff] }
  0x37   : > { %914 = vmatpush3.bf16.msra.mxu0 %v1001_v18  ;;  %952 = vmatpush3.bf16.msra.mxu1 %v1001_v18  ;;  %v394_v34 = vld [vmem:[#allocation2 + $0x50] sm:$0xff]  ;;  %v392_v36 = vld [vmem:[#allocation2 + $0x40] sm:$0xff]  ;;  %v387_v39 = vld [vmem:[#allocation2 + $0x18] sm:$0xff] }
  0x38   : > { %915 = vmatprep.subr.bf16.mxu0 %v1002_v19  ;;  %945 = vmatprep.subr.bf16.mxu1 %v1002_v19  ;;  %v395_v40 = vld [vmem:[#allocation2 + $0x58] sm:$0xff]  ;;  %v385_v45 = vld [vmem:[#allocation2 + $0x8] sm:$0xff]  ;;  %v390_v57 = vld [vmem:[#allocation2 + $0x30] sm:$0xff] }
  0x39   : > { %v393_v46 = vld [vmem:[#allocation2 + $0x48] sm:$0xff]  ;;  %v398_v58 = vld [vmem:[#allocation2 + $0x70] sm:$0xff]  ;;  %v388_v59 = vld [vmem:[#allocation2 + $0x20] sm:$0xff] }
  0x3a   : > { %v396_v60 = vld [vmem:[#allocation2 + $0x60] sm:$0xff]  ;;  %v391_v63 = vld [vmem:[#allocation2 + $0x38] sm:$0xff]  ;;  %v389_v5 = vld [vmem:[#allocation2 + $0x28] sm:$0xff] }
  0x3b   : > { %916 = vmatpush3.bf16.msra.mxu0 %v1002_v19  ;;  %953 = vmatpush3.bf16.msra.mxu1 %v1002_v19  ;;  %v399_v0 = vld [vmem:[#allocation2 + $0x78] sm:$0xff]  ;;  %v397_v6 = vld [vmem:[#allocation2 + $0x68] sm:$0xff]  ;;  %v1207_v18 = vld [vmem:[%s1354_s2] ss:$0 sm:$0xff] (!%p889_p11) }
  0x3c   : > { %917 = vmatprep.subr.bf16.mxu0 %v1003_v20  ;;  %946 = vmatprep.subr.bf16.mxu1 %v1003_v20  ;;  %v701_v19 = vld [vmem:[%s1355_s3] sm:$0xff] (!%p889_p11)  ;;  %v702_v22 = vld [vmem:[%s1355_s3 + $0x8] sm:$0xff] (!%p889_p11) }
  0x3f   : > { %918 = vmatpush3.bf16.msra.mxu0 %v1003_v20  ;;  %954 = vmatpush3.bf16.msra.mxu1 %v1003_v20 }
  0x40   : > { %919 = vmatprep.subr.bf16.mxu0 %v1004_v23  ;;  %947 = vmatprep.subr.bf16.mxu1 %v1004_v23 }
  0x43   : > { %920 = vmatpush3.bf16.msra.mxu0 %v1004_v23  ;;  %955 = vmatpush3.bf16.msra.mxu1 %v1004_v23 }
  0x44   : > { %921 = vmatprep.subr.bf16.mxu0 %v1005_v24  ;;  %948 = vmatprep.subr.bf16.mxu1 %v1005_v24 }
  0x47   : > { %922 = vmatpush3.bf16.msra.mxu0 %v1005_v24  ;;  %956 = vmatpush3.bf16.msra.mxu1 %v1005_v24 }
  0x48   : > { %923 = vmatprep.subr.bf16.mxu0 %v1006_v25  ;;  %949 = vmatprep.subr.bf16.mxu1 %v1006_v25 }
  0x4b   : > { %924 = vmatpush3.bf16.msra.mxu0 %v1006_v25  ;;  %957 = vmatpush3.bf16.msra.mxu1 %v1006_v25 }
  0x4c   : > { %925 = vmatprep.subr.bf16.mxu0 %v1007_v26  ;;  %950 = vmatprep.subr.bf16.mxu1 %v1007_v26 }
  0x4f   : > { %926 = vmatpush3.bf16.msra.mxu0 %v1007_v26  ;;  %958 = vmatpush3.bf16.msra.mxu1 %v1007_v26  ;;  %v703_v26 = vld [vmem:[%s1355_s3 + $0x10] sm:$0xff] (!%p889_p11) }
  0x52   : > { %928 = vmatmul.mubr.bf16.vlgmr.msra.gmra.mrb[0].mxu0 %v1010_v27  ;;  %936 = vmatmul.mubr.bf16.vlgmr.msra.gmra.mrb[0].mxu1 %v1011_v28  ;;  %v704_v28 = vld [vmem:[%s1355_s3 + $0x18] sm:$0xff] (!%p889_p11) }
  0x53   : > { %931 = vmatprep.mubr.bf16.mxu0 %v1012_v29  ;;  %939 = vmatprep.mubr.bf16.mxu1 %v1013_v30 }
  0x5a   : > { %932 = vmatmul.mubr.bf16.gmra.mrb[4].mxu0 %v1014_v31  ;;  %940 = vmatmul.mubr.bf16.gmra.mrb[4].mxu1 %v1015_v32  ;;  %v705_v32 = vld [vmem:[%s1355_s3 + $0x20] sm:$0xff] (!%p889_p11) }
 0x125   : > { %v929_v37 = vpop.f32.mrb[0].mxu0  ;;  %v937_v38 = vpop.f32.mrb[0].mxu1 }
 0x126   : > { %v627_v41 = vadd.f32 %v929_v37, %v386_v33  ;;  %v635_v42 = vadd.f32 %v937_v38, %v394_v34  ;;  %v562_v43 = vpop.f32.mrb[1].mxu0  ;;  %v594_v44 = vpop.f32.mrb[1].mxu1  ;;  %v706_v38 = vld [vmem:[%s1355_s3 + $0x28] sm:$0xff] (!%p889_p11) }
 0x127   : > { %v625_v47 = vadd.f32 %v562_v43, %v384_v35  ;;  %v633_v48 = vadd.f32 %v594_v44, %v392_v36  ;;  %v930_v49 = vpop.f32.mrb[2].mxu0  ;;  %v938_v50 = vpop.f32.mrb[2].mxu1 }
 0x128   : > { %644 = vst.msk [vmem:[#allocation2 + $0x10] sm:$0xff] %vm641_vm1, %v627_v41  ;;  %652 = vst.msk [vmem:[#allocation2 + $0x50] sm:$0xff] %vm641_vm1, %v635_v42  ;;  %v628_v51 = vadd.f32 %v930_v49, %v387_v39  ;;  %v636_v52 = vadd.f32 %v938_v50, %v395_v40  ;;  %v565_v53 = vpop.f32.mrb[3].mxu0  ;;  %v597_v54 = vpop.f32.mrb[3].mxu1  ;;  %v707_v40 = vld [vmem:[%s1355_s3 + $0x30] sm:$0xff] (!%p889_p11) }
 0x129   : > { %642 = vst.msk [vmem:[#allocation2] sm:$0xff] %vm641_vm1, %v625_v47  ;;  %650 = vst.msk [vmem:[#allocation2 + $0x40] sm:$0xff] %vm641_vm1, %v633_v48  ;;  %v626_v55 = vadd.f32 %v565_v53, %v385_v45  ;;  %v634_v56 = vadd.f32 %v597_v54, %v393_v46  ;;  %v708_v45 = vld [vmem:[%s1355_s3 + $0x38] sm:$0xff] (!%p889_p11)  ;;  %v710_v53 = vld [vmem:[%s1355_s3 + $0x48] sm:$0xff] (!%p889_p11) }
 0x12a   : > { %645 = vst.msk [vmem:[#allocation2 + $0x18] sm:$0xff] %vm641_vm1, %v628_v51  ;;  %653 = vst.msk [vmem:[#allocation2 + $0x58] sm:$0xff] %vm641_vm1, %v636_v52  ;;  %v709_v51 = vld [vmem:[%s1355_s3 + $0x40] sm:$0xff] (!%p889_p11) }
 0x12b   : > { %643 = vst.msk [vmem:[#allocation2 + $0x8] sm:$0xff] %vm641_vm1, %v626_v55  ;;  %651 = vst.msk [vmem:[#allocation2 + $0x48] sm:$0xff] %vm641_vm1, %v634_v56 }
 0x12d   : > { %v933_v61 = vpop.f32.mrb[4].mxu0  ;;  %v941_v62 = vpop.f32.mrb[4].mxu1  ;;  %661 = sbr.rel (%p889_p11) target bundleno = 323 (0x143), region = 85 }
 0x12e   : > { %v631_v1 = vadd.f32 %v933_v61, %v390_v57  ;;  %v639_v2 = vadd.f32 %v941_v62, %v398_v58  ;;  %v578_v3 = vpop.f32.mrb[5].mxu0  ;;  %v610_v4 = vpop.f32.mrb[5].mxu1 }
 0x12f   : > { %v629_v7 = vadd.f32 %v578_v3, %v388_v59  ;;  %v637_v8 = vadd.f32 %v610_v4, %v396_v60  ;;  %v934_v9 = vpop.f32.mrb[6].mxu0  ;;  %v942_v10 = vpop.f32.mrb[6].mxu1  ;;  %v664_v23 = vld [vmem:[#allocation2 + $0x10] sm:$0xff] (!%p889_p11)  ;;  %v713_v3 = vld [vmem:[%s1355_s3 + $0x60] sm:$0xff] (!%p889_p11) }
 0x130   : > { %648 = vst.msk [vmem:[#allocation2 + $0x30] sm:$0xff] %vm641_vm1, %v631_v1  ;;  %656 = vst.msk [vmem:[#allocation2 + $0x70] sm:$0xff] %vm641_vm1, %v639_v2  ;;  %v632_v11 = vadd.f32 %v934_v9, %v391_v63  ;;  %v640_v12 = vadd.f32 %v942_v10, %v399_v0  ;;  %v581_v13 = vpop.f32.mrb[7].mxu0  ;;  %v613_v14 = vpop.f32.mrb[7].mxu1  ;;  %v662_v17 = vld [vmem:[#allocation2] sm:$0xff] (!%p889_p11)  ;;  %v687_v25 = vadd.f32 (!%p889_p11), %v1207_v18, %v664_v23  ;;  %v672_v58 = vld [vmem:[#allocation2 + $0x50] sm:$0xff] (!%p889_p11) }
 0x131   : > { %646 = vst.msk [vmem:[#allocation2 + $0x20] sm:$0xff] %vm641_vm1, %v629_v7  ;;  %654 = vst.msk [vmem:[#allocation2 + $0x60] sm:$0xff] %vm641_vm1, %v637_v8  ;;  %v630_v15 = vadd.f32 %v581_v13, %v389_v5  ;;  %v638_v16 = vadd.f32 %v613_v14, %v397_v6  ;;  %v685_v20 = vadd.f32 (!%p889_p11), %v1207_v18, %v662_v17  ;;  %v665_v27 = vld [vmem:[#allocation2 + $0x18] sm:$0xff] (!%p889_p11)  ;;  %v670_v46 = vld [vmem:[#allocation2 + $0x40] sm:$0xff] (!%p889_p11) }
 0x132   : > { %649 = vst.msk [vmem:[#allocation2 + $0x38] sm:$0xff] %vm641_vm1, %v632_v11  ;;  %657 = vst.msk [vmem:[#allocation2 + $0x78] sm:$0xff] %vm641_vm1, %v640_v12  ;;  %v663_v21 = vld [vmem:[#allocation2 + $0x8] sm:$0xff] (!%p889_p11)  ;;  %v688_v30 = vadd.f32 (!%p889_p11), %v1207_v18, %v665_v27  ;;  %v719_v35 = vadd.f32 (!%p889_p11), %v703_v26, %v687_v25  ;;  %v693_v57 = vadd.f32 (!%p889_p11), %v1207_v18, %v670_v46  ;;  %v711_v59 = vld [vmem:[%s1355_s3 + $0x50] sm:$0xff] (!%p889_p11) }
 0x133   : > { %647 = vst.msk [vmem:[#allocation2 + $0x28] sm:$0xff] %vm641_vm1, %v630_v15  ;;  %655 = vst.msk [vmem:[#allocation2 + $0x68] sm:$0xff] %vm641_vm1, %v638_v16  ;;  %v686_v24 = vadd.f32 (!%p889_p11), %v1207_v18, %v663_v21  ;;  %v717_v29 = vadd.f32 (!%p889_p11), %v701_v19, %v685_v20  ;;  %v671_v52 = vld [vmem:[#allocation2 + $0x48] sm:$0xff] (!%p889_p11)  ;;  %v673_v60 = vld [vmem:[#allocation2 + $0x58] sm:$0xff] (!%p889_p11)  ;;  %v695_v0 = vadd.f32 (!%p889_p11), %v1207_v18, %v672_v58 }
 0x134   : > { %v720_v42 = vadd.f32 %v704_v28, %v688_v30  ;;  %v735_v48 = vmax.f32 %v719_v35, 0.0  ;;  %v694_v63 = vadd.f32 %v1207_v18, %v671_v52  ;;  %v712_v1 = vld [vmem:[%s1355_s3 + $0x58] sm:$0xff]  ;;  %v725_v6 = vadd.f32 %v709_v51, %v693_v57  ;;  %v714_v9 = vld [vmem:[%s1355_s3 + $0x68] sm:$0xff]  ;;  %v715_v15 = vld [vmem:[%s1355_s3 + $0x70] sm:$0xff] }
 0x135   : > { %v718_v34 = vadd.f32 %v702_v22, %v686_v24  ;;  %v733_v41 = vmax.f32 %v717_v29, 0.0  ;;  %v696_v7 = vadd.f32 %v1207_v18, %v673_v60  ;;  %v727_v12 = vadd.f32 %v711_v59, %v695_v0  ;;  %v716_v26 = vld [vmem:[%s1355_s3 + $0x78] sm:$0xff] }
 0x136   : > { %v736_v54 = vmax.f32 %v720_v42, 0.0  ;;  %751 = vst.msk [vmem:[%s1356_s4 + $0x10] sm:$0xff] %vm641_vm1, %v735_v48  ;;  %v726_v11 = vadd.f32 %v710_v53, %v694_v63  ;;  %v741_v19 = vmax.f32 %v725_v6, 0.0 }
 0x137   : > { %v668_v39 = vld [vmem:[#allocation2 + $0x30] sm:$0xff]  ;;  %v734_v47 = vmax.f32 %v718_v34, 0.0  ;;  %749 = vst.msk [vmem:[%s1356_s4] sm:$0xff] %vm641_vm1, %v733_v41  ;;  %v728_v20 = vadd.f32 %v712_v1, %v696_v7  ;;  %v743_v23 = vmax.f32 %v727_v12, 0.0 }
 0x138   : > { %v666_v31 = vld [vmem:[#allocation2 + $0x20] sm:$0xff]  ;;  %v691_v43 = vadd.f32 %v1207_v18, %v668_v39  ;;  %752 = vst.msk [vmem:[%s1356_s4 + $0x18] sm:$0xff] %vm641_vm1, %v736_v54  ;;  %v676_v10 = vld [vmem:[#allocation2 + $0x70] sm:$0xff]  ;;  %v742_v22 = vmax.f32 %v726_v11, 0.0  ;;  %757 = vst.msk [vmem:[%s1356_s4 + $0x40] sm:$0xff] %vm641_vm1, %v741_v19 }
 0x139   : > { %v689_v36 = vadd.f32 %v1207_v18, %v666_v31  ;;  %v669_v44 = vld [vmem:[#allocation2 + $0x38] sm:$0xff]  ;;  %750 = vst.msk [vmem:[%s1356_s4 + $0x8] sm:$0xff] %vm641_vm1, %v734_v47  ;;  %v674_v2 = vld [vmem:[#allocation2 + $0x60] sm:$0xff]  ;;  %v699_v21 = vadd.f32 %v1207_v18, %v676_v10  ;;  %v744_v27 = vmax.f32 %v728_v20, 0.0  ;;  %759 = vst.msk [vmem:[%s1356_s4 + $0x50] sm:$0xff] %vm641_vm1, %v743_v23 }
 0x13a   : > { %v667_v33 = vld [vmem:[#allocation2 + $0x28] sm:$0xff]  ;;  %v723_v55 = vadd.f32 %v707_v40, %v691_v43  ;;  %v692_v56 = vadd.f32 %v1207_v18, %v669_v44  ;;  %v697_v13 = vadd.f32 %v1207_v18, %v674_v2  ;;  %v677_v16 = vld [vmem:[#allocation2 + $0x78] sm:$0xff]  ;;  %758 = vst.msk [vmem:[%s1356_s4 + $0x48] sm:$0xff] %vm641_vm1, %v742_v22 }
 0x13b   : > { %v690_v37 = vadd.f32 %v1207_v18, %v667_v33  ;;  %v721_v49 = vadd.f32 %v705_v32, %v689_v36  ;;  %v675_v8 = vld [vmem:[#allocation2 + $0x68] sm:$0xff]  ;;  %v731_v28 = vadd.f32 %v715_v15, %v699_v21  ;;  %v700_v29 = vadd.f32 %v1207_v18, %v677_v16  ;;  %760 = vst.msk [vmem:[%s1356_s4 + $0x58] sm:$0xff] %vm641_vm1, %v744_v27 }
 0x13c   : > { %v739_v4 = vmax.f32 %v723_v55, 0.0  ;;  %v724_v5 = vadd.f32 %v708_v45, %v692_v56  ;;  %v698_v14 = vadd.f32 %v1207_v18, %v675_v8  ;;  %v729_v24 = vadd.f32 %v713_v3, %v697_v13 }
 0x13d   : > { %v722_v50 = vadd.f32 %v706_v38, %v690_v37  ;;  %v737_v61 = vmax.f32 %v721_v49, 0.0  ;;  %v747_v32 = vmax.f32 %v731_v28, 0.0  ;;  %v732_v33 = vadd.f32 %v716_v26, %v700_v29 }
 0x13e   : > { %755 = vst.msk [vmem:[%s1356_s4 + $0x30] sm:$0xff] %vm641_vm1, %v739_v4  ;;  %v740_v17 = vmax.f32 %v724_v5, 0.0  ;;  %v730_v25 = vadd.f32 %v714_v9, %v698_v14  ;;  %v745_v30 = vmax.f32 %v729_v24, 0.0 }
 0x13f   : > { %v738_v62 = vmax.f32 %v722_v50, 0.0  ;;  %753 = vst.msk [vmem:[%s1356_s4 + $0x20] sm:$0xff] %vm641_vm1, %v737_v61  ;;  %763 = vst.msk [vmem:[%s1356_s4 + $0x70] sm:$0xff] %vm641_vm1, %v747_v32  ;;  %v748_v18 = vmax.f32 %v732_v33, 0.0 }
 0x140   : > { %756 = vst.msk [vmem:[%s1356_s4 + $0x38] sm:$0xff] %vm641_vm1, %v740_v17  ;;  %v746_v31 = vmax.f32 %v730_v25, 0.0  ;;  %761 = vst.msk [vmem:[%s1356_s4 + $0x60] sm:$0xff] %vm641_vm1, %v745_v30 }
 0x141   : > { %754 = vst.msk [vmem:[%s1356_s4 + $0x28] sm:$0xff] %vm641_vm1, %v738_v62  ;;  %764 = vst.msk [vmem:[%s1356_s4 + $0x78] sm:$0xff] %vm641_vm1, %v748_v18 }
 0x142   : > { %762 = vst.msk [vmem:[%s1356_s4 + $0x68] sm:$0xff] %vm641_vm1, %v746_v31 }
 0x143 PF: > { %s14_s19 = sadd.s32 1, %s1054_s19   ;;  %s1357_s15 = smov %s1042_s16 }
 0x144   : > { %p11_p12 = scmp.ge.s32.totalorder %s14_s19, 7   ;;  %s1358_s16 = smov %s1117_s23 }
 0x145   : > { %s1359_s17 = smov %s1050_s18  ;;  %s1360_s18 = smov %s1362_s20 }
 0x146   :  { %13 = sbr.rel (!%p11_p12) target bundleno = 3 (0x3), region = 126 }

// kernel: _lambda_.19
= control target key start
LH: loop header
LB: loop body
LE: loop exit
PB: predicated region body
PF: predicated region fallthrough
CT: control target
= control target key end

     0   :  { %s692_s12 = smov 0   ;;  %s694_s13 = smov 0   ;;  %s791_s0 = inlined_call_operand.vmem [shape: bf16[32,640], index: 0, kind: input, shape index: {}]   ;;  %s792_s1 = inlined_call_operand.vmem [shape: bf16[640,128], index: 1, kind: input, shape index: {}]   ;;  %s793_s2 = inlined_call_operand.vmem [shape: f32[1,128], index: 2, kind: input, shape index: {}]   ;;  %s794_s3 = inlined_call_operand.vmem [shape: f32[32,128], index: 3, kind: output, shape index: {}]  }
   0x1   :  { %s696_s14 = smov 0   ;;  %s698_s15 = smov 0  }
   0x2   :  { %s700_s16 = smov 0  }
   0x3 LB: > { %s22_s17 = sadd.s32 1, %s665_s15  ;;  %p41_p1 = scmp.ne.s32.totalorder %s657_s13, %s653_s12  ;;  %s669_s16 = sphi %s700_s16, %s13_s16   ;;  %s665_s15 = sphi %s698_s15, %s798_s15   ;;  %s661_s14 = sphi %s696_s14, %s797_s14   ;;  %s657_s13 = sphi %s694_s13, %s796_s13   ;;  %s653_s12 = sphi %s692_s12, %s795_s12  }
   0x4   : > { %p23_p0 = scmp.ge.s32.totalorder %s22_s17, 5  ;;  %p42_p2 = scmp.eq.s32.totalorder %s669_s16, 0 }
   0x5   : > { %s34_s19 = sadd.s32 1, %s657_s13  ;;  %p526_p5 = scmp.ge.s32.totalorder %s669_s16, 5 }
   0x6   : > { %s800_s17 = smov (%p23_p0, %s22_s17), 0  ;;  %p43_p3 = por %p42_p2, %p41_p1 }
   0x7   : > { %s30_s18 = ssub.s32 %s665_s15, %s800_s17  ;;  %143 = sbr.rel (%p526_p5) target bundleno = 21 (0x15), region = 20 }
   0x8   : > { %p32_p4 = scmp.eq.s32.totalorder %s30_s18, 0 }
   0xa   : > { %s727_s20 = scalar_select %p32_p4, %s657_s13, %s34_s19  }
   0xe   : > { %146 = sbr.rel (!%p43_p3) target bundleno = 21 (0x15), region = 24  ;;  %s148_s21 = sand.u32 (%p43_p3), 1, %s657_s13  }
   0xf   : > { %s528_s22 = sshll.u32 (%p43_p3), %s665_s15, 2  ;;  %s527_s23 = sshll.u32 (%p43_p3), %s148_s21, 4 }
  0x10   : > { %s155_s26 = scalar_lea.vmem (%p43_p3), %s791_s0, %s528_s22  ;;  %s150_s27 = scalar_lea.vmem (%p43_p3), [#allocation3], %s527_s23 }
  0x11   : > { %v171_v0 = vld [vmem:[%s155_s26] sm:$0xf] (%p43_p3)  ;;  %v173_v1 = vld [vmem:[%s155_s26 + $0x14] sm:$0xf] (%p43_p3)  ;;  %v175_v2 = vld [vmem:[%s155_s26 + $0x28] sm:$0xf] (%p43_p3) }
  0x12   : > { %172 = vst [vmem:[%s150_s27] sm:$0xf] (%p43_p3), %v171_v0  ;;  %174 = vst [vmem:[%s150_s27 + $0x4] sm:$0xf] (%p43_p3), %v173_v1  ;;  %v177_v3 = vld [vmem:[%s155_s26 + $0x3c] sm:$0xf] (%p43_p3) }
  0x13   : > { %176 = vst [vmem:[%s150_s27 + $0x8] sm:$0xf] (%p43_p3), %v175_v2  ;;  %178 = vst [vmem:[%s150_s27 + $0xc] sm:$0xf] (%p43_p3), %v177_v3 }
  0x15 PF: > { %p529_p6 = scmp.ge.s32.totalorder %s669_s16, 1  ;;  %p217_p7 = scmp.lt.s32.totalorder %s669_s16, 6 }
  0x17   : > { %p218_p8 = pnand %p529_p6, %p217_p7 }
  0x18   : > { %s224_s28 = sand.u32 (!%p218_p8), 1, %s653_s12   ;;  %s531_s29 = sshll.u32 (!%p218_p8), %s661_s14, 4 }
  0x19   : > { %221 = sbr.rel (%p218_p8) target bundleno = 302 (0x12e), region = 69  ;;  %s739_s30 = sshll.u32 (!%p218_p8), %s224_s28, 4 }
  0x1a   : > { %p254_p9 = scmp.lt.s32.totalorder (!%p218_p8), %s531_s29, 79  ;;  %s226_s8 = scalar_lea.vmem (!%p218_p8), [#allocation3], %s739_s30 }
  0x1b   : > { %p533_p10 = scmp.ne.s32.totalorder (!%p218_p8), %s661_s14, 0 }
  0x20   : > { %s802_s29 = smov (!%p254_p9, %s531_s29), 79  ;;  %269 = sbr.rel (%p533_p10) target bundleno = 39 (0x27), region = 77 }
  0x21   : > { %s532_s4 = sshll.u32 %s802_s29, 2  ;;  %v671_v4 = vmov (!%p533_p10), 0.0  }
  0x22   : > { %s744_s7 = scalar_lea.vmem %s792_s1, %s532_s4  ;;  %270 = vst [vmem:[#allocation2] sm:$0xff] (!%p533_p10), %v671_v4  ;;  %271 = vst [vmem:[#allocation2 + $0x8] sm:$0xff] (!%p533_p10), %v671_v4 }
  0x23   : > { %272 = vst [vmem:[#allocation2 + $0x10] sm:$0xff] (!%p533_p10), %v671_v4  ;;  %273 = vst [vmem:[#allocation2 + $0x18] sm:$0xff] (!%p533_p10), %v671_v4 }
  0x27 PF: > { %v621_v5 = vld [vmem:[%s744_s7] sm:$0xff]   ;;  %v622_v6 = vld [vmem:[%s744_s7 + $0x8] sm:$0xff]   ;;  %v623_v7 = vld [vmem:[%s744_s7 + $0x10] sm:$0xff]   ;;  %p544_p11 = scmp.ne.s32.totalorder %s661_s14, 4 }
  0x28   : > { %560 = vmatprep.subr.bf16.mxu0 %v621_v5  ;;  %v624_v8 = vld [vmem:[%s744_s7 + $0x18] sm:$0xff]   ;;  %v629_v9 = vld [vmem:[%s226_s8] sm:$0xff]   ;;  %v626_v11 = vld [vmem:[%s744_s7 + $0x28] sm:$0xff]  }
  0x29   : > { %561 = vmatpush3.bf16.msra.mxu0 %v621_v5  ;;  %576 = vmatprep.mubr.bf16.mxu0 %v629_v9  ;;  %v625_v10 = vld [vmem:[%s744_s7 + $0x20] sm:$0xff]   ;;  %v627_v12 = vld [vmem:[%s744_s7 + $0x30] sm:$0xff]   ;;  %v628_v13 = vld [vmem:[%s744_s7 + $0x38] sm:$0xff]  }
  0x2a   : > { %562 = vmatprep.subr.bf16.mxu0 %v622_v6  ;;  %v630_v14 = vld [vmem:[%s226_s8 + $0x8] sm:$0xff]   ;;  %v276_v15 = vld [vmem:[#allocation2 + $0x10] sm:$0xff]  ;;  %v274_v16 = vld [vmem:[#allocation2] sm:$0xff] }
  0x2b   : > { %v277_v18 = vld [vmem:[#allocation2 + $0x18] sm:$0xff]  ;;  %v275_v21 = vld [vmem:[#allocation2 + $0x8] sm:$0xff]  ;;  %v545_v28 = vld [vmem:[%s793_s2] ss:$0 sm:$0xff] (!%p544_p11) }
  0x2d   : > { %563 = vmatpush3.bf16.msra.mxu0 %v622_v6 }
  0x2e   : > { %564 = vmatprep.subr.bf16.mxu0 %v623_v7 }
  0x31   : > { %565 = vmatpush3.bf16.msra.mxu0 %v623_v7 }
  0x32   : > { %566 = vmatprep.subr.bf16.mxu0 %v624_v8 }
  0x35   : > { %567 = vmatpush3.bf16.msra.mxu0 %v624_v8 }
  0x36   : > { %568 = vmatprep.subr.bf16.mxu0 %v625_v10 }
  0x39   : > { %569 = vmatpush3.bf16.msra.mxu0 %v625_v10 }
  0x3a   : > { %570 = vmatprep.subr.bf16.mxu0 %v626_v11 }
  0x3d   : > { %571 = vmatpush3.bf16.msra.mxu0 %v626_v11 }
  0x3e   : > { %572 = vmatprep.subr.bf16.mxu0 %v627_v12 }
  0x41   : > { %573 = vmatpush3.bf16.msra.mxu0 %v627_v12 }
  0x42   : > { %574 = vmatprep.subr.bf16.mxu0 %v628_v13 }
  0x45   : > { %575 = vmatpush3.bf16.msra.mxu0 %v628_v13 }
  0x48   : > { %577 = vmatmul.mubr.bf16.vlgmr.msra.gmra.mrb[0].mxu0 %v630_v14 }
 0x11b   : > { %v578_v17 = vpop.f32.mrb[0].mxu0  ;;  %418 = sbr.rel (%p544_p11) target bundleno = 302 (0x12e), region = 81 }
 0x11c   : > { %v409_v19 = vadd.f32 %v578_v17, %v276_v15  ;;  %v392_v20 = vpop.f32.mrb[1].mxu0 }
 0x11d   : > { %v407_v22 = vadd.f32 %v392_v20, %v274_v16  ;;  %v579_v23 = vpop.f32.mrb[2].mxu0 }
 0x11e   : > { %413 = vst [vmem:[#allocation2 + $0x10] sm:$0xff] %v409_v19  ;;  %v410_v24 = vadd.f32 %v579_v23, %v277_v18  ;;  %v395_v25 = vpop.f32.mrb[3].mxu0 }
 0x11f   : > { %411 = vst [vmem:[#allocation2] sm:$0xff] %v407_v22  ;;  %v408_v26 = vadd.f32 %v395_v25, %v275_v21 }
 0x120   : > { %414 = vst [vmem:[#allocation2 + $0x18] sm:$0xff] %v410_v24 }
 0x121   : > { %412 = vst [vmem:[#allocation2 + $0x8] sm:$0xff] %v408_v26 }
 0x125   : > { %v421_v32 = vld [vmem:[#allocation2 + $0x10] sm:$0xff] }
 0x126   : > { %v419_v27 = vld [vmem:[#allocation2] sm:$0xff]  ;;  %v432_v34 = vadd.f32 %v545_v28, %v421_v32 }
 0x127   : > { %v430_v30 = vadd.f32 %v545_v28, %v419_v27  ;;  %v422_v33 = vld [vmem:[#allocation2 + $0x18] sm:$0xff] }
 0x128   : > { %v420_v29 = vld [vmem:[#allocation2 + $0x8] sm:$0xff]  ;;  %v433_v35 = vadd.f32 %v545_v28, %v422_v33  ;;  %v436_v38 = vmax.f32 %v432_v34, 0.0 }
 0x129   : > { %v431_v31 = vadd.f32 %v545_v28, %v420_v29  ;;  %v434_v36 = vmax.f32 %v430_v30, 0.0 }
 0x12a   : > { %v437_v39 = vmax.f32 %v433_v35, 0.0  ;;  %440 = vst [vmem:[%s794_s3 + $0x10] sm:$0xff] %v436_v38 }
 0x12b   : > { %v435_v37 = vmax.f32 %v431_v31, 0.0  ;;  %438 = vst [vmem:[%s794_s3] sm:$0xff] %v434_v36 }
 0x12c   : > { %441 = vst [vmem:[%s794_s3 + $0x18] sm:$0xff] %v437_v39 }
 0x12d   : > { %439 = vst [vmem:[%s794_s3 + $0x8] sm:$0xff] %v435_v37 }
 0x12e PF: > { %s13_s16 = sadd.s32 1, %s669_s16   ;;  %s795_s12 = smov %s657_s13 }
 0x12f   : > { %p10_p12 = scmp.ge.s32.totalorder %s13_s16, 7   ;;  %s796_s13 = smov %s727_s20 }
 0x130   : > { %s797_s14 = smov %s665_s15  ;;  %s798_s15 = smov %s800_s17 }
 0x131   :  { %12 = sbr.rel (!%p10_p12) target bundleno = 3 (0x3), region = 119 }

// kernel: _lambda_.20
= control target key start
LH: loop header
LB: loop body
LE: loop exit
PB: predicated region body
PF: predicated region fallthrough
CT: control target
= control target key end

     0   :  { %s770_s15 = smov 0   ;;  %s772_s16 = smov 0   ;;  %s881_s0 = inlined_call_operand.vmem [shape: bf16[32,1152], index: 0, kind: input, shape index: {}]   ;;  %s882_s1 = inlined_call_operand.vmem [shape: bf16[1152,128], index: 1, kind: input, shape index: {}]   ;;  %s883_s2 = inlined_call_operand.vmem [shape: f32[1,128], index: 2, kind: input, shape index: {}]   ;;  %s884_s3 = inlined_call_operand.vmem [shape: f32[32,128], index: 3, kind: input, shape index: {}]   ;;  %s885_s4 = inlined_call_operand.vmem [shape: f32[32,128], index: 4, kind: output, shape index: {}]  }
   0x1   :  { %s774_s17 = smov 0   ;;  %s776_s18 = smov 0  }
   0x2   :  { %s778_s19 = smov 0  }
   0x3 LB: > { %s23_s20 = sadd.s32 1, %s738_s18  ;;  %p42_p1 = scmp.ne.s32.totalorder %s730_s16, %s726_s15  ;;  %s742_s19 = sphi %s778_s19, %s14_s19   ;;  %s738_s18 = sphi %s776_s18, %s889_s18   ;;  %s734_s17 = sphi %s774_s17, %s888_s17   ;;  %s730_s16 = sphi %s772_s16, %s887_s16   ;;  %s726_s15 = sphi %s770_s15, %s886_s15  }
   0x4   : > { %p24_p0 = scmp.ge.s32.totalorder %s23_s20, 9  ;;  %p43_p2 = scmp.eq.s32.totalorder %s742_s19, 0 }
   0x5   : > { %s35_s22 = sadd.s32 1, %s730_s16  ;;  %p599_p5 = scmp.ge.s32.totalorder %s742_s19, 9 }
   0x6   : > { %s891_s20 = smov (%p24_p0, %s23_s20), 0  ;;  %p44_p3 = por %p43_p2, %p42_p1 }
   0x7   : > { %s31_s21 = ssub.s32 %s738_s18, %s891_s20  ;;  %179 = sbr.rel (%p599_p5) target bundleno = 21 (0x15), region = 24 }
   0x8   : > { %p33_p4 = scmp.eq.s32.totalorder %s31_s21, 0 }
   0xa   : > { %s805_s23 = scalar_select %p33_p4, %s730_s16, %s35_s22  }
   0xe   : > { %182 = sbr.rel (!%p44_p3) target bundleno = 21 (0x15), region = 28  ;;  %s184_s24 = sand.u32 (%p44_p3), 1, %s730_s16  }
   0xf   : > { %s601_s25 = sshll.u32 (%p44_p3), %s738_s18, 2  ;;  %s600_s26 = sshll.u32 (%p44_p3), %s184_s24, 4 }
  0x10   : > { %s191_s29 = scalar_lea.vmem (%p44_p3), %s881_s0, %s601_s25  ;;  %s186_s30 = scalar_lea.vmem (%p44_p3), [#allocation3], %s600_s26 }
  0x11   : > { %v207_v0 = vld [vmem:[%s191_s29] sm:$0xf] (%p44_p3)  ;;  %v209_v1 = vld [vmem:[%s191_s29 + $0x24] sm:$0xf] (%p44_p3)  ;;  %v211_v2 = vld [vmem:[%s191_s29 + $0x48] sm:$0xf] (%p44_p3) }
  0x12   : > { %208 = vst [vmem:[%s186_s30] sm:$0xf] (%p44_p3), %v207_v0  ;;  %210 = vst [vmem:[%s186_s30 + $0x4] sm:$0xf] (%p44_p3), %v209_v1  ;;  %v213_v3 = vld [vmem:[%s191_s29 + $0x6c] sm:$0xf] (%p44_p3) }
  0x13   : > { %212 = vst [vmem:[%s186_s30 + $0x8] sm:$0xf] (%p44_p3), %v211_v2  ;;  %214 = vst [vmem:[%s186_s30 + $0xc] sm:$0xf] (%p44_p3), %v213_v3 }
  0x15 PF: > { %p602_p6 = scmp.ge.s32.totalorder %s742_s19, 1  ;;  %p253_p7 = scmp.lt.s32.totalorder %s742_s19, 10 }
  0x17   : > { %p254_p8 = pnand %p602_p6, %p253_p7 }
  0x18   : > { %s260_s5 = sand.u32 (!%p254_p8), 1, %s726_s15   ;;  %s604_s6 = sshll.u32 (!%p254_p8), %s734_s17, 4 }
  0x19   : > { %257 = sbr.rel (%p254_p8) target bundleno = 304 (0x130), region = 73  ;;  %s817_s7 = sshll.u32 (!%p254_p8), %s260_s5, 4 }
  0x1a   : > { %p297_p9 = scmp.lt.s32.totalorder (!%p254_p8), %s604_s6, 143  ;;  %s262_s12 = scalar_lea.vmem (!%p254_p8), [#allocation3], %s817_s7 }
  0x1b   : > { %p606_p10 = scmp.ne.s32.totalorder (!%p254_p8), %s734_s17, 0 }
  0x20   : > { %s893_s6 = smov (!%p297_p9, %s604_s6), 143  ;;  %318 = sbr.rel (%p606_p10) target bundleno = 39 (0x27), region = 81 }
  0x21   : > { %s605_s8 = sshll.u32 %s893_s6, 2  ;;  %v744_v4 = vmov (!%p606_p10), 0.0  }
  0x22   : > { %s822_s11 = scalar_lea.vmem %s882_s1, %s605_s8  ;;  %319 = vst [vmem:[#allocation2] sm:$0xff] (!%p606_p10), %v744_v4  ;;  %320 = vst [vmem:[#allocation2 + $0x8] sm:$0xff] (!%p606_p10), %v744_v4 }
  0x23   : > { %321 = vst [vmem:[#allocation2 + $0x10] sm:$0xff] (!%p606_p10), %v744_v4  ;;  %322 = vst [vmem:[#allocation2 + $0x18] sm:$0xff] (!%p606_p10), %v744_v4 }
  0x27 PF: > { %v694_v5 = vld [vmem:[%s822_s11] sm:$0xff]   ;;  %v695_v6 = vld [vmem:[%s822_s11 + $0x8] sm:$0xff]   ;;  %v696_v7 = vld [vmem:[%s822_s11 + $0x10] sm:$0xff]   ;;  %p617_p11 = scmp.ne.s32.totalorder %s734_s17, 8 }
  0x28   : > { %633 = vmatprep.subr.bf16.mxu0 %v694_v5  ;;  %v697_v8 = vld [vmem:[%s822_s11 + $0x18] sm:$0xff]   ;;  %v702_v9 = vld [vmem:[%s262_s12] sm:$0xff]   ;;  %v699_v11 = vld [vmem:[%s822_s11 + $0x28] sm:$0xff]  }
  0x29   : > { %634 = vmatpush3.bf16.msra.mxu0 %v694_v5  ;;  %649 = vmatprep.mubr.bf16.mxu0 %v702_v9  ;;  %v698_v10 = vld [vmem:[%s822_s11 + $0x20] sm:$0xff]   ;;  %v700_v12 = vld [vmem:[%s822_s11 + $0x30] sm:$0xff]   ;;  %v701_v13 = vld [vmem:[%s822_s11 + $0x38] sm:$0xff]  }
  0x2a   : > { %635 = vmatprep.subr.bf16.mxu0 %v695_v6  ;;  %v703_v14 = vld [vmem:[%s262_s12 + $0x8] sm:$0xff]   ;;  %v325_v15 = vld [vmem:[#allocation2 + $0x10] sm:$0xff]  ;;  %v323_v16 = vld [vmem:[#allocation2] sm:$0xff] }
  0x2b   : > { %v326_v18 = vld [vmem:[#allocation2 + $0x18] sm:$0xff]  ;;  %v324_v21 = vld [vmem:[#allocation2 + $0x8] sm:$0xff]  ;;  %v618_v28 = vld [vmem:[%s883_s2] ss:$0 sm:$0xff] (!%p617_p11) }
  0x2c   : > { %v483_v29 = vld [vmem:[%s884_s3] sm:$0xff] (!%p617_p11)  ;;  %v484_v32 = vld [vmem:[%s884_s3 + $0x8] sm:$0xff] (!%p617_p11)  ;;  %v485_v36 = vld [vmem:[%s884_s3 + $0x10] sm:$0xff] (!%p617_p11) }
  0x2d   : > { %636 = vmatpush3.bf16.msra.mxu0 %v695_v6  ;;  %v486_v38 = vld [vmem:[%s884_s3 + $0x18] sm:$0xff] (!%p617_p11) }
  0x2e   : > { %637 = vmatprep.subr.bf16.mxu0 %v696_v7 }
  0x31   : > { %638 = vmatpush3.bf16.msra.mxu0 %v696_v7 }
  0x32   : > { %639 = vmatprep.subr.bf16.mxu0 %v697_v8 }
  0x35   : > { %640 = vmatpush3.bf16.msra.mxu0 %v697_v8 }
  0x36   : > { %641 = vmatprep.subr.bf16.mxu0 %v698_v10 }
  0x39   : > { %642 = vmatpush3.bf16.msra.mxu0 %v698_v10 }
  0x3a   : > { %643 = vmatprep.subr.bf16.mxu0 %v699_v11 }
  0x3d   : > { %644 = vmatpush3.bf16.msra.mxu0 %v699_v11 }
  0x3e   : > { %645 = vmatprep.subr.bf16.mxu0 %v700_v12 }
  0x41   : > { %646 = vmatpush3.bf16.msra.mxu0 %v700_v12 }
  0x42   : > { %647 = vmatprep.subr.bf16.mxu0 %v701_v13 }
  0x45   : > { %648 = vmatpush3.bf16.msra.mxu0 %v701_v13 }
  0x48   : > { %650 = vmatmul.mubr.bf16.vlgmr.msra.gmra.mrb[0].mxu0 %v703_v14 }
 0x11b   : > { %v651_v17 = vpop.f32.mrb[0].mxu0  ;;  %467 = sbr.rel (%p617_p11) target bundleno = 304 (0x130), region = 85 }
 0x11c   : > { %v458_v19 = vadd.f32 %v651_v17, %v325_v15  ;;  %v441_v20 = vpop.f32.mrb[1].mxu0 }
 0x11d   : > { %v456_v22 = vadd.f32 %v441_v20, %v323_v16  ;;  %v652_v23 = vpop.f32.mrb[2].mxu0 }
 0x11e   : > { %462 = vst [vmem:[#allocation2 + $0x10] sm:$0xff] %v458_v19  ;;  %v459_v24 = vadd.f32 %v652_v23, %v326_v18  ;;  %v444_v25 = vpop.f32.mrb[3].mxu0 }
 0x11f   : > { %460 = vst [vmem:[#allocation2] sm:$0xff] %v456_v22  ;;  %v457_v26 = vadd.f32 %v444_v25, %v324_v21 }
 0x120   : > { %463 = vst [vmem:[#allocation2 + $0x18] sm:$0xff] %v459_v24 }
 0x121   : > { %461 = vst [vmem:[#allocation2 + $0x8] sm:$0xff] %v457_v26 }
 0x125   : > { %v470_v33 = vld [vmem:[#allocation2 + $0x10] sm:$0xff] }
 0x126   : > { %v468_v27 = vld [vmem:[#allocation2] sm:$0xff]  ;;  %v481_v35 = vadd.f32 %v618_v28, %v470_v33 }
 0x127   : > { %v479_v30 = vadd.f32 %v618_v28, %v468_v27  ;;  %v471_v37 = vld [vmem:[#allocation2 + $0x18] sm:$0xff] }
 0x128   : > { %v469_v31 = vld [vmem:[#allocation2 + $0x8] sm:$0xff]  ;;  %v482_v40 = vadd.f32 %v618_v28, %v471_v37  ;;  %v489_v42 = vadd.f32 %v485_v36, %v481_v35 }
 0x129   : > { %v480_v34 = vadd.f32 %v618_v28, %v469_v31  ;;  %v487_v39 = vadd.f32 %v483_v29, %v479_v30 }
 0x12a   : > { %v490_v44 = vadd.f32 %v486_v38, %v482_v40  ;;  %v493_v46 = vmax.f32 %v489_v42, 0.0 }
 0x12b   : > { %v488_v41 = vadd.f32 %v484_v32, %v480_v34  ;;  %v491_v43 = vmax.f32 %v487_v39, 0.0 }
 0x12c   : > { %v494_v47 = vmax.f32 %v490_v44, 0.0  ;;  %497 = vst [vmem:[%s885_s4 + $0x10] sm:$0xff] %v493_v46 }
 0x12d   : > { %v492_v45 = vmax.f32 %v488_v41, 0.0  ;;  %495 = vst [vmem:[%s885_s4] sm:$0xff] %v491_v43 }
 0x12e   : > { %498 = vst [vmem:[%s885_s4 + $0x18] sm:$0xff] %v494_v47 }
 0x12f   : > { %496 = vst [vmem:[%s885_s4 + $0x8] sm:$0xff] %v492_v45 }
 0x130 PF: > { %s14_s19 = sadd.s32 1, %s742_s19   ;;  %s886_s15 = smov %s730_s16 }
 0x131   : > { %p11_p12 = scmp.ge.s32.totalorder %s14_s19, 11   ;;  %s887_s16 = smov %s805_s23 }
 0x132   : > { %s888_s17 = smov %s738_s18  ;;  %s889_s18 = smov %s891_s20 }
 0x133   :  { %13 = sbr.rel (!%p11_p12) target bundleno = 3 (0x3), region = 126 }

// kernel: _lambda_.18
= control target key start
LH: loop header
LB: loop body
LE: loop exit
PB: predicated region body
PF: predicated region fallthrough
CT: control target
= control target key end

     0   :  { %s306_s1 = inlined_call_operand.vmem [shape: bf16[128,128], index: 1, kind: input, shape index: {}]   ;;  %s307_s0 = inlined_call_operand.vmem [shape: bf16[32,128], index: 0, kind: input, shape index: {}]   ;;  %s308_s2 = inlined_call_operand.vmem [shape: f32[1,128], index: 2, kind: input, shape index: {}]   ;;  %s309_s3 = inlined_call_operand.vmem [shape: f32[32,128], index: 3, kind: output, shape index: {}]  }
   0x1   :  { %v231_v0 = vld [vmem:[%s306_s1] sm:$0xff]   ;;  %v232_v1 = vld [vmem:[%s306_s1 + $0x8] sm:$0xff]   ;;  %v233_v2 = vld [vmem:[%s306_s1 + $0x10] sm:$0xff]  }
   0x2   :  { %211 = vmatprep.subr.bf16.mxu0 %v231_v0  ;;  %v234_v3 = vld [vmem:[%s306_s1 + $0x18] sm:$0xff]   ;;  %v239_v4 = vld [vmem:[%s307_s0] sm:$0xff]   ;;  %v236_v6 = vld [vmem:[%s306_s1 + $0x28] sm:$0xff]  }
   0x3   :  { %212 = vmatpush3.bf16.msra.mxu0 %v231_v0  ;;  %227 = vmatprep.mubr.bf16.mxu0 %v239_v4  ;;  %v235_v5 = vld [vmem:[%s306_s1 + $0x20] sm:$0xff]   ;;  %v237_v7 = vld [vmem:[%s306_s1 + $0x30] sm:$0xff]   ;;  %v238_v8 = vld [vmem:[%s306_s1 + $0x38] sm:$0xff]  }
   0x4   :  { %213 = vmatprep.subr.bf16.mxu0 %v232_v1  ;;  %v240_v9 = vld [vmem:[%s307_s0 + $0x8] sm:$0xff]   ;;  %v200_v10 = vld [vmem:[%s308_s2] ss:$0 sm:$0xff] }
   0x7   :  { %214 = vmatpush3.bf16.msra.mxu0 %v232_v1 }
   0x8   :  { %215 = vmatprep.subr.bf16.mxu0 %v233_v2 }
   0xb   :  { %216 = vmatpush3.bf16.msra.mxu0 %v233_v2 }
   0xc   :  { %217 = vmatprep.subr.bf16.mxu0 %v234_v3 }
   0xf   :  { %218 = vmatpush3.bf16.msra.mxu0 %v234_v3 }
  0x10   :  { %219 = vmatprep.subr.bf16.mxu0 %v235_v5 }
  0x13   :  { %220 = vmatpush3.bf16.msra.mxu0 %v235_v5 }
  0x14   :  { %221 = vmatprep.subr.bf16.mxu0 %v236_v6 }
  0x17   :  { %222 = vmatpush3.bf16.msra.mxu0 %v236_v6 }
  0x18   :  { %223 = vmatprep.subr.bf16.mxu0 %v237_v7 }
  0x1b   :  { %224 = vmatpush3.bf16.msra.mxu0 %v237_v7 }
  0x1c   :  { %225 = vmatprep.subr.bf16.mxu0 %v238_v8 }
  0x1f   :  { %226 = vmatpush3.bf16.msra.mxu0 %v238_v8 }
  0x22   :  { %228 = vmatmul.mubr.bf16.vlgmr.msra.gmra.mrb[0].mxu0 %v240_v9 }
  0xf5   :  { %v229_v11 = vpop.f32.mrb[0].mxu0 }
  0xf6   :  { %v180_v12 = vadd.f32 %v229_v11, %v200_v10  ;;  %v141_v13 = vpop.f32.mrb[1].mxu0 }
  0xf7   :  { %v178_v14 = vadd.f32 %v200_v10, %v141_v13  ;;  %v230_v15 = vpop.f32.mrb[2].mxu0 }
  0xf8   :  { %184 = vst [vmem:[%s309_s3 + $0x10] sm:$0xff] %v180_v12  ;;  %v181_v16 = vadd.f32 %v230_v15, %v200_v10  ;;  %v144_v17 = vpop.f32.mrb[3].mxu0 }
  0xf9   :  { %182 = vst [vmem:[%s309_s3] sm:$0xff] %v178_v14  ;;  %v179_v18 = vadd.f32 %v200_v10, %v144_v17 }
  0xfa   :  { %185 = vst [vmem:[%s309_s3 + $0x18] sm:$0xff] %v181_v16 }
  0xfb   :  { %183 = vst [vmem:[%s309_s3 + $0x8] sm:$0xff] %v179_v18 }

// kernel: _lambda_.22
= control target key start
LH: loop header
LB: loop body
LE: loop exit
PB: predicated region body
PF: predicated region fallthrough
CT: control target
= control target key end

     0   :  { %s599_s12 = smov 0   ;;  %s601_s13 = smov 0   ;;  %s669_s0 = inlined_call_operand.vmem [shape: bf16[8,1152], index: 0, kind: input, shape index: {}]   ;;  %s670_s1 = inlined_call_operand.vmem [shape: bf16[1152,256], index: 1, kind: input, shape index: {}]   ;;  %s671_s2 = inlined_call_operand.vmem [shape: f32[1,256], index: 2, kind: input, shape index: {}]   ;;  %s672_s3 = inlined_call_operand.vmem [shape: f32[8,256], index: 3, kind: output, shape index: {}]  }
   0x1   :  { %s603_s14 = smov 0  }
   0x2 LB: > { %s22_s15 = sadd.s32 1, %s571_s13  ;;  %p476_p0 = scmp.ge.s32.totalorder %s575_s14, 1  ;;  %s575_s14 = sphi %s603_s14, %s13_s14   ;;  %s571_s13 = sphi %s601_s13, %s674_s13   ;;  %s567_s12 = sphi %s599_s12, %s673_s12  }
   0x3   : > { %p23_p1 = scmp.ge.s32.totalorder %s22_s15, 9  ;;  %p166_p2 = scmp.lt.s32.totalorder %s575_s14, 10 }
   0x5   : > { %s676_s15 = smov (%p23_p1, %s22_s15), 0  ;;  %p167_p3 = pnand %p476_p0, %p166_p2 }
   0x6   : > { %p201_p4 = scmp.lt.s32.totalorder (!%p167_p3), %s567_s12, 8  ;;  %s478_s16 = sshll.u32 (!%p167_p3), %s567_s12, 4 }
   0x7   : > { %170 = sbr.rel (%p167_p3) target bundleno = 283 (0x11b), region = 32  ;;  %p208_p5 = scmp.lt.s32.totalorder (!%p167_p3), %s478_s16, 143 }
   0x8   : > { %p481_p6 = scmp.ne.s32.totalorder (!%p167_p3), %s567_s12, 0 }
   0xe   : > { %s202_s17 = scalar_select %p201_p4, %s567_s12, 8 }
   0xf   : > { %s678_s16 = smov (!%p208_p5, %s478_s16), 143  ;;  %223 = sbr.rel (%p481_p6) target bundleno = 22 (0x16), region = 36 }
  0x10   : > { %s477_s18 = sshll.u32 %s202_s17, 2  ;;  %s502_s22 = sshll.u32 %s678_s16, 3  ;;  %v577_v0 = vmov (!%p481_p6), 0.0  }
  0x11   : > { %s625_s21 = scalar_lea.vmem %s669_s0, %s477_s18  ;;  %s630_s25 = scalar_lea.vmem %s670_s1, %s502_s22  ;;  %224 = vst [vmem:[#allocation2] sm:$0xff] (!%p481_p6), %v577_v0  ;;  %225 = vst [vmem:[#allocation2 + $0x8] sm:$0xff] (!%p481_p6), %v577_v0 }
  0x16 PF: > { %v529_v1 = vld [vmem:[%s630_s25 + $0x4] ss:$8 sps:$4 sm:$0xff]   ;;  %v531_v2 = vld [vmem:[%s630_s25] ss:$8 sps:$4 sm:$0xff]   ;;  %v578_v3 = vmov 0   ;;  %p498_p7 = scmp.ne.s32.totalorder %s567_s12, 8 }
  0x17   : > { %357 = vmatprep.mubr.bf16.mxu0 %v578_v3  ;;  %325 = vmatprep.subr.bf16.mxu0 %v529_v1  ;;  %v532_v4 = vld [vmem:[%s630_s25 + $0x14] ss:$8 sps:$4 sm:$0xff]   ;;  %v534_v5 = vld [vmem:[%s630_s25 + $0x10] ss:$8 sps:$4 sm:$0xff]   ;;  %v535_v6 = vld [vmem:[%s630_s25 + $0x24] ss:$8 sps:$4 sm:$0xff]   ;;  %v378_v27 = vlaneseq (!%p498_p7) }
  0x18   : > { %326 = vmatpush1.bf16.msra.mxu0 %v531_v2  ;;  %v537_v7 = vld [vmem:[%s630_s25 + $0x20] ss:$8 sps:$4 sm:$0xff]   ;;  %v538_v8 = vld [vmem:[%s630_s25 + $0x34] ss:$8 sps:$4 sm:$0xff]   ;;  %v540_v9 = vld [vmem:[%s630_s25 + $0x30] ss:$8 sps:$4 sm:$0xff]  }
  0x19   : > { %327 = vmatprep.subr.bf16.mxu0 %v532_v4  ;;  %v541_v10 = vld [vmem:[%s630_s25 + $0x44] ss:$8 sps:$4 sm:$0xff]   ;;  %v543_v11 = vld [vmem:[%s630_s25 + $0x40] ss:$8 sps:$4 sm:$0xff]   ;;  %v544_v12 = vld [vmem:[%s630_s25 + $0x54] ss:$8 sps:$4 sm:$0xff]  }
  0x1a   : > { %v546_v13 = vld [vmem:[%s630_s25 + $0x50] ss:$8 sps:$4 sm:$0xff]   ;;  %v547_v14 = vld [vmem:[%s630_s25 + $0x64] ss:$8 sps:$4 sm:$0xff]   ;;  %v549_v15 = vld [vmem:[%s630_s25 + $0x60] ss:$8 sps:$4 sm:$0xff]  }
  0x1b   : > { %v550_v16 = vld [vmem:[%s630_s25 + $0x74] ss:$8 sps:$4 sm:$0xff]   ;;  %v552_v17 = vld [vmem:[%s630_s25 + $0x70] ss:$8 sps:$4 sm:$0xff]   ;;  %v228_v18 = vld [vmem:[%s625_s21] sm:$0xf] }
  0x1c   : > { %328 = vmatpush1.bf16.msra.mxu0 %v534_v5  ;;  %v226_v19 = vld [vmem:[#allocation2] sm:$0xff]  ;;  %v227_v20 = vld [vmem:[#allocation2 + $0x8] sm:$0xff]  ;;  %v379_v28 = vshrl.u32 (!%p498_p7), %v378_v27, 7 }
  0x1d   : > { %329 = vmatprep.subr.bf16.mxu0 %v535_v6  ;;  %v376_v29 = vld [vmem:[%s671_s2] sm:$0x3] (!%p498_p7) }
  0x1e   : > { %v380_v30 = vsub.s32 (!%p498_p7), 0, %v379_v28  ;;  %v384_v31 = vsub.s32 (!%p498_p7), 1, %v379_v28 }
  0x20   : > { %330 = vmatpush1.bf16.msra.mxu0 %v537_v7  ;;  %v381_v34 = vrot.slane (!%p498_p7), %v376_v29, %v380_v30  ;;  %v385_v35 = vrot.slane (!%p498_p7), %v376_v29, %v384_v31 }
  0x21   : > { %331 = vmatprep.subr.bf16.mxu0 %v538_v8 }
  0x24   : > { %332 = vmatpush1.bf16.msra.mxu0 %v540_v9 }
  0x25   : > { %333 = vmatprep.subr.bf16.mxu0 %v541_v10 }
  0x28   : > { %334 = vmatpush1.bf16.msra.mxu0 %v543_v11 }
  0x29   : > { %335 = vmatprep.subr.bf16.mxu0 %v544_v12 }
  0x2c   : > { %336 = vmatpush1.bf16.msra.mxu0 %v546_v13 }
  0x2d   : > { %337 = vmatprep.subr.bf16.mxu0 %v547_v14 }
  0x30   : > { %338 = vmatpush1.bf16.msra.mxu0 %v549_v15 }
  0x31   : > { %339 = vmatprep.subr.bf16.mxu0 %v550_v16 }
  0x34   : > { %340 = vmatpush1.bf16.msra.mxu0 %v552_v17 }
  0x37   : > { %358 = vmatmul.mubr.bf16.vlgmr.msra.gmra.mrb[0].mxu0 %v228_v18 }
 0x108   : > { %373 = sbr.rel (%p498_p7) target bundleno = 283 (0x11b), region = 40 }
 0x10a   : > { %v359_v21 = vpop.f32.mrb[0].mxu0 }
 0x10b   : > { %v366_v22 = vadd.f32 %v359_v21, %v226_v19  ;;  %v361_v23 = vpop.f32.mrb[1].mxu0 }
 0x10c   : > { %v367_v24 = vadd.f32 %v361_v23, %v227_v20  ;;  %v363_v25 = vpop.f32.mrb[2].mxu0 }
 0x10d   : > { %368 = vst [vmem:[#allocation2] sm:$0xff] %v366_v22  ;;  %v364_v26 = vpop.f32.mrb[3].mxu0 }
 0x10e   : > { %369 = vst [vmem:[#allocation2 + $0x8] sm:$0xff] %v367_v24 }
 0x114   : > { %v374_v32 = vld [vmem:[#allocation2] sm:$0xff] }
 0x115   : > { %v375_v33 = vld [vmem:[#allocation2 + $0x8] sm:$0xff]  ;;  %v388_v36 = vadd.f32 %v381_v34, %v374_v32 }
 0x116   : > { %v389_v37 = vadd.f32 %v385_v35, %v375_v33 }
 0x117   : > { %v390_v38 = vmax.f32 %v388_v36, 0.0 }
 0x118   : > { %v391_v39 = vmax.f32 %v389_v37, 0.0 }
 0x119   : > { %392 = vst [vmem:[%s672_s3] sm:$0xff] %v390_v38 }
 0x11a   : > { %393 = vst [vmem:[%s672_s3 + $0x8] sm:$0xff] %v391_v39 }
 0x11b PF: > { %s13_s14 = sadd.s32 1, %s575_s14   ;;  %s673_s12 = smov %s571_s13 }
 0x11c   : > { %p10_p8 = scmp.ge.s32.totalorder %s13_s14, 11   ;;  %s674_s13 = smov %s676_s15 }
 0x11e   :  { %12 = sbr.rel (!%p10_p8) target bundleno = 2 (0x2), region = 73 }

// kernel: _lambda_.23
= control target key start
LH: loop header
LB: loop body
LE: loop exit
PB: predicated region body
PF: predicated region fallthrough
CT: control target
= control target key end

     0   :  { %s821_s15 = smov 0   ;;  %s823_s16 = smov 0   ;;  %s912_s0 = inlined_call_operand.vmem [shape: bf16[8,2304], index: 0, kind: input, shape index: {}]   ;;  %s913_s1 = inlined_call_operand.vmem [shape: bf16[2304,256], index: 1, kind: input, shape index: {}]   ;;  %s914_s2 = inlined_call_operand.vmem [shape: f32[1,256], index: 2, kind: input, shape index: {}]   ;;  %s915_s3 = inlined_call_operand.vmem [shape: f32[8,256], index: 3, kind: input, shape index: {}]   ;;  %s916_s4 = inlined_call_operand.vmem [shape: f32[8,256], index: 4, kind: output, shape index: {}]  }
   0x1   :  { %s825_s17 = smov 0  }
   0x2 LB: > { %s23_s18 = sadd.s32 1, %s789_s16  ;;  %p650_p0 = scmp.ge.s32.totalorder %s793_s17, 1  ;;  %s793_s17 = sphi %s825_s17, %s14_s17   ;;  %s789_s16 = sphi %s823_s16, %s918_s16   ;;  %s785_s15 = sphi %s821_s15, %s917_s15  }
   0x3   : > { %p24_p1 = scmp.ge.s32.totalorder %s23_s18, 9  ;;  %p203_p2 = scmp.lt.s32.totalorder %s793_s17, 10 }
   0x5   : > { %s920_s18 = smov (%p24_p1, %s23_s18), 0  ;;  %p204_p3 = pnand %p650_p0, %p203_p2 }
   0x6   : > { %s651_s19 = sshll.u32 (!%p204_p3), %s785_s15, 1  ;;  %s653_s20 = sshll.u32 (!%p204_p3), %s785_s15, 5 }
   0x7   : > { %207 = sbr.rel (%p204_p3) target bundleno = 319 (0x13f), region = 36  ;;  %p247_p4 = scmp.lt.s32.totalorder (!%p204_p3), %s651_s19, 17 }
   0x8   : > { %p255_p5 = scmp.lt.s32.totalorder (!%p204_p3), %s653_s20, 287  ;;  %p656_p6 = scmp.ne.s32.totalorder (!%p204_p3), %s785_s15, 0 }
   0xe   : > { %s922_s19 = smov (!%p247_p4, %s651_s19), 17  ;;  %s924_s20 = smov (!%p255_p5, %s653_s20), 287 }
   0xf   : > { %s652_s21 = sshll.u32 %s922_s19, 2  ;;  %s695_s25 = sshll.u32 %s924_s20, 3  ;;  %v795_v0 = vmov (!%p656_p6), 0.0  }
  0x10   : > { %s846_s24 = scalar_lea.vmem %s912_s0, %s652_s21  ;;  %s851_s28 = scalar_lea.vmem %s913_s1, %s695_s25  ;;  %275 = vst [vmem:[#allocation2] sm:$0xff] (!%p656_p6), %v795_v0  ;;  %276 = vst [vmem:[#allocation2 + $0x8] sm:$0xff] (!%p656_p6), %v795_v0 }
  0x11   : > { %274 = sbr.rel (%p656_p6) target bundleno = 24 (0x18), region = 40 }
  0x18 PF: > { %v721_v1 = vld [vmem:[%s851_s28 + $0x4] ss:$8 sps:$4 sm:$0xff]   ;;  %v723_v2 = vld [vmem:[%s851_s28] ss:$8 sps:$4 sm:$0xff]   ;;  %v724_v3 = vld [vmem:[%s851_s28 + $0x14] ss:$8 sps:$4 sm:$0xff]  }
  0x19   : > { %479 = vmatprep.subr.bf16.mxu0 %v721_v1  ;;  %v726_v4 = vld [vmem:[%s851_s28 + $0x10] ss:$8 sps:$4 sm:$0xff]   ;;  %v727_v5 = vld [vmem:[%s851_s28 + $0x24] ss:$8 sps:$4 sm:$0xff]   ;;  %v729_v6 = vld [vmem:[%s851_s28 + $0x20] ss:$8 sps:$4 sm:$0xff]  }
  0x1a   : > { %480 = vmatpush1.bf16.msra.mxu0 %v723_v2  ;;  %v730_v7 = vld [vmem:[%s851_s28 + $0x34] ss:$8 sps:$4 sm:$0xff]   ;;  %v732_v8 = vld [vmem:[%s851_s28 + $0x30] ss:$8 sps:$4 sm:$0xff]   ;;  %v733_v9 = vld [vmem:[%s851_s28 + $0x44] ss:$8 sps:$4 sm:$0xff]  }
  0x1b   : > { %481 = vmatprep.subr.bf16.mxu0 %v724_v3  ;;  %v735_v10 = vld [vmem:[%s851_s28 + $0x40] ss:$8 sps:$4 sm:$0xff]   ;;  %v736_v11 = vld [vmem:[%s851_s28 + $0x54] ss:$8 sps:$4 sm:$0xff]   ;;  %v738_v12 = vld [vmem:[%s851_s28 + $0x50] ss:$8 sps:$4 sm:$0xff]  }
  0x1c   : > { %v739_v13 = vld [vmem:[%s851_s28 + $0x64] ss:$8 sps:$4 sm:$0xff]   ;;  %v741_v16 = vld [vmem:[%s851_s28 + $0x60] ss:$8 sps:$4 sm:$0xff]   ;;  %v742_v17 = vld [vmem:[%s851_s28 + $0x74] ss:$8 sps:$4 sm:$0xff]  }
  0x1d   : > { %v279_v14 = vld [vmem:[%s846_s24] sm:$0xff]  ;;  %v744_v18 = vld [vmem:[%s851_s28 + $0x70] ss:$8 sps:$4 sm:$0xff]   ;;  %v748_v21 = vld [vmem:[%s851_s28 + $0x94] ss:$8 sps:$4 sm:$0xff]   ;;  %p691_p7 = scmp.ne.s32.totalorder %s785_s15, 8 }
  0x1e   : > { %482 = vmatpush1.bf16.msra.mxu0 %v726_v4  ;;  %v658_v15 = vcombine.high %v279_v14, %v279_v14  ;;  %v745_v19 = vld [vmem:[%s851_s28 + $0x84] ss:$8 sps:$4 sm:$0xff]   ;;  %v747_v20 = vld [vmem:[%s851_s28 + $0x80] ss:$8 sps:$4 sm:$0xff]   ;;  %v750_v22 = vld [vmem:[%s851_s28 + $0x90] ss:$8 sps:$4 sm:$0xff]   ;;  %v657_v35 = vcombine.low %v279_v14, %v279_v14  ;;  %v532_v44 = vlaneseq (!%p691_p7) }
  0x1f   : > { %483 = vmatprep.subr.bf16.mxu0 %v727_v5  ;;  %v751_v23 = vld [vmem:[%s851_s28 + $0xa4] ss:$8 sps:$4 sm:$0xff]   ;;  %v753_v24 = vld [vmem:[%s851_s28 + $0xa0] ss:$8 sps:$4 sm:$0xff]   ;;  %v754_v25 = vld [vmem:[%s851_s28 + $0xb4] ss:$8 sps:$4 sm:$0xff]  }
  0x20   : > { %511 = vmatprep.mubr.bf16.mxu0 %v658_v15  ;;  %v756_v26 = vld [vmem:[%s851_s28 + $0xb0] ss:$8 sps:$4 sm:$0xff]   ;;  %v757_v27 = vld [vmem:[%s851_s28 + $0xc4] ss:$8 sps:$4 sm:$0xff]   ;;  %v759_v28 = vld [vmem:[%s851_s28 + $0xc0] ss:$8 sps:$4 sm:$0xff]  }
  0x21   : > { %v760_v29 = vld [vmem:[%s851_s28 + $0xd4] ss:$8 sps:$4 sm:$0xff]   ;;  %v762_v30 = vld [vmem:[%s851_s28 + $0xd0] ss:$8 sps:$4 sm:$0xff]   ;;  %v763_v31 = vld [vmem:[%s851_s28 + $0xe4] ss:$8 sps:$4 sm:$0xff]  }
  0x22   : > { %484 = vmatpush1.bf16.msra.mxu0 %v729_v6  ;;  %v765_v32 = vld [vmem:[%s851_s28 + $0xe0] ss:$8 sps:$4 sm:$0xff]   ;;  %v766_v33 = vld [vmem:[%s851_s28 + $0xf4] ss:$8 sps:$4 sm:$0xff]   ;;  %v768_v34 = vld [vmem:[%s851_s28 + $0xf0] ss:$8 sps:$4 sm:$0xff]  }
  0x23   : > { %485 = vmatprep.subr.bf16.mxu0 %v730_v7  ;;  %v277_v36 = vld [vmem:[#allocation2] sm:$0xff]  ;;  %v278_v37 = vld [vmem:[#allocation2 + $0x8] sm:$0xff]  ;;  %v533_v45 = vshrl.u32 (!%p691_p7), %v532_v44, 7 }
  0x24   : > { %v530_v46 = vld [vmem:[%s914_s2] sm:$0x3] (!%p691_p7)  ;;  %v545_v54 = vld [vmem:[%s915_s3 + $0x8] sm:$0xff] (!%p691_p7) }
  0x25   : > { %v534_v47 = vsub.s32 (!%p691_p7), 0, %v533_v45  ;;  %v538_v48 = vsub.s32 (!%p691_p7), 1, %v533_v45  ;;  %v544_v53 = vld [vmem:[%s915_s3] sm:$0xff] (!%p691_p7) }
  0x26   : > { %486 = vmatpush1.bf16.msra.mxu0 %v732_v8 }
  0x27   : > { %487 = vmatprep.subr.bf16.mxu0 %v733_v9  ;;  %v535_v51 = vrot.slane (!%p691_p7), %v530_v46, %v534_v47  ;;  %v539_v52 = vrot.slane (!%p691_p7), %v530_v46, %v538_v48 }
  0x2a   : > { %488 = vmatpush1.bf16.msra.mxu0 %v735_v10 }
  0x2b   : > { %489 = vmatprep.subr.bf16.mxu0 %v736_v11 }
  0x2e   : > { %490 = vmatpush1.bf16.msra.mxu0 %v738_v12 }
  0x2f   : > { %491 = vmatprep.subr.bf16.mxu0 %v739_v13 }
  0x32   : > { %492 = vmatpush1.bf16.msra.mxu0 %v741_v16 }
  0x33   : > { %493 = vmatprep.subr.bf16.mxu0 %v742_v17 }
  0x36   : > { %494 = vmatpush1.bf16.msra.mxu0 %v744_v18 }
  0x37   : > { %495 = vmatprep.subr.bf16.mxu0 %v745_v19 }
  0x3a   : > { %496 = vmatpush1.bf16.msra.mxu0 %v747_v20 }
  0x3b   : > { %497 = vmatprep.subr.bf16.mxu0 %v748_v21 }
  0x3e   : > { %498 = vmatpush1.bf16.msra.mxu0 %v750_v22 }
  0x3f   : > { %499 = vmatprep.subr.bf16.mxu0 %v751_v23 }
  0x42   : > { %500 = vmatpush1.bf16.msra.mxu0 %v753_v24 }
  0x43   : > { %501 = vmatprep.subr.bf16.mxu0 %v754_v25 }
  0x46   : > { %502 = vmatpush1.bf16.msra.mxu0 %v756_v26 }
  0x47   : > { %503 = vmatprep.subr.bf16.mxu0 %v757_v27 }
  0x4a   : > { %504 = vmatpush1.bf16.msra.mxu0 %v759_v28 }
  0x4b   : > { %505 = vmatprep.subr.bf16.mxu0 %v760_v29 }
  0x4e   : > { %506 = vmatpush1.bf16.msra.mxu0 %v762_v30 }
  0x4f   : > { %507 = vmatprep.subr.bf16.mxu0 %v763_v31 }
  0x52   : > { %508 = vmatpush1.bf16.msra.mxu0 %v765_v32 }
  0x53   : > { %509 = vmatprep.subr.bf16.mxu0 %v766_v33 }
  0x56   : > { %510 = vmatpush1.bf16.msra.mxu0 %v768_v34 }
  0x59   : > { %512 = vmatmul.mubr.bf16.vlgmr.msra.gmra.mrb[0].mxu0 %v657_v35 }
 0x12a   : > { %527 = sbr.rel (%p691_p7) target bundleno = 319 (0x13f), region = 44 }
 0x12c   : > { %v513_v38 = vpop.f32.mrb[0].mxu0 }
 0x12d   : > { %v520_v39 = vadd.f32 %v513_v38, %v277_v36  ;;  %v515_v40 = vpop.f32.mrb[1].mxu0 }
 0x12e   : > { %v521_v41 = vadd.f32 %v515_v40, %v278_v37  ;;  %v517_v42 = vpop.f32.mrb[2].mxu0 }
 0x12f   : > { %522 = vst [vmem:[#allocation2] sm:$0xff] %v520_v39  ;;  %v518_v43 = vpop.f32.mrb[3].mxu0 }
 0x130   : > { %523 = vst [vmem:[#allocation2 + $0x8] sm:$0xff] %v521_v41 }
 0x136   : > { %v528_v49 = vld [vmem:[#allocation2] sm:$0xff] }
 0x137   : > { %v529_v50 = vld [vmem:[#allocation2 + $0x8] sm:$0xff]  ;;  %v542_v55 = vadd.f32 %v535_v51, %v528_v49 }
 0x138   : > { %v543_v56 = vadd.f32 %v539_v52, %v529_v50 }
 0x139   : > { %v546_v57 = vadd.f32 %v544_v53, %v542_v55 }
 0x13a   : > { %v547_v58 = vadd.f32 %v545_v54, %v543_v56 }
 0x13b   : > { %v548_v59 = vmax.f32 %v546_v57, 0.0 }
 0x13c   : > { %v549_v60 = vmax.f32 %v547_v58, 0.0 }
 0x13d   : > { %550 = vst [vmem:[%s916_s4] sm:$0xff] %v548_v59 }
 0x13e   : > { %551 = vst [vmem:[%s916_s4 + $0x8] sm:$0xff] %v549_v60 }
 0x13f PF: > { %s14_s17 = sadd.s32 1, %s793_s17   ;;  %s917_s15 = smov %s789_s16 }
 0x140   : > { %p11_p8 = scmp.ge.s32.totalorder %s14_s17, 11   ;;  %s918_s16 = smov %s920_s18 }
 0x142   :  { %13 = sbr.rel (!%p11_p8) target bundleno = 2 (0x2), region = 80 }

// kernel: _lambda_.21
= control target key start
LH: loop header
LB: loop body
LE: loop exit
PB: predicated region body
PF: predicated region fallthrough
CT: control target
= control target key end

     0   :  { %v231_v1 = vmov 0   ;;  %v172_v18 = vlaneseq  ;;  %s312_s1 = inlined_call_operand.vmem [shape: bf16[128,256], index: 1, kind: input, shape index: {}]   ;;  %s313_s0 = inlined_call_operand.vmem [shape: bf16[8,128], index: 0, kind: input, shape index: {}]   ;;  %s314_s2 = inlined_call_operand.vmem [shape: f32[1,256], index: 2, kind: input, shape index: {}]   ;;  %s315_s3 = inlined_call_operand.vmem [shape: f32[8,256], index: 3, kind: output, shape index: {}]  }
   0x1   :  { %v207_v0 = vld [vmem:[%s312_s1 + $0x4] ss:$8 sps:$4 sm:$0xff]   ;;  %152 = vmatprep.mubr.bf16.mxu0 %v231_v1  ;;  %v209_v2 = vld [vmem:[%s312_s1] ss:$8 sps:$4 sm:$0xff]   ;;  %v210_v3 = vld [vmem:[%s312_s1 + $0x14] ss:$8 sps:$4 sm:$0xff]  }
   0x2   :  { %120 = vmatprep.subr.bf16.mxu0 %v207_v0  ;;  %v212_v4 = vld [vmem:[%s312_s1 + $0x10] ss:$8 sps:$4 sm:$0xff]   ;;  %v213_v5 = vld [vmem:[%s312_s1 + $0x24] ss:$8 sps:$4 sm:$0xff]   ;;  %v215_v6 = vld [vmem:[%s312_s1 + $0x20] ss:$8 sps:$4 sm:$0xff]  }
   0x3   :  { %121 = vmatpush1.bf16.msra.mxu0 %v209_v2  ;;  %v216_v7 = vld [vmem:[%s312_s1 + $0x34] ss:$8 sps:$4 sm:$0xff]   ;;  %v218_v8 = vld [vmem:[%s312_s1 + $0x30] ss:$8 sps:$4 sm:$0xff]   ;;  %v219_v9 = vld [vmem:[%s312_s1 + $0x44] ss:$8 sps:$4 sm:$0xff]  }
   0x4   :  { %122 = vmatprep.subr.bf16.mxu0 %v210_v3  ;;  %v221_v10 = vld [vmem:[%s312_s1 + $0x40] ss:$8 sps:$4 sm:$0xff]   ;;  %v222_v11 = vld [vmem:[%s312_s1 + $0x54] ss:$8 sps:$4 sm:$0xff]   ;;  %v224_v12 = vld [vmem:[%s312_s1 + $0x50] ss:$8 sps:$4 sm:$0xff]  }
   0x5   :  { %v225_v13 = vld [vmem:[%s312_s1 + $0x64] ss:$8 sps:$4 sm:$0xff]   ;;  %v227_v14 = vld [vmem:[%s312_s1 + $0x60] ss:$8 sps:$4 sm:$0xff]   ;;  %v228_v15 = vld [vmem:[%s312_s1 + $0x74] ss:$8 sps:$4 sm:$0xff]  }
   0x6   :  { %v230_v16 = vld [vmem:[%s312_s1 + $0x70] ss:$8 sps:$4 sm:$0xff]   ;;  %v23_v17 = vld [vmem:[%s313_s0] sm:$0xf]  ;;  %v173_v19 = vshrl.u32 %v172_v18, 7 }
   0x7   :  { %123 = vmatpush1.bf16.msra.mxu0 %v212_v4  ;;  %v170_v21 = vld [vmem:[%s314_s2] sm:$0x3] }
   0x8   :  { %124 = vmatprep.subr.bf16.mxu0 %v213_v5  ;;  %v174_v20 = vsub.s32 0, %v173_v19  ;;  %v178_v22 = vsub.s32 1, %v173_v19 }
   0xa   :  { %v175_v23 = vrot.slane %v170_v21, %v174_v20  ;;  %v179_v24 = vrot.slane %v170_v21, %v178_v22 }
   0xb   :  { %125 = vmatpush1.bf16.msra.mxu0 %v215_v6 }
   0xc   :  { %126 = vmatprep.subr.bf16.mxu0 %v216_v7 }
   0xf   :  { %127 = vmatpush1.bf16.msra.mxu0 %v218_v8 }
  0x10   :  { %128 = vmatprep.subr.bf16.mxu0 %v219_v9 }
  0x13   :  { %129 = vmatpush1.bf16.msra.mxu0 %v221_v10 }
  0x14   :  { %130 = vmatprep.subr.bf16.mxu0 %v222_v11 }
  0x17   :  { %131 = vmatpush1.bf16.msra.mxu0 %v224_v12 }
  0x18   :  { %132 = vmatprep.subr.bf16.mxu0 %v225_v13 }
  0x1b   :  { %133 = vmatpush1.bf16.msra.mxu0 %v227_v14 }
  0x1c   :  { %134 = vmatprep.subr.bf16.mxu0 %v228_v15 }
  0x1f   :  { %135 = vmatpush1.bf16.msra.mxu0 %v230_v16 }
  0x22   :  { %153 = vmatmul.mubr.bf16.vlgmr.msra.gmra.mrb[0].mxu0 %v23_v17 }
  0xf5   :  { %v154_v25 = vpop.f32.mrb[0].mxu0 }
  0xf6   :  { %v182_v26 = vadd.f32 %v175_v23, %v154_v25  ;;  %v156_v27 = vpop.f32.mrb[1].mxu0 }
  0xf7   :  { %v183_v28 = vadd.f32 %v179_v24, %v156_v27  ;;  %v158_v29 = vpop.f32.mrb[2].mxu0 }
  0xf8   :  { %184 = vst [vmem:[%s315_s3] sm:$0xff] %v182_v26  ;;  %v159_v30 = vpop.f32.mrb[3].mxu0 }
  0xf9   :  { %185 = vst [vmem:[%s315_s3 + $0x8] sm:$0xff] %v183_v28 }

// kernel: _lambda_.25
= control target key start
LH: loop header
LB: loop body
LE: loop exit
PB: predicated region body
PF: predicated region fallthrough
CT: control target
= control target key end

     0   :  { %s1088_s12 = smov 0   ;;  %s1090_s13 = smov 0   ;;  %s1211_s0 = inlined_call_operand.vmem [shape: bf16[8,2304], index: 0, kind: input, shape index: {}]   ;;  %s1212_s1 = inlined_call_operand.vmem [shape: bf16[2304,512], index: 1, kind: input, shape index: {}]   ;;  %s1213_s2 = inlined_call_operand.vmem [shape: f32[1,512], index: 2, kind: input, shape index: {}]   ;;  %s1214_s3 = inlined_call_operand.vmem [shape: f32[8,512], index: 3, kind: output, shape index: {}]  }
   0x1   :  { %s1092_s14 = smov 0  }
   0x2 LB: > { %s22_s15 = sadd.s32 1, %s1061_s13  ;;  %p842_p0 = scmp.ge.s32.totalorder %s1065_s14, 1  ;;  %s1065_s14 = sphi %s1092_s14, %s13_s14   ;;  %s1061_s13 = sphi %s1090_s13, %s1216_s13   ;;  %s1057_s12 = sphi %s1088_s12, %s1215_s12  }
   0x3   : > { %p23_p1 = scmp.ge.s32.totalorder %s22_s15, 9  ;;  %p168_p2 = scmp.lt.s32.totalorder %s1065_s14, 10 }
   0x5   : > { %s1218_s15 = smov (%p23_p1, %s22_s15), 0  ;;  %p169_p3 = pnand %p842_p0, %p168_p2 }
   0x6   : > { %s843_s16 = sshll.u32 (!%p169_p3), %s1057_s12, 1  ;;  %s845_s17 = sshll.u32 (!%p169_p3), %s1057_s12, 5 }
   0x7   : > { %172 = sbr.rel (%p169_p3) target bundleno = 317 (0x13d), region = 32  ;;  %p205_p4 = scmp.lt.s32.totalorder (!%p169_p3), %s843_s16, 17 }
   0x8   : > { %p213_p5 = scmp.lt.s32.totalorder (!%p169_p3), %s845_s17, 287  ;;  %p848_p6 = scmp.ne.s32.totalorder (!%p169_p3), %s1057_s12, 0 }
   0xe   : > { %s1220_s16 = smov (!%p205_p4, %s843_s16), 17  ;;  %s1222_s17 = smov (!%p213_p5, %s845_s17), 287 }
   0xf   : > { %s844_s18 = sshll.u32 %s1220_s16, 2  ;;  %s919_s22 = sshll.u32 %s1222_s17, 4  ;;  %v1067_v0 = vmov (!%p848_p6), 0.0  }
  0x10   : > { %s1113_s21 = scalar_lea.vmem %s1211_s0, %s844_s18  ;;  %s1118_s25 = scalar_lea.vmem %s1212_s1, %s919_s22  ;;  %228 = vst [vmem:[#allocation2] sm:$0xff] (!%p848_p6), %v1067_v0  ;;  %229 = vst [vmem:[#allocation2 + $0x8] sm:$0xff] (!%p848_p6), %v1067_v0 }
  0x11   : > { %227 = sbr.rel (%p848_p6) target bundleno = 24 (0x18), region = 36  ;;  %230 = vst [vmem:[#allocation2 + $0x10] sm:$0xff] (!%p848_p6), %v1067_v0  ;;  %231 = vst [vmem:[#allocation2 + $0x18] sm:$0xff] (!%p848_p6), %v1067_v0 }
  0x18 PF: > { %v945_v1 = vld [vmem:[%s1118_s25 + $0x4] ss:$16 sps:$4 sm:$0xff]   ;;  %v947_v2 = vld [vmem:[%s1118_s25 + $0xc] ss:$16 sps:$4 sm:$0xff]   ;;  %v949_v3 = vld [vmem:[%s1118_s25] ss:$16 sps:$4 sm:$0xff]  }
  0x19   : > { %628 = vmatprep.subr.bf16.mxu0 %v945_v1  ;;  %v950_v4 = vld [vmem:[%s1118_s25 + $0x8] ss:$16 sps:$4 sm:$0xff]   ;;  %669 = vmatprep.subr.bf16.mxu1 %v947_v2  ;;  %v951_v5 = vld [vmem:[%s1118_s25 + $0x24] ss:$16 sps:$4 sm:$0xff]   ;;  %v953_v6 = vld [vmem:[%s1118_s25 + $0x2c] ss:$16 sps:$4 sm:$0xff]  }
  0x1a   : > { %629 = vmatpush1.bf16.msra.mxu0 %v949_v3  ;;  %670 = vmatpush1.bf16.msra.mxu1 %v950_v4  ;;  %v955_v7 = vld [vmem:[%s1118_s25 + $0x20] ss:$16 sps:$4 sm:$0xff]   ;;  %v956_v8 = vld [vmem:[%s1118_s25 + $0x28] ss:$16 sps:$4 sm:$0xff]   ;;  %v957_v9 = vld [vmem:[%s1118_s25 + $0x44] ss:$16 sps:$4 sm:$0xff]  }
  0x1b   : > { %630 = vmatprep.subr.bf16.mxu0 %v951_v5  ;;  %671 = vmatprep.subr.bf16.mxu1 %v953_v6  ;;  %v959_v10 = vld [vmem:[%s1118_s25 + $0x4c] ss:$16 sps:$4 sm:$0xff]   ;;  %v961_v11 = vld [vmem:[%s1118_s25 + $0x40] ss:$16 sps:$4 sm:$0xff]   ;;  %v962_v12 = vld [vmem:[%s1118_s25 + $0x48] ss:$16 sps:$4 sm:$0xff]  }
  0x1c   : > { %v963_v13 = vld [vmem:[%s1118_s25 + $0x64] ss:$16 sps:$4 sm:$0xff]   ;;  %v965_v14 = vld [vmem:[%s1118_s25 + $0x6c] ss:$16 sps:$4 sm:$0xff]   ;;  %v967_v15 = vld [vmem:[%s1118_s25 + $0x60] ss:$16 sps:$4 sm:$0xff]  }
  0x1d   : > { %v968_v16 = vld [vmem:[%s1118_s25 + $0x68] ss:$16 sps:$4 sm:$0xff]   ;;  %v969_v17 = vld [vmem:[%s1118_s25 + $0x84] ss:$16 sps:$4 sm:$0xff]   ;;  %v971_v18 = vld [vmem:[%s1118_s25 + $0x8c] ss:$16 sps:$4 sm:$0xff]  }
  0x1e   : > { %631 = vmatpush1.bf16.msra.mxu0 %v955_v7  ;;  %672 = vmatpush1.bf16.msra.mxu1 %v956_v8  ;;  %v973_v19 = vld [vmem:[%s1118_s25 + $0x80] ss:$16 sps:$4 sm:$0xff]   ;;  %v974_v20 = vld [vmem:[%s1118_s25 + $0x88] ss:$16 sps:$4 sm:$0xff]   ;;  %v975_v21 = vld [vmem:[%s1118_s25 + $0xa4] ss:$16 sps:$4 sm:$0xff]  }
  0x1f   : > { %632 = vmatprep.subr.bf16.mxu0 %v957_v9  ;;  %673 = vmatprep.subr.bf16.mxu1 %v959_v10  ;;  %v977_v22 = vld [vmem:[%s1118_s25 + $0xac] ss:$16 sps:$4 sm:$0xff]   ;;  %v979_v23 = vld [vmem:[%s1118_s25 + $0xa0] ss:$16 sps:$4 sm:$0xff]   ;;  %v980_v24 = vld [vmem:[%s1118_s25 + $0xa8] ss:$16 sps:$4 sm:$0xff]  }
  0x20   : > { %v981_v25 = vld [vmem:[%s1118_s25 + $0xc4] ss:$16 sps:$4 sm:$0xff]   ;;  %v983_v26 = vld [vmem:[%s1118_s25 + $0xcc] ss:$16 sps:$4 sm:$0xff]   ;;  %v985_v27 = vld [vmem:[%s1118_s25 + $0xc0] ss:$16 sps:$4 sm:$0xff]  }
  0x21   : > { %v986_v28 = vld [vmem:[%s1118_s25 + $0xc8] ss:$16 sps:$4 sm:$0xff]   ;;  %v987_v29 = vld [vmem:[%s1118_s25 + $0xe4] ss:$16 sps:$4 sm:$0xff]   ;;  %v989_v30 = vld [vmem:[%s1118_s25 + $0xec] ss:$16 sps:$4 sm:$0xff]  }
  0x22   : > { %633 = vmatpush1.bf16.msra.mxu0 %v961_v11  ;;  %674 = vmatpush1.bf16.msra.mxu1 %v962_v12  ;;  %v991_v31 = vld [vmem:[%s1118_s25 + $0xe0] ss:$16 sps:$4 sm:$0xff]   ;;  %v992_v32 = vld [vmem:[%s1118_s25 + $0xe8] ss:$16 sps:$4 sm:$0xff]   ;;  %v993_v33 = vld [vmem:[%s1118_s25 + $0x104] ss:$16 sps:$4 sm:$0xff]  }
  0x23   : > { %634 = vmatprep.subr.bf16.mxu0 %v963_v13  ;;  %675 = vmatprep.subr.bf16.mxu1 %v965_v14  ;;  %v995_v34 = vld [vmem:[%s1118_s25 + $0x10c] ss:$16 sps:$4 sm:$0xff]   ;;  %v997_v35 = vld [vmem:[%s1118_s25 + $0x100] ss:$16 sps:$4 sm:$0xff]   ;;  %v998_v36 = vld [vmem:[%s1118_s25 + $0x108] ss:$16 sps:$4 sm:$0xff]  }
  0x24   : > { %v999_v37 = vld [vmem:[%s1118_s25 + $0x124] ss:$16 sps:$4 sm:$0xff]   ;;  %v1001_v38 = vld [vmem:[%s1118_s25 + $0x12c] ss:$16 sps:$4 sm:$0xff]   ;;  %v1003_v39 = vld [vmem:[%s1118_s25 + $0x120] ss:$16 sps:$4 sm:$0xff]  }
  0x25   : > { %v1004_v40 = vld [vmem:[%s1118_s25 + $0x128] ss:$16 sps:$4 sm:$0xff]   ;;  %v1005_v41 = vld [vmem:[%s1118_s25 + $0x144] ss:$16 sps:$4 sm:$0xff]   ;;  %v1007_v42 = vld [vmem:[%s1118_s25 + $0x14c] ss:$16 sps:$4 sm:$0xff]  }
  0x26   : > { %635 = vmatpush1.bf16.msra.mxu0 %v967_v15  ;;  %676 = vmatpush1.bf16.msra.mxu1 %v968_v16  ;;  %v1009_v43 = vld [vmem:[%s1118_s25 + $0x140] ss:$16 sps:$4 sm:$0xff]   ;;  %v1010_v44 = vld [vmem:[%s1118_s25 + $0x148] ss:$16 sps:$4 sm:$0xff]   ;;  %v1011_v45 = vld [vmem:[%s1118_s25 + $0x164] ss:$16 sps:$4 sm:$0xff]  }
  0x27   : > { %636 = vmatprep.subr.bf16.mxu0 %v969_v17  ;;  %677 = vmatprep.subr.bf16.mxu1 %v971_v18  ;;  %v1013_v46 = vld [vmem:[%s1118_s25 + $0x16c] ss:$16 sps:$4 sm:$0xff]   ;;  %v236_v47 = vld [vmem:[%s1113_s21] sm:$0xff]  ;;  %v1016_v50 = vld [vmem:[%s1118_s25 + $0x168] ss:$16 sps:$4 sm:$0xff]   ;;  %p915_p7 = scmp.ne.s32.totalorder %s1057_s12, 8 }
  0x28   : > { %v850_v48 = vcombine.high %v236_v47, %v236_v47  ;;  %v1015_v49 = vld [vmem:[%s1118_s25 + $0x160] ss:$16 sps:$4 sm:$0xff]   ;;  %v1017_v51 = vld [vmem:[%s1118_s25 + $0x184] ss:$16 sps:$4 sm:$0xff]   ;;  %v1019_v52 = vld [vmem:[%s1118_s25 + $0x18c] ss:$16 sps:$4 sm:$0xff]   ;;  %v849_v3 = vcombine.low %v236_v47, %v236_v47 }
  0x29   : > { %v1021_v53 = vld [vmem:[%s1118_s25 + $0x180] ss:$16 sps:$4 sm:$0xff]   ;;  %v1022_v54 = vld [vmem:[%s1118_s25 + $0x188] ss:$16 sps:$4 sm:$0xff]   ;;  %v1023_v55 = vld [vmem:[%s1118_s25 + $0x1a4] ss:$16 sps:$4 sm:$0xff]  }
  0x2a   : > { %637 = vmatpush1.bf16.msra.mxu0 %v973_v19  ;;  %678 = vmatpush1.bf16.msra.mxu1 %v974_v20  ;;  %v1025_v56 = vld [vmem:[%s1118_s25 + $0x1ac] ss:$16 sps:$4 sm:$0xff]   ;;  %v1027_v57 = vld [vmem:[%s1118_s25 + $0x1a0] ss:$16 sps:$4 sm:$0xff]   ;;  %v1028_v58 = vld [vmem:[%s1118_s25 + $0x1a8] ss:$16 sps:$4 sm:$0xff]   ;;  %v728_v20 = vlaneseq (!%p915_p7) }
  0x2b   : > { %638 = vmatprep.subr.bf16.mxu0 %v975_v21  ;;  %679 = vmatprep.subr.bf16.mxu1 %v977_v22  ;;  %v1029_v59 = vld [vmem:[%s1118_s25 + $0x1c4] ss:$16 sps:$4 sm:$0xff]   ;;  %v1031_v60 = vld [vmem:[%s1118_s25 + $0x1cc] ss:$16 sps:$4 sm:$0xff]   ;;  %v1033_v61 = vld [vmem:[%s1118_s25 + $0x1c0] ss:$16 sps:$4 sm:$0xff]  }
  0x2c   : > { %660 = vmatprep.mubr.bf16.mxu0 %v850_v48  ;;  %701 = vmatprep.mubr.bf16.mxu1 %v850_v48  ;;  %v1034_v62 = vld [vmem:[%s1118_s25 + $0x1c8] ss:$16 sps:$4 sm:$0xff]   ;;  %v1035_v63 = vld [vmem:[%s1118_s25 + $0x1e4] ss:$16 sps:$4 sm:$0xff]   ;;  %v1037_v0 = vld [vmem:[%s1118_s25 + $0x1ec] ss:$16 sps:$4 sm:$0xff]  }
  0x2d   : > { %v1039_v1 = vld [vmem:[%s1118_s25 + $0x1e0] ss:$16 sps:$4 sm:$0xff]   ;;  %v1040_v2 = vld [vmem:[%s1118_s25 + $0x1e8] ss:$16 sps:$4 sm:$0xff]   ;;  %v729_v21 = vshrl.u32 (!%p915_p7), %v728_v20, 7 }
  0x2e   : > { %639 = vmatpush1.bf16.msra.mxu0 %v979_v23  ;;  %680 = vmatpush1.bf16.msra.mxu1 %v980_v24  ;;  %v232_v4 = vld [vmem:[#allocation2] sm:$0xff]  ;;  %v234_v5 = vld [vmem:[#allocation2 + $0x10] sm:$0xff]  ;;  %v233_v6 = vld [vmem:[#allocation2 + $0x8] sm:$0xff] }
  0x2f   : > { %640 = vmatprep.subr.bf16.mxu0 %v981_v25  ;;  %681 = vmatprep.subr.bf16.mxu1 %v983_v26  ;;  %v235_v7 = vld [vmem:[#allocation2 + $0x18] sm:$0xff]  ;;  %v726_v22 = vld [vmem:[%s1213_s2] sm:$0xf] (!%p915_p7)  ;;  %v730_v24 = vsub.s32 (!%p915_p7), 0, %v729_v21  ;;  %v734_v25 = vsub.s32 (!%p915_p7), 1, %v729_v21  ;;  %v738_v26 = vsub.s32 (!%p915_p7), 2, %v729_v21 }
  0x32   : > { %641 = vmatpush1.bf16.msra.mxu0 %v985_v27  ;;  %682 = vmatpush1.bf16.msra.mxu1 %v986_v28  ;;  %v742_v27 = vsub.s32 (!%p915_p7), 3, %v729_v21 }
  0x33   : > { %642 = vmatprep.subr.bf16.mxu0 %v987_v29  ;;  %683 = vmatprep.subr.bf16.mxu1 %v989_v30 }
  0x36   : > { %643 = vmatpush1.bf16.msra.mxu0 %v991_v31  ;;  %684 = vmatpush1.bf16.msra.mxu1 %v992_v32  ;;  %v731_v31 = vrot.slane (!%p915_p7), %v726_v22, %v730_v24  ;;  %v735_v32 = vrot.slane (!%p915_p7), %v726_v22, %v734_v25 }
  0x37   : > { %644 = vmatprep.subr.bf16.mxu0 %v993_v33  ;;  %685 = vmatprep.subr.bf16.mxu1 %v995_v34  ;;  %v739_v33 = vrot.slane (!%p915_p7), %v726_v22, %v738_v26  ;;  %v743_v34 = vrot.slane (!%p915_p7), %v726_v22, %v742_v27 }
  0x3a   : > { %645 = vmatpush1.bf16.msra.mxu0 %v997_v35  ;;  %686 = vmatpush1.bf16.msra.mxu1 %v998_v36 }
  0x3b   : > { %646 = vmatprep.subr.bf16.mxu0 %v999_v37  ;;  %687 = vmatprep.subr.bf16.mxu1 %v1001_v38 }
  0x3e   : > { %647 = vmatpush1.bf16.msra.mxu0 %v1003_v39  ;;  %688 = vmatpush1.bf16.msra.mxu1 %v1004_v40 }
  0x3f   : > { %648 = vmatprep.subr.bf16.mxu0 %v1005_v41  ;;  %689 = vmatprep.subr.bf16.mxu1 %v1007_v42 }
  0x42   : > { %649 = vmatpush1.bf16.msra.mxu0 %v1009_v43  ;;  %690 = vmatpush1.bf16.msra.mxu1 %v1010_v44 }
  0x43   : > { %650 = vmatprep.subr.bf16.mxu0 %v1011_v45  ;;  %691 = vmatprep.subr.bf16.mxu1 %v1013_v46 }
  0x46   : > { %651 = vmatpush1.bf16.msra.mxu0 %v1015_v49  ;;  %692 = vmatpush1.bf16.msra.mxu1 %v1016_v50 }
  0x47   : > { %652 = vmatprep.subr.bf16.mxu0 %v1017_v51  ;;  %693 = vmatprep.subr.bf16.mxu1 %v1019_v52 }
  0x4a   : > { %653 = vmatpush1.bf16.msra.mxu0 %v1021_v53  ;;  %694 = vmatpush1.bf16.msra.mxu1 %v1022_v54 }
  0x4b   : > { %654 = vmatprep.subr.bf16.mxu0 %v1023_v55  ;;  %695 = vmatprep.subr.bf16.mxu1 %v1025_v56 }
  0x4e   : > { %655 = vmatpush1.bf16.msra.mxu0 %v1027_v57  ;;  %696 = vmatpush1.bf16.msra.mxu1 %v1028_v58 }
  0x4f   : > { %656 = vmatprep.subr.bf16.mxu0 %v1029_v59  ;;  %697 = vmatprep.subr.bf16.mxu1 %v1031_v60 }
  0x52   : > { %657 = vmatpush1.bf16.msra.mxu0 %v1033_v61  ;;  %698 = vmatpush1.bf16.msra.mxu1 %v1034_v62 }
  0x53   : > { %658 = vmatprep.subr.bf16.mxu0 %v1035_v63  ;;  %699 = vmatprep.subr.bf16.mxu1 %v1037_v0 }
  0x56   : > { %659 = vmatpush1.bf16.msra.mxu0 %v1039_v1  ;;  %700 = vmatpush1.bf16.msra.mxu1 %v1040_v2 }
  0x59   : > { %661 = vmatmul.mubr.bf16.vlgmr.msra.gmra.mrb[0].mxu0 %v849_v3  ;;  %702 = vmatmul.mubr.bf16.vlgmr.msra.gmra.mrb[0].mxu1 %v849_v3 }
 0x12a   : > { %721 = sbr.rel (%p915_p7) target bundleno = 317 (0x13d), region = 40 }
 0x12c   : > { %v662_v8 = vpop.f32.mrb[0].mxu0  ;;  %v703_v9 = vpop.f32.mrb[0].mxu1 }
 0x12d   : > { %v710_v10 = vadd.f32 %v662_v8, %v232_v4  ;;  %v712_v11 = vadd.f32 %v703_v9, %v234_v5  ;;  %v664_v12 = vpop.f32.mrb[1].mxu0  ;;  %v705_v13 = vpop.f32.mrb[1].mxu1 }
 0x12e   : > { %v711_v14 = vadd.f32 %v664_v12, %v233_v6  ;;  %v713_v15 = vadd.f32 %v705_v13, %v235_v7  ;;  %v666_v16 = vpop.f32.mrb[2].mxu0  ;;  %v707_v17 = vpop.f32.mrb[2].mxu1 }
 0x12f   : > { %714 = vst [vmem:[#allocation2] sm:$0xff] %v710_v10  ;;  %716 = vst [vmem:[#allocation2 + $0x10] sm:$0xff] %v712_v11  ;;  %v667_v18 = vpop.f32.mrb[3].mxu0  ;;  %v708_v19 = vpop.f32.mrb[3].mxu1 }
 0x130   : > { %715 = vst [vmem:[#allocation2 + $0x8] sm:$0xff] %v711_v14  ;;  %717 = vst [vmem:[#allocation2 + $0x18] sm:$0xff] %v713_v15 }
 0x136   : > { %v722_v23 = vld [vmem:[#allocation2] sm:$0xff]  ;;  %v724_v29 = vld [vmem:[#allocation2 + $0x10] sm:$0xff] }
 0x137   : > { %v723_v28 = vld [vmem:[#allocation2 + $0x8] sm:$0xff]  ;;  %v725_v30 = vld [vmem:[#allocation2 + $0x18] sm:$0xff]  ;;  %v748_v35 = vadd.f32 %v731_v31, %v722_v23  ;;  %v750_v37 = vadd.f32 %v739_v33, %v724_v29 }
 0x138   : > { %v749_v36 = vadd.f32 %v735_v32, %v723_v28  ;;  %v751_v38 = vadd.f32 %v743_v34, %v725_v30 }
 0x139   : > { %v752_v39 = vmax.f32 %v748_v35, 0.0  ;;  %v754_v41 = vmax.f32 %v750_v37, 0.0 }
 0x13a   : > { %v753_v40 = vmax.f32 %v749_v36, 0.0  ;;  %v755_v42 = vmax.f32 %v751_v38, 0.0 }
 0x13b   : > { %756 = vst [vmem:[%s1214_s3] sm:$0xff] %v752_v39  ;;  %758 = vst [vmem:[%s1214_s3 + $0x10] sm:$0xff] %v754_v41 }
 0x13c   : > { %757 = vst [vmem:[%s1214_s3 + $0x8] sm:$0xff] %v753_v40  ;;  %759 = vst [vmem:[%s1214_s3 + $0x18] sm:$0xff] %v755_v42 }
 0x13d PF: > { %s13_s14 = sadd.s32 1, %s1065_s14   ;;  %s1215_s12 = smov %s1061_s13 }
 0x13e   : > { %p10_p8 = scmp.ge.s32.totalorder %s13_s14, 11   ;;  %s1216_s13 = smov %s1218_s15 }
 0x140   :  { %12 = sbr.rel (!%p10_p8) target bundleno = 2 (0x2), region = 73 }

// kernel: _lambda_.24
= control target key start
LH: loop header
LB: loop body
LE: loop exit
PB: predicated region body
PF: predicated region fallthrough
CT: control target
= control target key end

     0   :  { %s943_s1 = inlined_call_operand.vmem [shape: bf16[256,512], index: 1, kind: input, shape index: {}]   ;;  %s944_s0 = inlined_call_operand.vmem [shape: bf16[8,256], index: 0, kind: input, shape index: {}]   ;;  %s945_s2 = inlined_call_operand.vmem [shape: f32[1,512], index: 2, kind: input, shape index: {}]   ;;  %s946_s3 = inlined_call_operand.vmem [shape: f32[8,512], index: 3, kind: output, shape index: {}]  }
   0x1   :  { %v615_v0 = vld [vmem:[%s943_s1 + $0x4] ss:$16 sps:$4 sm:$0xff]   ;;  %v617_v1 = vld [vmem:[%s943_s1 + $0xc] ss:$16 sps:$4 sm:$0xff]   ;;  %v619_v2 = vld [vmem:[%s943_s1] ss:$16 sps:$4 sm:$0xff]  }
   0x2   :  { %418 = vmatprep.subr.bf16.mxu0 %v615_v0  ;;  %v620_v3 = vld [vmem:[%s943_s1 + $0x8] ss:$16 sps:$4 sm:$0xff]   ;;  %459 = vmatprep.subr.bf16.mxu1 %v617_v1  ;;  %v621_v4 = vld [vmem:[%s943_s1 + $0x24] ss:$16 sps:$4 sm:$0xff]   ;;  %v623_v5 = vld [vmem:[%s943_s1 + $0x2c] ss:$16 sps:$4 sm:$0xff]  }
   0x3   :  { %419 = vmatpush1.bf16.msra.mxu0 %v619_v2  ;;  %460 = vmatpush1.bf16.msra.mxu1 %v620_v3  ;;  %v625_v6 = vld [vmem:[%s943_s1 + $0x20] ss:$16 sps:$4 sm:$0xff]   ;;  %v626_v7 = vld [vmem:[%s943_s1 + $0x28] ss:$16 sps:$4 sm:$0xff]   ;;  %v627_v8 = vld [vmem:[%s943_s1 + $0x44] ss:$16 sps:$4 sm:$0xff]   ;;  %v517_v3 = vlaneseq }
   0x4   :  { %420 = vmatprep.subr.bf16.mxu0 %v621_v4  ;;  %461 = vmatprep.subr.bf16.mxu1 %v623_v5  ;;  %v629_v9 = vld [vmem:[%s943_s1 + $0x4c] ss:$16 sps:$4 sm:$0xff]   ;;  %v631_v10 = vld [vmem:[%s943_s1 + $0x40] ss:$16 sps:$4 sm:$0xff]   ;;  %v632_v11 = vld [vmem:[%s943_s1 + $0x48] ss:$16 sps:$4 sm:$0xff]  }
   0x5   :  { %v633_v12 = vld [vmem:[%s943_s1 + $0x64] ss:$16 sps:$4 sm:$0xff]   ;;  %v635_v13 = vld [vmem:[%s943_s1 + $0x6c] ss:$16 sps:$4 sm:$0xff]   ;;  %v637_v14 = vld [vmem:[%s943_s1 + $0x60] ss:$16 sps:$4 sm:$0xff]  }
   0x6   :  { %v638_v15 = vld [vmem:[%s943_s1 + $0x68] ss:$16 sps:$4 sm:$0xff]   ;;  %v639_v16 = vld [vmem:[%s943_s1 + $0x84] ss:$16 sps:$4 sm:$0xff]   ;;  %v641_v17 = vld [vmem:[%s943_s1 + $0x8c] ss:$16 sps:$4 sm:$0xff]  }
   0x7   :  { %421 = vmatpush1.bf16.msra.mxu0 %v625_v6  ;;  %462 = vmatpush1.bf16.msra.mxu1 %v626_v7  ;;  %v643_v18 = vld [vmem:[%s943_s1 + $0x80] ss:$16 sps:$4 sm:$0xff]   ;;  %v644_v19 = vld [vmem:[%s943_s1 + $0x88] ss:$16 sps:$4 sm:$0xff]   ;;  %v645_v20 = vld [vmem:[%s943_s1 + $0xa4] ss:$16 sps:$4 sm:$0xff]  }
   0x8   :  { %422 = vmatprep.subr.bf16.mxu0 %v627_v8  ;;  %463 = vmatprep.subr.bf16.mxu1 %v629_v9  ;;  %v647_v21 = vld [vmem:[%s943_s1 + $0xac] ss:$16 sps:$4 sm:$0xff]   ;;  %v649_v22 = vld [vmem:[%s943_s1 + $0xa0] ss:$16 sps:$4 sm:$0xff]   ;;  %v650_v23 = vld [vmem:[%s943_s1 + $0xa8] ss:$16 sps:$4 sm:$0xff]  }
   0x9   :  { %v651_v24 = vld [vmem:[%s943_s1 + $0xc4] ss:$16 sps:$4 sm:$0xff]   ;;  %v653_v25 = vld [vmem:[%s943_s1 + $0xcc] ss:$16 sps:$4 sm:$0xff]   ;;  %v655_v26 = vld [vmem:[%s943_s1 + $0xc0] ss:$16 sps:$4 sm:$0xff]  }
   0xa   :  { %v656_v27 = vld [vmem:[%s943_s1 + $0xc8] ss:$16 sps:$4 sm:$0xff]   ;;  %v657_v28 = vld [vmem:[%s943_s1 + $0xe4] ss:$16 sps:$4 sm:$0xff]   ;;  %v659_v29 = vld [vmem:[%s943_s1 + $0xec] ss:$16 sps:$4 sm:$0xff]  }
   0xb   :  { %423 = vmatpush1.bf16.msra.mxu0 %v631_v10  ;;  %464 = vmatpush1.bf16.msra.mxu1 %v632_v11  ;;  %v661_v30 = vld [vmem:[%s943_s1 + $0xe0] ss:$16 sps:$4 sm:$0xff]   ;;  %v662_v31 = vld [vmem:[%s943_s1 + $0xe8] ss:$16 sps:$4 sm:$0xff]   ;;  %v663_v32 = vld [vmem:[%s943_s1 + $0x104] ss:$16 sps:$4 sm:$0xff]  }
   0xc   :  { %424 = vmatprep.subr.bf16.mxu0 %v633_v12  ;;  %465 = vmatprep.subr.bf16.mxu1 %v635_v13  ;;  %v665_v33 = vld [vmem:[%s943_s1 + $0x10c] ss:$16 sps:$4 sm:$0xff]   ;;  %v667_v34 = vld [vmem:[%s943_s1 + $0x100] ss:$16 sps:$4 sm:$0xff]   ;;  %v668_v35 = vld [vmem:[%s943_s1 + $0x108] ss:$16 sps:$4 sm:$0xff]  }
   0xd   :  { %v669_v36 = vld [vmem:[%s943_s1 + $0x124] ss:$16 sps:$4 sm:$0xff]   ;;  %v671_v37 = vld [vmem:[%s943_s1 + $0x12c] ss:$16 sps:$4 sm:$0xff]   ;;  %v673_v38 = vld [vmem:[%s943_s1 + $0x120] ss:$16 sps:$4 sm:$0xff]  }
   0xe   :  { %v674_v39 = vld [vmem:[%s943_s1 + $0x128] ss:$16 sps:$4 sm:$0xff]   ;;  %v675_v40 = vld [vmem:[%s943_s1 + $0x144] ss:$16 sps:$4 sm:$0xff]   ;;  %v677_v41 = vld [vmem:[%s943_s1 + $0x14c] ss:$16 sps:$4 sm:$0xff]  }
   0xf   :  { %425 = vmatpush1.bf16.msra.mxu0 %v637_v14  ;;  %466 = vmatpush1.bf16.msra.mxu1 %v638_v15  ;;  %v679_v42 = vld [vmem:[%s943_s1 + $0x140] ss:$16 sps:$4 sm:$0xff]   ;;  %v680_v43 = vld [vmem:[%s943_s1 + $0x148] ss:$16 sps:$4 sm:$0xff]   ;;  %v681_v44 = vld [vmem:[%s943_s1 + $0x164] ss:$16 sps:$4 sm:$0xff]  }
  0x10   :  { %426 = vmatprep.subr.bf16.mxu0 %v639_v16  ;;  %467 = vmatprep.subr.bf16.mxu1 %v641_v17  ;;  %v683_v45 = vld [vmem:[%s943_s1 + $0x16c] ss:$16 sps:$4 sm:$0xff]   ;;  %v26_v46 = vld [vmem:[%s944_s0] sm:$0xff]  ;;  %v686_v49 = vld [vmem:[%s943_s1 + $0x168] ss:$16 sps:$4 sm:$0xff]   ;;  %v518_v4 = vshrl.u32 %v517_v3, 7 }
  0x11   :  { %v550_v47 = vcombine.high %v26_v46, %v26_v46  ;;  %v685_v48 = vld [vmem:[%s943_s1 + $0x160] ss:$16 sps:$4 sm:$0xff]   ;;  %v687_v50 = vld [vmem:[%s943_s1 + $0x184] ss:$16 sps:$4 sm:$0xff]   ;;  %v689_v51 = vld [vmem:[%s943_s1 + $0x18c] ss:$16 sps:$4 sm:$0xff]   ;;  %v549_v2 = vcombine.low %v26_v46, %v26_v46 }
  0x12   :  { %v691_v52 = vld [vmem:[%s943_s1 + $0x180] ss:$16 sps:$4 sm:$0xff]   ;;  %v692_v53 = vld [vmem:[%s943_s1 + $0x188] ss:$16 sps:$4 sm:$0xff]   ;;  %v693_v54 = vld [vmem:[%s943_s1 + $0x1a4] ss:$16 sps:$4 sm:$0xff]  }
  0x13   :  { %427 = vmatpush1.bf16.msra.mxu0 %v643_v18  ;;  %468 = vmatpush1.bf16.msra.mxu1 %v644_v19  ;;  %v695_v55 = vld [vmem:[%s943_s1 + $0x1ac] ss:$16 sps:$4 sm:$0xff]   ;;  %v697_v56 = vld [vmem:[%s943_s1 + $0x1a0] ss:$16 sps:$4 sm:$0xff]   ;;  %v698_v57 = vld [vmem:[%s943_s1 + $0x1a8] ss:$16 sps:$4 sm:$0xff]  }
  0x14   :  { %428 = vmatprep.subr.bf16.mxu0 %v645_v20  ;;  %469 = vmatprep.subr.bf16.mxu1 %v647_v21  ;;  %v699_v58 = vld [vmem:[%s943_s1 + $0x1c4] ss:$16 sps:$4 sm:$0xff]   ;;  %v701_v59 = vld [vmem:[%s943_s1 + $0x1cc] ss:$16 sps:$4 sm:$0xff]   ;;  %v703_v60 = vld [vmem:[%s943_s1 + $0x1c0] ss:$16 sps:$4 sm:$0xff]  }
  0x15   :  { %450 = vmatprep.mubr.bf16.mxu0 %v550_v47  ;;  %491 = vmatprep.mubr.bf16.mxu1 %v550_v47  ;;  %v704_v61 = vld [vmem:[%s943_s1 + $0x1c8] ss:$16 sps:$4 sm:$0xff]   ;;  %v705_v62 = vld [vmem:[%s943_s1 + $0x1e4] ss:$16 sps:$4 sm:$0xff]   ;;  %v707_v63 = vld [vmem:[%s943_s1 + $0x1ec] ss:$16 sps:$4 sm:$0xff]  }
  0x16   :  { %v709_v0 = vld [vmem:[%s943_s1 + $0x1e0] ss:$16 sps:$4 sm:$0xff]   ;;  %v710_v1 = vld [vmem:[%s943_s1 + $0x1e8] ss:$16 sps:$4 sm:$0xff]   ;;  %v519_v5 = vsub.s32 0, %v518_v4  ;;  %v527_v6 = vsub.s32 2, %v518_v4 }
  0x17   :  { %429 = vmatpush1.bf16.msra.mxu0 %v649_v22  ;;  %470 = vmatpush1.bf16.msra.mxu1 %v650_v23  ;;  %v515_v7 = vld [vmem:[%s945_s2] sm:$0xf]  ;;  %v523_v8 = vsub.s32 1, %v518_v4  ;;  %v531_v9 = vsub.s32 3, %v518_v4 }
  0x18   :  { %430 = vmatprep.subr.bf16.mxu0 %v651_v24  ;;  %471 = vmatprep.subr.bf16.mxu1 %v653_v25  ;;  %v520_v10 = vrot.slane %v515_v7, %v519_v5  ;;  %v528_v11 = vrot.slane %v515_v7, %v527_v6 }
  0x19   :  { %v524_v12 = vrot.slane %v515_v7, %v523_v8  ;;  %v532_v13 = vrot.slane %v515_v7, %v531_v9 }
  0x1b   :  { %431 = vmatpush1.bf16.msra.mxu0 %v655_v26  ;;  %472 = vmatpush1.bf16.msra.mxu1 %v656_v27 }
  0x1c   :  { %432 = vmatprep.subr.bf16.mxu0 %v657_v28  ;;  %473 = vmatprep.subr.bf16.mxu1 %v659_v29 }
  0x1f   :  { %433 = vmatpush1.bf16.msra.mxu0 %v661_v30  ;;  %474 = vmatpush1.bf16.msra.mxu1 %v662_v31 }
  0x20   :  { %434 = vmatprep.subr.bf16.mxu0 %v663_v32  ;;  %475 = vmatprep.subr.bf16.mxu1 %v665_v33 }
  0x23   :  { %435 = vmatpush1.bf16.msra.mxu0 %v667_v34  ;;  %476 = vmatpush1.bf16.msra.mxu1 %v668_v35 }
  0x24   :  { %436 = vmatprep.subr.bf16.mxu0 %v669_v36  ;;  %477 = vmatprep.subr.bf16.mxu1 %v671_v37 }
  0x27   :  { %437 = vmatpush1.bf16.msra.mxu0 %v673_v38  ;;  %478 = vmatpush1.bf16.msra.mxu1 %v674_v39 }
  0x28   :  { %438 = vmatprep.subr.bf16.mxu0 %v675_v40  ;;  %479 = vmatprep.subr.bf16.mxu1 %v677_v41 }
  0x2b   :  { %439 = vmatpush1.bf16.msra.mxu0 %v679_v42  ;;  %480 = vmatpush1.bf16.msra.mxu1 %v680_v43 }
  0x2c   :  { %440 = vmatprep.subr.bf16.mxu0 %v681_v44  ;;  %481 = vmatprep.subr.bf16.mxu1 %v683_v45 }
  0x2f   :  { %441 = vmatpush1.bf16.msra.mxu0 %v685_v48  ;;  %482 = vmatpush1.bf16.msra.mxu1 %v686_v49 }
  0x30   :  { %442 = vmatprep.subr.bf16.mxu0 %v687_v50  ;;  %483 = vmatprep.subr.bf16.mxu1 %v689_v51 }
  0x33   :  { %443 = vmatpush1.bf16.msra.mxu0 %v691_v52  ;;  %484 = vmatpush1.bf16.msra.mxu1 %v692_v53 }
  0x34   :  { %444 = vmatprep.subr.bf16.mxu0 %v693_v54  ;;  %485 = vmatprep.subr.bf16.mxu1 %v695_v55 }
  0x37   :  { %445 = vmatpush1.bf16.msra.mxu0 %v697_v56  ;;  %486 = vmatpush1.bf16.msra.mxu1 %v698_v57 }
  0x38   :  { %446 = vmatprep.subr.bf16.mxu0 %v699_v58  ;;  %487 = vmatprep.subr.bf16.mxu1 %v701_v59 }
  0x3b   :  { %447 = vmatpush1.bf16.msra.mxu0 %v703_v60  ;;  %488 = vmatpush1.bf16.msra.mxu1 %v704_v61 }
  0x3c   :  { %448 = vmatprep.subr.bf16.mxu0 %v705_v62  ;;  %489 = vmatprep.subr.bf16.mxu1 %v707_v63 }
  0x3f   :  { %449 = vmatpush1.bf16.msra.mxu0 %v709_v0  ;;  %490 = vmatpush1.bf16.msra.mxu1 %v710_v1 }
  0x42   :  { %451 = vmatmul.mubr.bf16.vlgmr.msra.gmra.mrb[0].mxu0 %v549_v2  ;;  %492 = vmatmul.mubr.bf16.vlgmr.msra.gmra.mrb[0].mxu1 %v549_v2 }
 0x115   :  { %v452_v14 = vpop.f32.mrb[0].mxu0  ;;  %v493_v15 = vpop.f32.mrb[0].mxu1 }
 0x116   :  { %v537_v16 = vadd.f32 %v520_v10, %v452_v14  ;;  %v539_v17 = vadd.f32 %v528_v11, %v493_v15  ;;  %v454_v18 = vpop.f32.mrb[1].mxu0  ;;  %v495_v19 = vpop.f32.mrb[1].mxu1 }
 0x117   :  { %v538_v20 = vadd.f32 %v524_v12, %v454_v18  ;;  %v540_v21 = vadd.f32 %v532_v13, %v495_v19  ;;  %v456_v22 = vpop.f32.mrb[2].mxu0  ;;  %v497_v23 = vpop.f32.mrb[2].mxu1 }
 0x118   :  { %541 = vst [vmem:[%s946_s3] sm:$0xff] %v537_v16  ;;  %543 = vst [vmem:[%s946_s3 + $0x10] sm:$0xff] %v539_v17  ;;  %v457_v24 = vpop.f32.mrb[3].mxu0  ;;  %v498_v25 = vpop.f32.mrb[3].mxu1 }
 0x119   :  { %542 = vst [vmem:[%s946_s3 + $0x8] sm:$0xff] %v538_v20  ;;  %544 = vst [vmem:[%s946_s3 + $0x18] sm:$0xff] %v540_v21 }

// kernel: _lambda_.27
= control target key start
LH: loop header
LB: loop body
LE: loop exit
PB: predicated region body
PF: predicated region fallthrough
CT: control target
= control target key end

     0   :  { %v440_v51 = vmov 1966171168   ;;  %v96_v53 = vlaneseq  ;;  %s672_s0 = inlined_call_operand.vmem [shape: f32[2,1,512], index: 0, kind: input, shape index: {}]   ;;  %s673_s1 = inlined_call_operand.vmem [shape: f32[512,10], index: 1, kind: input, shape index: {}]   ;;  %s674_s2 = inlined_call_operand.vmem [shape: f32[1,10], index: 2, kind: input, shape index: {}]   ;;  %s675_s3 = inlined_call_operand.hbm [shape: f32[2,10], index: 3, kind: output, shape index: {}]  }
   0x1   :  { %v35_v0 = vld [vmem:[%s673_s1 + $0x80] sm:$0xff]  ;;  %v36_v1 = vld [vmem:[%s673_s1 + $0x88] sm:$0xff]  ;;  %v37_v11 = vld [vmem:[%s673_s1 + $0x90] sm:$0xff]  ;;  %v94_v52 = vunpack.c.l.s4 %v440_v51 }
   0x2   :  { %v19_v2 = vld [vmem:[%s673_s1] sm:$0xff]  ;;  %v348_v3 = vpack.c.bf16 %v36_v1, %v35_v0  ;;  %v20_v4 = vld [vmem:[%s673_s1 + $0x8] sm:$0xff]  ;;  %v38_v13 = vld [vmem:[%s673_s1 + $0x98] sm:$0xff] }
   0x3   :  { %v67_v5 = vld [vmem:[%s673_s1 + $0x180] sm:$0xff]  ;;  %v68_v6 = vld [vmem:[%s673_s1 + $0x188] sm:$0xff]  ;;  %v350_v7 = vpack.c.bf16 %v20_v4, %v19_v2  ;;  %v21_v14 = vld [vmem:[%s673_s1 + $0x10] sm:$0xff]  ;;  %v352_v16 = vpack.c.bf16 %v38_v13, %v37_v11  ;;  %v95_v2 = vunpack.c.0.s8 %v94_v52 }
   0x4   :  { %v380_v8 = vpack.c.bf16 %v68_v6, %v67_v5  ;;  %v51_v9 = vld [vmem:[%s673_s1 + $0x100] sm:$0xff]  ;;  %v52_v10 = vld [vmem:[%s673_s1 + $0x108] sm:$0xff]  ;;  %349 = vmatprep.subr.bf16.mxu0 %v348_v3  ;;  %v22_v15 = vld [vmem:[%s673_s1 + $0x18] sm:$0xff]  ;;  %v97_v3 = vshrl.u32 %v96_v53, 7 }
   0x5   :  { %v382_v12 = vpack.c.bf16 %v52_v10, %v51_v9  ;;  %351 = vmatpush3.bf16.msra.mxu0 %v350_v7  ;;  %v354_v17 = vpack.c.bf16 %v22_v15, %v21_v14  ;;  %v69_v18 = vld [vmem:[%s673_s1 + $0x190] sm:$0xff]  ;;  %v70_v19 = vld [vmem:[%s673_s1 + $0x198] sm:$0xff]  ;;  %v39_v23 = vld [vmem:[%s673_s1 + $0xa0] sm:$0xff] }
   0x6   :  { %381 = vmatprep.subr.bf16.mxu1 %v380_v8  ;;  %v53_v20 = vld [vmem:[%s673_s1 + $0x110] sm:$0xff]  ;;  %v384_v21 = vpack.c.bf16 %v70_v19, %v69_v18  ;;  %v54_v22 = vld [vmem:[%s673_s1 + $0x118] sm:$0xff]  ;;  %v40_v24 = vld [vmem:[%s673_s1 + $0xa8] sm:$0xff]  ;;  %353 = vmatprep.subr.bf16.mxu0 %v352_v16 }
   0x7   :  { %383 = vmatpush3.bf16.msra.mxu1 %v382_v12  ;;  %v386_v25 = vpack.c.bf16 %v54_v22, %v53_v20  ;;  %v356_v26 = vpack.c.bf16 %v40_v24, %v39_v23  ;;  %v23_v27 = vld [vmem:[%s673_s1 + $0x20] sm:$0xff]  ;;  %v24_v28 = vld [vmem:[%s673_s1 + $0x28] sm:$0xff]  ;;  %v41_v35 = vld [vmem:[%s673_s1 + $0xb0] sm:$0xff]  ;;  %v98_v20 = vsub.s32 %v95_v2, %v97_v3 }
   0x8   :  { %v71_v29 = vld [vmem:[%s673_s1 + $0x1a0] sm:$0xff]  ;;  %385 = vmatprep.subr.bf16.mxu1 %v384_v21  ;;  %v72_v30 = vld [vmem:[%s673_s1 + $0x1a8] sm:$0xff]  ;;  %v358_v33 = vpack.c.bf16 %v24_v28, %v23_v27  ;;  %v42_v36 = vld [vmem:[%s673_s1 + $0xb8] sm:$0xff] }
   0x9   :  { %v55_v31 = vld [vmem:[%s673_s1 + $0x120] sm:$0xff]  ;;  %v56_v32 = vld [vmem:[%s673_s1 + $0x128] sm:$0xff]  ;;  %355 = vmatpush3.bf16.msra.mxu0 %v354_v17  ;;  %v388_v34 = vpack.c.bf16 %v72_v30, %v71_v29  ;;  %v25_v37 = vld [vmem:[%s673_s1 + $0x30] sm:$0xff]  ;;  %v360_v39 = vpack.c.bf16 %v42_v36, %v41_v35 }
   0xa   :  { %357 = vmatprep.subr.bf16.mxu0 %v356_v26  ;;  %v390_v38 = vpack.c.bf16 %v56_v32, %v55_v31  ;;  %v26_v40 = vld [vmem:[%s673_s1 + $0x38] sm:$0xff]  ;;  %v73_v41 = vld [vmem:[%s673_s1 + $0x1b0] sm:$0xff]  ;;  %v43_v46 = vld [vmem:[%s673_s1 + $0xc0] sm:$0xff] }
   0xb   :  { %387 = vmatpush3.bf16.msra.mxu1 %v386_v25  ;;  %v74_v42 = vld [vmem:[%s673_s1 + $0x1b8] sm:$0xff]  ;;  %v57_v44 = vld [vmem:[%s673_s1 + $0x130] sm:$0xff]  ;;  %v44_v47 = vld [vmem:[%s673_s1 + $0xc8] sm:$0xff]  ;;  %v362_v48 = vpack.c.bf16 %v26_v40, %v25_v37 }
   0xc   :  { %389 = vmatprep.subr.bf16.mxu1 %v388_v34  ;;  %v392_v43 = vpack.c.bf16 %v74_v42, %v73_v41  ;;  %v58_v45 = vld [vmem:[%s673_s1 + $0x138] sm:$0xff]  ;;  %v75_v49 = vld [vmem:[%s673_s1 + $0x1c0] sm:$0xff]  ;;  %v76_v50 = vld [vmem:[%s673_s1 + $0x1c8] sm:$0xff]  ;;  %v364_v55 = vpack.c.bf16 %v44_v47, %v43_v46 }
   0xd   :  { %359 = vmatpush3.bf16.msra.mxu0 %v358_v33  ;;  %v394_v54 = vpack.c.bf16 %v58_v45, %v57_v44  ;;  %v27_v56 = vld [vmem:[%s673_s1 + $0x40] sm:$0xff]  ;;  %v28_v57 = vld [vmem:[%s673_s1 + $0x48] sm:$0xff]  ;;  %v396_v59 = vpack.c.bf16 %v76_v50, %v75_v49  ;;  %v45_v61 = vld [vmem:[%s673_s1 + $0xd0] sm:$0xff] }
   0xe   :  { %361 = vmatprep.subr.bf16.mxu0 %v360_v39  ;;  %v59_v58 = vld [vmem:[%s673_s1 + $0x140] sm:$0xff]  ;;  %v60_v60 = vld [vmem:[%s673_s1 + $0x148] sm:$0xff]  ;;  %v46_v62 = vld [vmem:[%s673_s1 + $0xd8] sm:$0xff]  ;;  %v366_v1 = vpack.c.bf16 %v28_v57, %v27_v56 }
   0xf   :  { %391 = vmatpush3.bf16.msra.mxu1 %v390_v38  ;;  %v77_v63 = vld [vmem:[%s673_s1 + $0x1d0] sm:$0xff]  ;;  %v78_v0 = vld [vmem:[%s673_s1 + $0x1d8] sm:$0xff]  ;;  %v398_v4 = vpack.c.bf16 %v60_v60, %v59_v58  ;;  %v368_v5 = vpack.c.bf16 %v46_v62, %v45_v61  ;;  %v47_v11 = vld [vmem:[%s673_s1 + $0xe0] sm:$0xff] }
  0x10   :  { %393 = vmatprep.subr.bf16.mxu1 %v392_v43  ;;  %v29_v6 = vld [vmem:[%s673_s1 + $0x50] sm:$0xff]  ;;  %v30_v7 = vld [vmem:[%s673_s1 + $0x58] sm:$0xff]  ;;  %v400_v9 = vpack.c.bf16 %v78_v0, %v77_v63  ;;  %v48_v12 = vld [vmem:[%s673_s1 + $0xe8] sm:$0xff] }
  0x11   :  { %363 = vmatpush3.bf16.msra.mxu0 %v362_v48  ;;  %v61_v8 = vld [vmem:[%s673_s1 + $0x150] sm:$0xff]  ;;  %v62_v10 = vld [vmem:[%s673_s1 + $0x158] sm:$0xff]  ;;  %v31_v13 = vld [vmem:[%s673_s1 + $0x60] sm:$0xff]  ;;  %v370_v16 = vpack.c.bf16 %v30_v7, %v29_v6  ;;  %v372_v22 = vpack.c.bf16 %v48_v12, %v47_v11 }
  0x12   :  { %365 = vmatprep.subr.bf16.mxu0 %v364_v55  ;;  %v79_v14 = vld [vmem:[%s673_s1 + $0x1e0] sm:$0xff]  ;;  %v80_v15 = vld [vmem:[%s673_s1 + $0x1e8] sm:$0xff]  ;;  %v402_v21 = vpack.c.bf16 %v62_v10, %v61_v8  ;;  %v49_v23 = vld [vmem:[%s673_s1 + $0xf0] sm:$0xff] }
  0x13   :  { %395 = vmatpush3.bf16.msra.mxu1 %v394_v54  ;;  %v32_v17 = vld [vmem:[%s673_s1 + $0x68] sm:$0xff]  ;;  %v63_v18 = vld [vmem:[%s673_s1 + $0x160] sm:$0xff]  ;;  %v404_v24 = vpack.c.bf16 %v80_v15, %v79_v14  ;;  %v50_v25 = vld [vmem:[%s673_s1 + $0xf8] sm:$0xff] }
  0x14   :  { %397 = vmatprep.subr.bf16.mxu1 %v396_v59  ;;  %v64_v19 = vld [vmem:[%s673_s1 + $0x168] sm:$0xff]  ;;  %v415_v26 = vld.sshfl [vmem:[%s672_s0] sm:$0xff pattern:$0x75316420] }
  0x15   :  { %367 = vmatpush3.bf16.msra.mxu0 %v366_v1 }
  0x16   :  { %369 = vmatprep.subr.bf16.mxu0 %v368_v5 }
  0x17   :  { %399 = vmatpush3.bf16.msra.mxu1 %v398_v4 }
  0x18   :  { %401 = vmatprep.subr.bf16.mxu1 %v400_v9 }
  0x19   :  { %8 = vsyncpa [#allocation3], 0  ;;  %v81_v27 = vld [vmem:[%s673_s1 + $0x1f0] sm:$0xff]  ;;  %v82_v28 = vld [vmem:[%s673_s1 + $0x1f8] sm:$0xff]  ;;  %371 = vmatpush3.bf16.msra.mxu0 %v370_v16  ;;  %v374_v29 = vpack.c.bf16 %v32_v17, %v31_v13  ;;  %v406_v30 = vpack.c.bf16 %v64_v19, %v63_v18  ;;  %v376_v31 = vpack.c.bf16 %v50_v25, %v49_v23  ;;  %v100_v37 = vcombine.high %v415_v26, %v415_v26  ;;  %s441_s7 = smov [#allocation2]  }
  0x1a   :  { %373 = vmatprep.subr.bf16.mxu0 %v372_v22  ;;  %v33_v32 = vld [vmem:[%s673_s1 + $0x70] sm:$0xff]  ;;  %v34_v33 = vld [vmem:[%s673_s1 + $0x78] sm:$0xff]  ;;  %v408_v34 = vpack.c.bf16 %v82_v28, %v81_v27  ;;  %v107_v40 = vrot.slane %v415_v26, %v98_v20  ;;  %v277_v45 = vld [vmem:[%s674_s2] ss:$0 sm:$0xff]  ;;  %s269_s8 = sshll.u32 %s441_s7, 4  ;;  %vm261_vm0 = vcmask 74752   ;;  %s270_s8 = int_to_ptr.vmem [resolvable:$true] %s269_s8 }
  0x1b   :  { %403 = vmatpush3.bf16.msra.mxu1 %v402_v21  ;;  %v65_v35 = vld [vmem:[%s673_s1 + $0x170] sm:$0xff]  ;;  %v66_v36 = vld [vmem:[%s673_s1 + $0x178] sm:$0xff]  ;;  %v378_v38 = vpack.c.bf16 %v34_v33, %v33_v32  ;;  %v114_v39 = vrot.slane %v100_v37, %v98_v20  ;;  %s416_s9 = scalar_lea.vmem %s270_s8, 32  ;;  %p421_p1 = scmp.lt.s32.totalorder %s270_s8, %s270_s8 }
  0x1c   :  { %405 = vmatprep.subr.bf16.mxu1 %v404_v24  ;;  %v410_v41 = vpack.c.bf16 %v66_v36, %v65_v35  ;;  %v115_v43 = vcombine.high %v107_v40, %v107_v40  ;;  %p417_p0 = scmp.ne.s32.totalorder %s270_s8, %s416_s9  ;;  %p422_p2 = scmp.lt.s32.totalorder %s416_s9, %s416_s9 }
  0x1d   :  { %375 = vmatpush3.bf16.msra.mxu0 %v374_v29  ;;  %185 = vmatprep.mubr.f32.mxu0 %v114_v39  ;;  %v116_v42 = vcombine.high %v114_v39, %v114_v39 }
  0x1e   :  { %377 = vmatprep.subr.bf16.mxu0 %v376_v31  ;;  %p423_p3 = por %p422_p2, %p421_p1 }
  0x1f   :  { %407 = vmatpush3.bf16.msra.mxu1 %v406_v30  ;;  %255 = vmatprep.mubr.f32.mxu1 %v116_v42 }
  0x20   :  { %409 = vmatprep.subr.bf16.mxu1 %v408_v34  ;;  %p424_p4 = pnand %p423_p3, %p417_p0 }
  0x21   :  { %379 = vmatpush3.bf16.msra.mxu0 %v378_v38 }
  0x23   :  { %411 = vmatpush3.bf16.msra.mxu1 %v410_v41 }
  0x24   :  { %186 = vmatmul.mubr.f32.vlgmr.msra.gmra.mrb[0].mxu0 %v107_v40 }
  0x26   :  { %256 = vmatmul.mubr.f32.vlgmr.msra.gmra.mrb[0].mxu1 %v115_v43 }
  0xf7   :  { %v310_v44 = vpop.f32.mrb[0].mxu0 }
  0xf8   :  { %v311_v46 = vpop.f32.mrb[1].mxu0 }
  0xf9   :  { %v345_v47 = vpop.f32.mrb[0].mxu1  ;;  %v312_v48 = vadd.f32 %v311_v46, %v310_v44 }
  0xfa   :  { %v346_v49 = vpop.f32.mrb[1].mxu1 }
  0xfb   :  { %v347_v50 = vadd.f32 %v346_v49, %v345_v47  ;;  %v188_v51 = vadd.f32 %v312_v48, %v277_v45 }
  0xfd   :  { %v258_v52 = vadd.f32 %v347_v50, %v188_v51 }
  0xff   :  { %262 = vst.msk [vmem:[#allocation2] sm:$0x3] %vm261_vm0, %v258_v52 }
 0x100   :  { %427 = shalt.err (!%p424_p4)
}
 0x101   :  { %s428_s11 = scalar_lea.hbm %s675_s3, 32 }
 0x102   :  { %p429_p5 = scmp.ne.s32.totalorder %s675_s3, %s428_s11  ;;  %p432_p6 = scmp.lt.u32.totalorder %s428_s11, %s675_s3 }
 0x104   :  { %p434_p7 = pnand %p432_p6, %p429_p5 }
 0x106   :  { %437 = shalt.err (!%p434_p7)
}
 0x107   :  { %272 = dma.vmem_to_hbm [thread:$0]  %s270_s8, 32, %s675_s3, [#allocation3]  }
 0x108   :  { %438 = dma.done.wait [#allocation3], 32  }
 0x109   :  { %439 = vsyncadd [#allocation3], 4294967264 }
 0x10a   :  { %276 = vsyncpa [#allocation3], 1 }

// kernel: _lambda_.26
= control target key start
LH: loop header
LB: loop body
LE: loop exit
PB: predicated region body
PF: predicated region fallthrough
CT: control target
= control target key end

     0   :  { %s1802_s15 = smov 0   ;;  %s1804_s16 = smov 0   ;;  %s2014_s0 = inlined_call_operand.vmem [shape: bf16[8,4608], index: 0, kind: input, shape index: {}]   ;;  %s2015_s1 = inlined_call_operand.vmem [shape: bf16[4608,512], index: 1, kind: input, shape index: {}]   ;;  %s2016_s2 = inlined_call_operand.vmem [shape: f32[1,512], index: 2, kind: input, shape index: {}]   ;;  %s2017_s3 = inlined_call_operand.vmem [shape: f32[8,512], index: 3, kind: input, shape index: {}]   ;;  %s2018_s4 = inlined_call_operand.vmem [shape: f32[8,512], index: 4, kind: output, shape index: {}]  }
   0x1   :  { %s1806_s17 = smov 0  }
   0x2 LB: > { %s23_s18 = sadd.s32 1, %s1770_s16  ;;  %p1387_p0 = scmp.ge.s32.totalorder %s1774_s17, 1  ;;  %s1774_s17 = sphi %s1806_s17, %s14_s17   ;;  %s1770_s16 = sphi %s1804_s16, %s2020_s16   ;;  %s1766_s15 = sphi %s1802_s15, %s2019_s15  }
   0x3   : > { %p24_p1 = scmp.ge.s32.totalorder %s23_s18, 9  ;;  %p203_p2 = scmp.lt.s32.totalorder %s1774_s17, 10 }
   0x5   : > { %s2022_s18 = smov (%p24_p1, %s23_s18), 0  ;;  %p204_p3 = pnand %p1387_p0, %p203_p2 }
   0x6   : > { %s1388_s19 = sshll.u32 (!%p204_p3), %s1766_s15, 2  ;;  %s1390_s20 = sshll.u32 (!%p204_p3), %s1766_s15, 6 }
   0x7   : > { %207 = sbr.rel (%p204_p3) target bundleno = 386 (0x182), region = 36  ;;  %p247_p4 = scmp.lt.s32.totalorder (!%p204_p3), %s1388_s19, 35 }
   0x8   : > { %p255_p5 = scmp.lt.s32.totalorder (!%p204_p3), %s1390_s20, 575  ;;  %p1393_p6 = scmp.ne.s32.totalorder (!%p204_p3), %s1766_s15, 0 }
   0xe   : > { %s2024_s19 = smov (!%p247_p4, %s1388_s19), 35  ;;  %s2026_s20 = smov (!%p255_p5, %s1390_s20), 575 }
   0xf   : > { %s1389_s21 = sshll.u32 %s2024_s19, 2  ;;  %s1530_s25 = sshll.u32 %s2026_s20, 4  ;;  %v1776_v0 = vmov (!%p1393_p6), 0.0  }
  0x10   : > { %s1827_s24 = scalar_lea.vmem %s2014_s0, %s1389_s21  ;;  %s1832_s28 = scalar_lea.vmem %s2015_s1, %s1530_s25  ;;  %275 = vst [vmem:[#allocation2] sm:$0xff] (!%p1393_p6), %v1776_v0  ;;  %276 = vst [vmem:[#allocation2 + $0x8] sm:$0xff] (!%p1393_p6), %v1776_v0 }
  0x11   : > { %274 = sbr.rel (%p1393_p6) target bundleno = 24 (0x18), region = 40  ;;  %277 = vst [vmem:[#allocation2 + $0x10] sm:$0xff] (!%p1393_p6), %v1776_v0  ;;  %278 = vst [vmem:[#allocation2 + $0x18] sm:$0xff] (!%p1393_p6), %v1776_v0 }
  0x18 PF: > { %v1556_v1 = vld [vmem:[%s1832_s28 + $0x4] ss:$16 sps:$4 sm:$0xff]   ;;  %v1560_v3 = vld [vmem:[%s1832_s28] ss:$16 sps:$4 sm:$0xff]   ;;  %v284_v49 = vld [vmem:[%s1827_s24 + $0x8] sm:$0xff]  ;;  %p1526_p7 = scmp.ne.s32.totalorder %s1766_s15, 8 }
  0x19   : > { %v1558_v2 = vld [vmem:[%s1832_s28 + $0x204] ss:$16 sps:$4 sm:$0xff]   ;;  %1067 = vmatprep.subr.bf16.mxu0 %v1556_v1  ;;  %v1561_v4 = vld [vmem:[%s1832_s28 + $0x200] ss:$16 sps:$4 sm:$0xff]   ;;  %v1397_v52 = vcombine.high %v284_v49, %v284_v49 }
  0x1a   : > { %1108 = vmatprep.subr.bf16.mxu1 %v1558_v2  ;;  %v1562_v5 = vld [vmem:[%s1832_s28 + $0x24] ss:$16 sps:$4 sm:$0xff]   ;;  %1068 = vmatpush1.bf16.msra.mxu0 %v1560_v3  ;;  %v1566_v7 = vld [vmem:[%s1832_s28 + $0x20] ss:$16 sps:$4 sm:$0xff]  }
  0x1b   : > { %1109 = vmatpush1.bf16.msra.mxu1 %v1561_v4  ;;  %v1564_v6 = vld [vmem:[%s1832_s28 + $0x224] ss:$16 sps:$4 sm:$0xff]   ;;  %1069 = vmatprep.subr.bf16.mxu0 %v1562_v5  ;;  %v1567_v8 = vld [vmem:[%s1832_s28 + $0x220] ss:$16 sps:$4 sm:$0xff]   ;;  %v1658_v5 = vld [vmem:[%s1832_s28 + $0xc] ss:$16 sps:$4 sm:$0xff]  }
  0x1c   : > { %1110 = vmatprep.subr.bf16.mxu1 %v1564_v6  ;;  %v1568_v9 = vld [vmem:[%s1832_s28 + $0x44] ss:$16 sps:$4 sm:$0xff]   ;;  %v1572_v11 = vld [vmem:[%s1832_s28 + $0x40] ss:$16 sps:$4 sm:$0xff]   ;;  %1140 = vmatprep.mubr.bf16.mxu1 %v1397_v52  ;;  %v1661_v6 = vld [vmem:[%s1832_s28 + $0x20c] ss:$16 sps:$4 sm:$0xff]  }
  0x1d   : > { %v1570_v10 = vld [vmem:[%s1832_s28 + $0x244] ss:$16 sps:$4 sm:$0xff]   ;;  %v1573_v12 = vld [vmem:[%s1832_s28 + $0x240] ss:$16 sps:$4 sm:$0xff]  }
  0x1e   : > { %1070 = vmatpush1.bf16.msra.mxu0 %v1566_v7  ;;  %v1574_v13 = vld [vmem:[%s1832_s28 + $0x64] ss:$16 sps:$4 sm:$0xff]   ;;  %v1578_v15 = vld [vmem:[%s1832_s28 + $0x60] ss:$16 sps:$4 sm:$0xff]  }
  0x1f   : > { %1111 = vmatpush1.bf16.msra.mxu1 %v1567_v8  ;;  %1071 = vmatprep.subr.bf16.mxu0 %v1568_v9  ;;  %v1576_v14 = vld [vmem:[%s1832_s28 + $0x264] ss:$16 sps:$4 sm:$0xff]   ;;  %v1579_v16 = vld [vmem:[%s1832_s28 + $0x260] ss:$16 sps:$4 sm:$0xff]   ;;  %v1908_v8 = vcombine.low %v284_v49, %v284_v49  ;;  %v1656_v9 = vld [vmem:[%s1832_s28 + $0x8] ss:$16 sps:$4 sm:$0xff]  }
  0x20   : > { %1112 = vmatprep.subr.bf16.mxu1 %v1570_v10  ;;  %v1580_v17 = vld [vmem:[%s1832_s28 + $0x84] ss:$16 sps:$4 sm:$0xff]   ;;  %v1584_v19 = vld [vmem:[%s1832_s28 + $0x80] ss:$16 sps:$4 sm:$0xff]   ;;  %v1659_v10 = vld [vmem:[%s1832_s28 + $0x208] ss:$16 sps:$4 sm:$0xff]  }
  0x21   : > { %v1582_v18 = vld [vmem:[%s1832_s28 + $0x284] ss:$16 sps:$4 sm:$0xff]   ;;  %v1585_v20 = vld [vmem:[%s1832_s28 + $0x280] ss:$16 sps:$4 sm:$0xff]   ;;  %v1716_v49 = vld [vmem:[%s1832_s28 + $0x148] ss:$16 sps:$4 sm:$0xff]  }
  0x22   : > { %1072 = vmatpush1.bf16.msra.mxu0 %v1572_v11  ;;  %v1586_v21 = vld [vmem:[%s1832_s28 + $0xa4] ss:$16 sps:$4 sm:$0xff]   ;;  %v1590_v23 = vld [vmem:[%s1832_s28 + $0xa0] ss:$16 sps:$4 sm:$0xff]   ;;  %v1664_v11 = vld [vmem:[%s1832_s28 + $0x2c] ss:$16 sps:$4 sm:$0xff]  }
  0x23   : > { %1113 = vmatpush1.bf16.msra.mxu1 %v1573_v12  ;;  %1073 = vmatprep.subr.bf16.mxu0 %v1574_v13  ;;  %v1588_v22 = vld [vmem:[%s1832_s28 + $0x2a4] ss:$16 sps:$4 sm:$0xff]   ;;  %v1591_v24 = vld [vmem:[%s1832_s28 + $0x2a0] ss:$16 sps:$4 sm:$0xff]   ;;  %v1667_v12 = vld [vmem:[%s1832_s28 + $0x22c] ss:$16 sps:$4 sm:$0xff]  }
  0x24   : > { %1114 = vmatprep.subr.bf16.mxu1 %v1576_v14  ;;  %v1592_v25 = vld [vmem:[%s1832_s28 + $0xc4] ss:$16 sps:$4 sm:$0xff]   ;;  %v1596_v27 = vld [vmem:[%s1832_s28 + $0xc0] ss:$16 sps:$4 sm:$0xff]   ;;  %v1662_v13 = vld [vmem:[%s1832_s28 + $0x28] ss:$16 sps:$4 sm:$0xff]  }
  0x25   : > { %v1594_v26 = vld [vmem:[%s1832_s28 + $0x2c4] ss:$16 sps:$4 sm:$0xff]   ;;  %v1597_v28 = vld [vmem:[%s1832_s28 + $0x2c0] ss:$16 sps:$4 sm:$0xff]   ;;  %v1665_v14 = vld [vmem:[%s1832_s28 + $0x228] ss:$16 sps:$4 sm:$0xff]  }
  0x26   : > { %1074 = vmatpush1.bf16.msra.mxu0 %v1578_v15  ;;  %v1598_v29 = vld [vmem:[%s1832_s28 + $0xe4] ss:$16 sps:$4 sm:$0xff]   ;;  %v1602_v31 = vld [vmem:[%s1832_s28 + $0xe0] ss:$16 sps:$4 sm:$0xff]   ;;  %v1670_v15 = vld [vmem:[%s1832_s28 + $0x4c] ss:$16 sps:$4 sm:$0xff]  }
  0x27   : > { %1115 = vmatpush1.bf16.msra.mxu1 %v1579_v16  ;;  %1075 = vmatprep.subr.bf16.mxu0 %v1580_v17  ;;  %v1600_v30 = vld [vmem:[%s1832_s28 + $0x2e4] ss:$16 sps:$4 sm:$0xff]   ;;  %v1603_v32 = vld [vmem:[%s1832_s28 + $0x2e0] ss:$16 sps:$4 sm:$0xff]   ;;  %v1673_v16 = vld [vmem:[%s1832_s28 + $0x24c] ss:$16 sps:$4 sm:$0xff]  }
  0x28   : > { %1116 = vmatprep.subr.bf16.mxu1 %v1582_v18  ;;  %v1604_v33 = vld [vmem:[%s1832_s28 + $0x104] ss:$16 sps:$4 sm:$0xff]   ;;  %v1608_v35 = vld [vmem:[%s1832_s28 + $0x100] ss:$16 sps:$4 sm:$0xff]   ;;  %v1668_v17 = vld [vmem:[%s1832_s28 + $0x48] ss:$16 sps:$4 sm:$0xff]  }
  0x29   : > { %v1606_v34 = vld [vmem:[%s1832_s28 + $0x304] ss:$16 sps:$4 sm:$0xff]   ;;  %v1609_v36 = vld [vmem:[%s1832_s28 + $0x300] ss:$16 sps:$4 sm:$0xff]   ;;  %v1671_v18 = vld [vmem:[%s1832_s28 + $0x248] ss:$16 sps:$4 sm:$0xff]  }
  0x2a   : > { %1076 = vmatpush1.bf16.msra.mxu0 %v1584_v19  ;;  %v1610_v37 = vld [vmem:[%s1832_s28 + $0x124] ss:$16 sps:$4 sm:$0xff]   ;;  %v1614_v39 = vld [vmem:[%s1832_s28 + $0x120] ss:$16 sps:$4 sm:$0xff]   ;;  %v1676_v19 = vld [vmem:[%s1832_s28 + $0x6c] ss:$16 sps:$4 sm:$0xff]  }
  0x2b   : > { %1117 = vmatpush1.bf16.msra.mxu1 %v1585_v20  ;;  %1077 = vmatprep.subr.bf16.mxu0 %v1586_v21  ;;  %v1612_v38 = vld [vmem:[%s1832_s28 + $0x324] ss:$16 sps:$4 sm:$0xff]   ;;  %v1615_v40 = vld [vmem:[%s1832_s28 + $0x320] ss:$16 sps:$4 sm:$0xff]   ;;  %v1679_v20 = vld [vmem:[%s1832_s28 + $0x26c] ss:$16 sps:$4 sm:$0xff]  }
  0x2c   : > { %1118 = vmatprep.subr.bf16.mxu1 %v1588_v22  ;;  %v1616_v41 = vld [vmem:[%s1832_s28 + $0x144] ss:$16 sps:$4 sm:$0xff]   ;;  %v1620_v43 = vld [vmem:[%s1832_s28 + $0x140] ss:$16 sps:$4 sm:$0xff]   ;;  %v1674_v21 = vld [vmem:[%s1832_s28 + $0x68] ss:$16 sps:$4 sm:$0xff]  }
  0x2d   : > { %v1618_v42 = vld [vmem:[%s1832_s28 + $0x344] ss:$16 sps:$4 sm:$0xff]   ;;  %v1621_v44 = vld [vmem:[%s1832_s28 + $0x340] ss:$16 sps:$4 sm:$0xff]   ;;  %v1677_v22 = vld [vmem:[%s1832_s28 + $0x268] ss:$16 sps:$4 sm:$0xff]  }
  0x2e   : > { %1078 = vmatpush1.bf16.msra.mxu0 %v1590_v23  ;;  %v1622_v45 = vld [vmem:[%s1832_s28 + $0x164] ss:$16 sps:$4 sm:$0xff]   ;;  %v1626_v50 = vld [vmem:[%s1832_s28 + $0x160] ss:$16 sps:$4 sm:$0xff]   ;;  %v1682_v23 = vld [vmem:[%s1832_s28 + $0x8c] ss:$16 sps:$4 sm:$0xff]  }
  0x2f   : > { %1119 = vmatpush1.bf16.msra.mxu1 %v1591_v24  ;;  %1079 = vmatprep.subr.bf16.mxu0 %v1592_v25  ;;  %v1624_v46 = vld [vmem:[%s1832_s28 + $0x364] ss:$16 sps:$4 sm:$0xff]   ;;  %v1627_v51 = vld [vmem:[%s1832_s28 + $0x360] ss:$16 sps:$4 sm:$0xff]   ;;  %v1685_v24 = vld [vmem:[%s1832_s28 + $0x28c] ss:$16 sps:$4 sm:$0xff]  }
  0x30   : > { %1120 = vmatprep.subr.bf16.mxu1 %v1594_v26  ;;  %v283_v47 = vld [vmem:[%s1827_s24] sm:$0xff]  ;;  %v1680_v25 = vld [vmem:[%s1832_s28 + $0x88] ss:$16 sps:$4 sm:$0xff]  }
  0x31   : > { %v1882_v48 = vcombine.high %v283_v47, %v283_v47  ;;  %v1628_v53 = vld [vmem:[%s1832_s28 + $0x184] ss:$16 sps:$4 sm:$0xff]   ;;  %v1632_v55 = vld [vmem:[%s1832_s28 + $0x180] ss:$16 sps:$4 sm:$0xff]   ;;  %v1906_v7 = vcombine.low %v283_v47, %v283_v47  ;;  %v1683_v26 = vld [vmem:[%s1832_s28 + $0x288] ss:$16 sps:$4 sm:$0xff]  }
  0x32   : > { %1080 = vmatpush1.bf16.msra.mxu0 %v1596_v27  ;;  %v1630_v54 = vld [vmem:[%s1832_s28 + $0x384] ss:$16 sps:$4 sm:$0xff]   ;;  %v1633_v56 = vld [vmem:[%s1832_s28 + $0x380] ss:$16 sps:$4 sm:$0xff]   ;;  %v1688_v27 = vld [vmem:[%s1832_s28 + $0xac] ss:$16 sps:$4 sm:$0xff]  }
  0x33   : > { %1121 = vmatpush1.bf16.msra.mxu1 %v1597_v28  ;;  %1081 = vmatprep.subr.bf16.mxu0 %v1598_v29  ;;  %v1634_v57 = vld [vmem:[%s1832_s28 + $0x1a4] ss:$16 sps:$4 sm:$0xff]   ;;  %v1638_v59 = vld [vmem:[%s1832_s28 + $0x1a0] ss:$16 sps:$4 sm:$0xff]   ;;  %v1691_v28 = vld [vmem:[%s1832_s28 + $0x2ac] ss:$16 sps:$4 sm:$0xff]  }
  0x34   : > { %1122 = vmatprep.subr.bf16.mxu1 %v1600_v30  ;;  %1099 = vmatprep.mubr.bf16.mxu0 %v1882_v48  ;;  %v1636_v58 = vld [vmem:[%s1832_s28 + $0x3a4] ss:$16 sps:$4 sm:$0xff]   ;;  %v1639_v60 = vld [vmem:[%s1832_s28 + $0x3a0] ss:$16 sps:$4 sm:$0xff]   ;;  %v1686_v29 = vld [vmem:[%s1832_s28 + $0xa8] ss:$16 sps:$4 sm:$0xff]  }
  0x35   : > { %v1640_v61 = vld [vmem:[%s1832_s28 + $0x1c4] ss:$16 sps:$4 sm:$0xff]   ;;  %v1644_v63 = vld [vmem:[%s1832_s28 + $0x1c0] ss:$16 sps:$4 sm:$0xff]   ;;  %v1689_v30 = vld [vmem:[%s1832_s28 + $0x2a8] ss:$16 sps:$4 sm:$0xff]  }
  0x36   : > { %1082 = vmatpush1.bf16.msra.mxu0 %v1602_v31  ;;  %v1642_v62 = vld [vmem:[%s1832_s28 + $0x3c4] ss:$16 sps:$4 sm:$0xff]   ;;  %v1645_v0 = vld [vmem:[%s1832_s28 + $0x3c0] ss:$16 sps:$4 sm:$0xff]   ;;  %v1694_v31 = vld [vmem:[%s1832_s28 + $0xcc] ss:$16 sps:$4 sm:$0xff]  }
  0x37   : > { %1123 = vmatpush1.bf16.msra.mxu1 %v1603_v32  ;;  %1083 = vmatprep.subr.bf16.mxu0 %v1604_v33  ;;  %v1646_v1 = vld [vmem:[%s1832_s28 + $0x1e4] ss:$16 sps:$4 sm:$0xff]   ;;  %v1650_v3 = vld [vmem:[%s1832_s28 + $0x1e0] ss:$16 sps:$4 sm:$0xff]   ;;  %v1697_v32 = vld [vmem:[%s1832_s28 + $0x2cc] ss:$16 sps:$4 sm:$0xff]  }
  0x38   : > { %1124 = vmatprep.subr.bf16.mxu1 %v1606_v34  ;;  %v1648_v2 = vld [vmem:[%s1832_s28 + $0x3e4] ss:$16 sps:$4 sm:$0xff]   ;;  %v1651_v4 = vld [vmem:[%s1832_s28 + $0x3e0] ss:$16 sps:$4 sm:$0xff]   ;;  %v1692_v33 = vld [vmem:[%s1832_s28 + $0xc8] ss:$16 sps:$4 sm:$0xff]  }
  0x39   : > { %v1695_v34 = vld [vmem:[%s1832_s28 + $0x2c8] ss:$16 sps:$4 sm:$0xff]   ;;  %v1718_v47 = vld [vmem:[%s1832_s28 + $0x14c] ss:$16 sps:$4 sm:$0xff]  }
  0x3a   : > { %1084 = vmatpush1.bf16.msra.mxu0 %v1608_v35  ;;  %v1700_v35 = vld [vmem:[%s1832_s28 + $0xec] ss:$16 sps:$4 sm:$0xff]  }
  0x3b   : > { %1125 = vmatpush1.bf16.msra.mxu1 %v1609_v36  ;;  %1085 = vmatprep.subr.bf16.mxu0 %v1610_v37  ;;  %v1703_v36 = vld [vmem:[%s1832_s28 + $0x2ec] ss:$16 sps:$4 sm:$0xff]   ;;  %v1698_v37 = vld [vmem:[%s1832_s28 + $0xe8] ss:$16 sps:$4 sm:$0xff]  }
  0x3c   : > { %1126 = vmatprep.subr.bf16.mxu1 %v1612_v38  ;;  %v1701_v38 = vld [vmem:[%s1832_s28 + $0x2e8] ss:$16 sps:$4 sm:$0xff]  }
  0x3e   : > { %1086 = vmatpush1.bf16.msra.mxu0 %v1614_v39  ;;  %v1706_v39 = vld [vmem:[%s1832_s28 + $0x10c] ss:$16 sps:$4 sm:$0xff]  }
  0x3f   : > { %1127 = vmatpush1.bf16.msra.mxu1 %v1615_v40  ;;  %1087 = vmatprep.subr.bf16.mxu0 %v1616_v41  ;;  %v1709_v40 = vld [vmem:[%s1832_s28 + $0x30c] ss:$16 sps:$4 sm:$0xff]   ;;  %v1704_v41 = vld [vmem:[%s1832_s28 + $0x108] ss:$16 sps:$4 sm:$0xff]  }
  0x40   : > { %1128 = vmatprep.subr.bf16.mxu1 %v1618_v42  ;;  %v1707_v42 = vld [vmem:[%s1832_s28 + $0x308] ss:$16 sps:$4 sm:$0xff]  }
  0x42   : > { %1088 = vmatpush1.bf16.msra.mxu0 %v1620_v43  ;;  %v1712_v43 = vld [vmem:[%s1832_s28 + $0x12c] ss:$16 sps:$4 sm:$0xff]  }
  0x43   : > { %1129 = vmatpush1.bf16.msra.mxu1 %v1621_v44  ;;  %1089 = vmatprep.subr.bf16.mxu0 %v1622_v45  ;;  %v1715_v44 = vld [vmem:[%s1832_s28 + $0x32c] ss:$16 sps:$4 sm:$0xff]   ;;  %v1710_v45 = vld [vmem:[%s1832_s28 + $0x128] ss:$16 sps:$4 sm:$0xff]  }
  0x44   : > { %1130 = vmatprep.subr.bf16.mxu1 %v1624_v46  ;;  %v1713_v46 = vld [vmem:[%s1832_s28 + $0x328] ss:$16 sps:$4 sm:$0xff]  }
  0x46   : > { %1090 = vmatpush1.bf16.msra.mxu0 %v1626_v50  ;;  %v1719_v50 = vld [vmem:[%s1832_s28 + $0x348] ss:$16 sps:$4 sm:$0xff]  }
  0x47   : > { %1131 = vmatpush1.bf16.msra.mxu1 %v1627_v51  ;;  %1091 = vmatprep.subr.bf16.mxu0 %v1628_v53  ;;  %v1724_v51 = vld [vmem:[%s1832_s28 + $0x16c] ss:$16 sps:$4 sm:$0xff]   ;;  %v1722_v53 = vld [vmem:[%s1832_s28 + $0x168] ss:$16 sps:$4 sm:$0xff]  }
  0x48   : > { %1132 = vmatprep.subr.bf16.mxu1 %v1630_v54  ;;  %v1725_v54 = vld [vmem:[%s1832_s28 + $0x368] ss:$16 sps:$4 sm:$0xff]  }
  0x4a   : > { %1092 = vmatpush1.bf16.msra.mxu0 %v1632_v55  ;;  %v1730_v55 = vld [vmem:[%s1832_s28 + $0x18c] ss:$16 sps:$4 sm:$0xff]  }
  0x4b   : > { %1133 = vmatpush1.bf16.msra.mxu1 %v1633_v56  ;;  %1093 = vmatprep.subr.bf16.mxu0 %v1634_v57  ;;  %v1733_v56 = vld [vmem:[%s1832_s28 + $0x38c] ss:$16 sps:$4 sm:$0xff]   ;;  %v1728_v57 = vld [vmem:[%s1832_s28 + $0x188] ss:$16 sps:$4 sm:$0xff]  }
  0x4c   : > { %1134 = vmatprep.subr.bf16.mxu1 %v1636_v58  ;;  %v1731_v58 = vld [vmem:[%s1832_s28 + $0x388] ss:$16 sps:$4 sm:$0xff]  }
  0x4e   : > { %1094 = vmatpush1.bf16.msra.mxu0 %v1638_v59  ;;  %v1736_v59 = vld [vmem:[%s1832_s28 + $0x1ac] ss:$16 sps:$4 sm:$0xff]  }
  0x4f   : > { %1135 = vmatpush1.bf16.msra.mxu1 %v1639_v60  ;;  %1095 = vmatprep.subr.bf16.mxu0 %v1640_v61  ;;  %v1739_v60 = vld [vmem:[%s1832_s28 + $0x3ac] ss:$16 sps:$4 sm:$0xff]   ;;  %v1734_v61 = vld [vmem:[%s1832_s28 + $0x1a8] ss:$16 sps:$4 sm:$0xff]  }
  0x50   : > { %1136 = vmatprep.subr.bf16.mxu1 %v1642_v62  ;;  %v1737_v62 = vld [vmem:[%s1832_s28 + $0x3a8] ss:$16 sps:$4 sm:$0xff]  }
  0x52   : > { %1096 = vmatpush1.bf16.msra.mxu0 %v1644_v63  ;;  %v1742_v63 = vld [vmem:[%s1832_s28 + $0x1cc] ss:$16 sps:$4 sm:$0xff]  }
  0x53   : > { %1137 = vmatpush1.bf16.msra.mxu1 %v1645_v0  ;;  %1097 = vmatprep.subr.bf16.mxu0 %v1646_v1  ;;  %v1745_v0 = vld [vmem:[%s1832_s28 + $0x3cc] ss:$16 sps:$4 sm:$0xff]   ;;  %v1740_v1 = vld [vmem:[%s1832_s28 + $0x1c8] ss:$16 sps:$4 sm:$0xff]  }
  0x54   : > { %1138 = vmatprep.subr.bf16.mxu1 %v1648_v2  ;;  %v1743_v2 = vld [vmem:[%s1832_s28 + $0x3c8] ss:$16 sps:$4 sm:$0xff]  }
  0x56   : > { %1098 = vmatpush1.bf16.msra.mxu0 %v1650_v3  ;;  %v1748_v3 = vld [vmem:[%s1832_s28 + $0x1ec] ss:$16 sps:$4 sm:$0xff]  }
  0x57   : > { %1139 = vmatpush1.bf16.msra.mxu1 %v1651_v4  ;;  %1149 = vmatprep.subr.bf16.mxu0 %v1658_v5  ;;  %v1751_v4 = vld [vmem:[%s1832_s28 + $0x3ec] ss:$16 sps:$4 sm:$0xff]   ;;  %v1746_v5 = vld [vmem:[%s1832_s28 + $0x1e8] ss:$16 sps:$4 sm:$0xff]  }
  0x58   : > { %1190 = vmatprep.subr.bf16.mxu1 %v1661_v6  ;;  %v1749_v6 = vld [vmem:[%s1832_s28 + $0x3e8] ss:$16 sps:$4 sm:$0xff]  }
  0x59   : > { %1100 = vmatmul.mubr.bf16.vlgmr.msra.gmra.mrb[0].mxu0 %v1906_v7 }
  0x5a   : > { %1141 = vmatmul.mubr.bf16.vlgmr.msra.gmra.mrb[0].mxu1 %v1908_v8  ;;  %1150 = vmatpush1.bf16.msra.mxu0 %v1656_v9 }
  0x5b   : > { %1191 = vmatpush1.bf16.msra.mxu1 %v1659_v10  ;;  %1151 = vmatprep.subr.bf16.mxu0 %v1664_v11  ;;  %v279_v10 = vld [vmem:[#allocation2] sm:$0xff] }
  0x5c   : > { %1192 = vmatprep.subr.bf16.mxu1 %v1667_v12  ;;  %1181 = vmatprep.mubr.bf16.mxu0 %v1882_v48  ;;  %v1721_v48 = vld [vmem:[%s1832_s28 + $0x34c] ss:$16 sps:$4 sm:$0xff]  }
  0x5d   : > { %1222 = vmatprep.mubr.bf16.mxu1 %v1397_v52  ;;  %v1727_v52 = vld [vmem:[%s1832_s28 + $0x36c] ss:$16 sps:$4 sm:$0xff]  }
  0x5e   : > { %1152 = vmatpush1.bf16.msra.mxu0 %v1662_v13 }
  0x5f   : > { %1193 = vmatpush1.bf16.msra.mxu1 %v1665_v14  ;;  %1153 = vmatprep.subr.bf16.mxu0 %v1670_v15  ;;  %v280_v14 = vld [vmem:[#allocation2 + $0x8] sm:$0xff] }
  0x60   : > { %1194 = vmatprep.subr.bf16.mxu1 %v1673_v16 }
  0x62   : > { %1154 = vmatpush1.bf16.msra.mxu0 %v1668_v17 }
  0x63   : > { %1195 = vmatpush1.bf16.msra.mxu1 %v1671_v18  ;;  %1155 = vmatprep.subr.bf16.mxu0 %v1676_v19 }
  0x64   : > { %1196 = vmatprep.subr.bf16.mxu1 %v1679_v20 }
  0x66   : > { %1156 = vmatpush1.bf16.msra.mxu0 %v1674_v21 }
  0x67   : > { %1197 = vmatpush1.bf16.msra.mxu1 %v1677_v22  ;;  %1157 = vmatprep.subr.bf16.mxu0 %v1682_v23 }
  0x68   : > { %1198 = vmatprep.subr.bf16.mxu1 %v1685_v24 }
  0x6a   : > { %1158 = vmatpush1.bf16.msra.mxu0 %v1680_v25 }
  0x6b   : > { %1199 = vmatpush1.bf16.msra.mxu1 %v1683_v26  ;;  %1159 = vmatprep.subr.bf16.mxu0 %v1688_v27  ;;  %v282_v26 = vld [vmem:[#allocation2 + $0x18] sm:$0xff] }
  0x6c   : > { %1200 = vmatprep.subr.bf16.mxu1 %v1691_v28 }
  0x6e   : > { %1160 = vmatpush1.bf16.msra.mxu0 %v1686_v29 }
  0x6f   : > { %1201 = vmatpush1.bf16.msra.mxu1 %v1689_v30  ;;  %1161 = vmatprep.subr.bf16.mxu0 %v1694_v31 }
  0x70   : > { %1202 = vmatprep.subr.bf16.mxu1 %v1697_v32 }
  0x72   : > { %1162 = vmatpush1.bf16.msra.mxu0 %v1692_v33 }
  0x73   : > { %1203 = vmatpush1.bf16.msra.mxu1 %v1695_v34  ;;  %1163 = vmatprep.subr.bf16.mxu0 %v1700_v35  ;;  %v1249_v35 = vlaneseq (!%p1526_p7) }
  0x74   : > { %1204 = vmatprep.subr.bf16.mxu1 %v1703_v36 }
  0x75   : > { %v1250_v36 = vshrl.u32 (!%p1526_p7), %v1249_v35, 7 }
  0x76   : > { %1164 = vmatpush1.bf16.msra.mxu0 %v1698_v37  ;;  %v1247_v37 = vld [vmem:[%s2016_s2] sm:$0xf] (!%p1526_p7) }
  0x77   : > { %1205 = vmatpush1.bf16.msra.mxu1 %v1701_v38  ;;  %1165 = vmatprep.subr.bf16.mxu0 %v1706_v39  ;;  %v1251_v39 = vsub.s32 (!%p1526_p7), 0, %v1250_v36 }
  0x78   : > { %1206 = vmatprep.subr.bf16.mxu1 %v1709_v40  ;;  %v1255_v40 = vsub.s32 (!%p1526_p7), 1, %v1250_v36 }
  0x7a   : > { %1166 = vmatpush1.bf16.msra.mxu0 %v1704_v41  ;;  %v1259_v41 = vsub.s32 (!%p1526_p7), 2, %v1250_v36 }
  0x7b   : > { %1207 = vmatpush1.bf16.msra.mxu1 %v1707_v42  ;;  %1167 = vmatprep.subr.bf16.mxu0 %v1712_v43  ;;  %v1263_v42 = vsub.s32 (!%p1526_p7), 3, %v1250_v36 }
  0x7c   : > { %1208 = vmatprep.subr.bf16.mxu1 %v1715_v44 }
  0x7e   : > { %1168 = vmatpush1.bf16.msra.mxu0 %v1710_v45 }
  0x7f   : > { %1209 = vmatpush1.bf16.msra.mxu1 %v1713_v46  ;;  %1169 = vmatprep.subr.bf16.mxu0 %v1718_v47  ;;  %v1252_v46 = vrot.slane (!%p1526_p7), %v1247_v37, %v1251_v39  ;;  %v1273_v47 = vld [vmem:[%s2017_s3] sm:$0xff] (!%p1526_p7) }
  0x80   : > { %1210 = vmatprep.subr.bf16.mxu1 %v1721_v48  ;;  %v1256_v48 = vrot.slane (!%p1526_p7), %v1247_v37, %v1255_v40 }
  0x82   : > { %1170 = vmatpush1.bf16.msra.mxu0 %v1716_v49  ;;  %v1260_v49 = vrot.slane (!%p1526_p7), %v1247_v37, %v1259_v41 }
  0x83   : > { %1211 = vmatpush1.bf16.msra.mxu1 %v1719_v50  ;;  %1171 = vmatprep.subr.bf16.mxu0 %v1724_v51  ;;  %v1264_v50 = vrot.slane (!%p1526_p7), %v1247_v37, %v1263_v42  ;;  %v1274_v51 = vld [vmem:[%s2017_s3 + $0x8] sm:$0xff] (!%p1526_p7) }
  0x84   : > { %1212 = vmatprep.subr.bf16.mxu1 %v1727_v52  ;;  %v1275_v52 = vld [vmem:[%s2017_s3 + $0x10] sm:$0xff] (!%p1526_p7) }
  0x86   : > { %1172 = vmatpush1.bf16.msra.mxu0 %v1722_v53  ;;  %v1276_v53 = vld [vmem:[%s2017_s3 + $0x18] sm:$0xff] (!%p1526_p7) }
  0x87   : > { %1213 = vmatpush1.bf16.msra.mxu1 %v1725_v54  ;;  %1173 = vmatprep.subr.bf16.mxu0 %v1730_v55 }
  0x88   : > { %1214 = vmatprep.subr.bf16.mxu1 %v1733_v56 }
  0x8a   : > { %1174 = vmatpush1.bf16.msra.mxu0 %v1728_v57 }
  0x8b   : > { %1215 = vmatpush1.bf16.msra.mxu1 %v1731_v58  ;;  %1175 = vmatprep.subr.bf16.mxu0 %v1736_v59 }
  0x8c   : > { %1216 = vmatprep.subr.bf16.mxu1 %v1739_v60 }
  0x8e   : > { %1176 = vmatpush1.bf16.msra.mxu0 %v1734_v61 }
  0x8f   : > { %1217 = vmatpush1.bf16.msra.mxu1 %v1737_v62  ;;  %1177 = vmatprep.subr.bf16.mxu0 %v1742_v63 }
  0x90   : > { %1218 = vmatprep.subr.bf16.mxu1 %v1745_v0 }
  0x92   : > { %1178 = vmatpush1.bf16.msra.mxu0 %v1740_v1 }
  0x93   : > { %1219 = vmatpush1.bf16.msra.mxu1 %v1743_v2  ;;  %1179 = vmatprep.subr.bf16.mxu0 %v1748_v3 }
  0x94   : > { %1220 = vmatprep.subr.bf16.mxu1 %v1751_v4 }
  0x96   : > { %1180 = vmatpush1.bf16.msra.mxu0 %v1746_v5 }
  0x97   : > { %1221 = vmatpush1.bf16.msra.mxu1 %v1749_v6 }
  0x99   : > { %1182 = vmatmul.mubr.bf16.vlgmr.msra.gmra.mrb[4].mxu0 %v1906_v7  ;;  %v281_v7 = vld [vmem:[#allocation2 + $0x10] sm:$0xff] }
  0x9a   : > { %1223 = vmatmul.mubr.bf16.vlgmr.msra.gmra.mrb[4].mxu1 %v1908_v8 }
 0x12c   : > { %v1101_v9 = vpop.f32.mrb[0].mxu0 }
 0x12d   : > { %v1142_v11 = vpop.f32.mrb[0].mxu1  ;;  %v1103_v13 = vpop.f32.mrb[1].mxu0 }
 0x12e   : > { %v1143_v12 = vadd.f32 %v1142_v11, %v1101_v9  ;;  %v1144_v15 = vpop.f32.mrb[1].mxu1  ;;  %v1105_v17 = vpop.f32.mrb[2].mxu0 }
 0x12f   : > { %v1145_v16 = vadd.f32 %v1144_v15, %v1103_v13  ;;  %v1146_v18 = vpop.f32.mrb[2].mxu1  ;;  %v1106_v20 = vpop.f32.mrb[3].mxu0 }
 0x130   : > { %v1231_v19 = vadd.f32 %v1143_v12, %v279_v10  ;;  %v1147_v21 = vpop.f32.mrb[3].mxu1 }
 0x131   : > { %v1232_v22 = vadd.f32 %v1145_v16, %v280_v14 }
 0x132   : > { %1235 = vst [vmem:[#allocation2] sm:$0xff] %v1231_v19 }
 0x133   : > { %1236 = vst [vmem:[#allocation2 + $0x8] sm:$0xff] %v1232_v22 }
 0x139   : > { %v1243_v38 = vld [vmem:[#allocation2] sm:$0xff] (!%p1526_p7) }
 0x13a   : > { %v1244_v43 = vld [vmem:[#allocation2 + $0x8] sm:$0xff] (!%p1526_p7)  ;;  %v1269_v54 = vadd.f32 (!%p1526_p7), %v1252_v46, %v1243_v38 }
 0x13b   : > { %v1270_v55 = vadd.f32 (!%p1526_p7), %v1256_v48, %v1244_v43 }
 0x13c   : > { %v1277_v58 = vadd.f32 (!%p1526_p7), %v1273_v47, %v1269_v54 }
 0x13d   : > { %v1278_v59 = vadd.f32 (!%p1526_p7), %v1274_v51, %v1270_v55 }
 0x13e   : > { %v1281_v62 = vmax.f32 (!%p1526_p7), %v1277_v58, 0.0 }
 0x13f   : > { %v1282_v63 = vmax.f32 (!%p1526_p7), %v1278_v59, 0.0 }
 0x140   : > { %1285 = vst [vmem:[%s2018_s4] sm:$0xff] (!%p1526_p7), %v1281_v62 }
 0x141   : > { %1286 = vst [vmem:[%s2018_s4 + $0x8] sm:$0xff] (!%p1526_p7), %v1282_v63 }
 0x16c   : > { %v1183_v23 = vpop.f32.mrb[4].mxu0 }
 0x16d   : > { %v1224_v24 = vpop.f32.mrb[4].mxu1  ;;  %v1185_v25 = vpop.f32.mrb[5].mxu0  ;;  %1242 = sbr.rel (%p1526_p7) target bundleno = 386 (0x182), region = 44 }
 0x16e   : > { %v1225_v8 = vadd.f32 %v1224_v24, %v1183_v23  ;;  %v1226_v27 = vpop.f32.mrb[5].mxu1  ;;  %v1187_v29 = vpop.f32.mrb[6].mxu0 }
 0x16f   : > { %v1227_v28 = vadd.f32 %v1226_v27, %v1185_v25  ;;  %v1228_v30 = vpop.f32.mrb[6].mxu1  ;;  %v1188_v32 = vpop.f32.mrb[7].mxu0 }
 0x170   : > { %v1233_v31 = vadd.f32 %v1225_v8, %v281_v7  ;;  %v1229_v33 = vpop.f32.mrb[7].mxu1 }
 0x171   : > { %v1234_v34 = vadd.f32 %v1227_v28, %v282_v26 }
 0x172   : > { %1237 = vst [vmem:[#allocation2 + $0x10] sm:$0xff] %v1233_v31 }
 0x173   : > { %1238 = vst [vmem:[#allocation2 + $0x18] sm:$0xff] %v1234_v34 }
 0x179   : > { %v1245_v44 = vld [vmem:[#allocation2 + $0x10] sm:$0xff] }
 0x17a   : > { %v1246_v45 = vld [vmem:[#allocation2 + $0x18] sm:$0xff]  ;;  %v1271_v56 = vadd.f32 %v1260_v49, %v1245_v44 }
 0x17b   : > { %v1272_v57 = vadd.f32 %v1264_v50, %v1246_v45 }
 0x17c   : > { %v1279_v60 = vadd.f32 %v1275_v52, %v1271_v56 }
 0x17d   : > { %v1280_v61 = vadd.f32 %v1276_v53, %v1272_v57 }
 0x17e   : > { %v1283_v0 = vmax.f32 %v1279_v60, 0.0 }
 0x17f   : > { %v1284_v1 = vmax.f32 %v1280_v61, 0.0 }
 0x180   : > { %1287 = vst [vmem:[%s2018_s4 + $0x10] sm:$0xff] %v1283_v0 }
 0x181   : > { %1288 = vst [vmem:[%s2018_s4 + $0x18] sm:$0xff] %v1284_v1 }
 0x182 PF: > { %s14_s17 = sadd.s32 1, %s1774_s17   ;;  %s2019_s15 = smov %s1770_s16 }
 0x183   : > { %p11_p8 = scmp.ge.s32.totalorder %s14_s17, 11   ;;  %s2020_s16 = smov %s2022_s18 }
 0x185   :  { %13 = sbr.rel (!%p11_p8) target bundleno = 2 (0x2), region = 80 }

</bundles_post_ra>
